<compile_context>
chip_gen: v7x
topology: tpu7x:2x2x1
jax: 0.10.0
libtpu: 0.0.40
codegen_flags: <defaults>
</compile_context>

<pallas_src>
import jax
import jax.numpy as jnp
from jax.experimental import pallas as pl
from jax.experimental.pallas import tpu as pltpu


def _round_up(a, m):
    return ((a + m - 1) // m) * m


def _is_dual_tensorcore():
    # v7x / v5p / v4 have 2 TensorCores per chip; v5e / v6e have 1.
    try:
        kind = jax.devices()[0].device_kind.lower()
        return ("v7" in kind) or ("v5p" in kind) or ("v4" in kind)
    except Exception:
        return False


# ----------------------------------------------------------------------------- kernel
def make_qdist_kernel(NA, S, N, Ne, H):
    """NA = n_agents * dist_N, S = state dim, Ne = env taus, H = hidden_dim."""

    def qdist_kernel(
        x_ref, pis_ref,
        wf1_ref, bf1_ref, wf2_ref, bf2_ref, wf3_ref, bf3_ref,
        wc_ref, bc_ref, wq1_ref, bq1_ref, wq2_ref, bq2_ref,
        scat_ref,
        out_ref,
    ):
        f32 = jnp.float32
        bf16 = jnp.bfloat16
        relu = lambda a: jnp.maximum(a, 0.0)
        # bf16 MXU operands, f32 accumulation, f32 elementwise everywhere else.
        mm = lambda a, w_ref: jnp.dot(a.astype(bf16), w_ref[...],
                                      preferred_element_type=f32)

        x = x_ref[...]                      # (Bt, NA + S + Ne)  [agent_qs | state | taus]
        Bt = x.shape[0]
        aq = x[:, :NA]                      # (Bt, NA)
        aqst = x[:, :NA + S]                # (Bt, NA + S)
        taus = x[:, NA + S:]                # (Bt, Ne)

        # ---- fused hypernets (weight1 / weight2 / V) + Qjt_embed ----------------
        h1 = relu(mm(aqst, wf1_ref) + bf1_ref[...])          # (Bt, 4H)
        h2 = relu(mm(h1, wf2_ref) + bf2_ref[...])            # (Bt, 4H)
        hyp = mm(h2, wf3_ref) + bf3_ref[...]                  # (Bt, 128) [w1|w2|v|pad]
        w1 = jnp.abs(hyp[:, :NA])                              # (Bt, NA)
        w2 = jnp.abs(hyp[:, NA:2 * NA])                        # (Bt, NA)
        v = hyp[:, 2 * NA:2 * NA + N]                          # (Bt, N)
        e = h2[:, 3 * H:]                                      # (Bt, H)  Qjt_embed output

        # ---- cos embedding of taus + Qjt head, flattened to 2-D (Bt*Ne, .) ------
        ct = jnp.cos(taus[:, :, None] * pis_ref[...][None, :, :])      # (Bt, Ne, C)
        ct2 = ct.reshape(Bt * Ne, ct.shape[-1])                        # (Bt*Ne, C)
        cemb = relu(mm(ct2, wc_ref) + bc_ref[...])                     # (Bt*Ne, H)
        # broadcast-multiply by e directly (no materialized e_rep)
        mix = (cemb.reshape(Bt, Ne, H) * e[:, None, :]).reshape(Bt * Ne, H)
        q1 = relu(mm(mix, wq1_ref) + bq1_ref[...])                     # (Bt*Ne, H)
        # final Linear(H, 1) as an f32 lane (XLU) reduction
        qjt = jnp.sum((q1 * wq2_ref[...]).reshape(Bt, Ne, H), axis=-1) + bq2_ref[...]  # (Bt, Ne)

        # ---- single fused lane-dense output scatter (f32, exact sums) -----------
        # columns: [q_tot row-major (N, Ne) | q_tot2 (N) | zero pad to 128]
        packed = jnp.concatenate([w1 * aq, w2 * aq, v, qjt], axis=-1)   # (Bt, 2NA+N+Ne)
        out_ref[...] = jnp.dot(packed, scat_ref[...], preferred_element_type=f32)

    return qdist_kernel


PARAM_ORDER = [
    'pis',
    'wf1', 'bf1', 'wf2', 'bf2', 'wf3', 'bf3',
    'wc', 'bc', 'wq1', 'bq1', 'wq2', 'bq2',
    'scat',
]


# ----------------------------------------------------------------------------- params
def init_params(key, S, A, N, C, H):
    """Raw per-layer weights, mirroring the torch module layout (all f32)."""
    f32 = jnp.float32

    def lin(k, fin, fout):
        kw, kb = jax.random.split(k)
        w = jax.random.normal(kw, (fin, fout), f32) * (fin ** -0.5)
        b = jax.random.normal(kb, (1, fout), f32) * 0.01
        return w, b

    ks = jax.random.split(key, 14)
    wa1, ba1 = lin(ks[0], S, H); wa2, ba2 = lin(ks[1], H, H); wa3, ba3 = lin(ks[2], H, A * N)
    wb1, bb1 = lin(ks[3], S, H); wb2, bb2 = lin(ks[4], H, H); wb3, bb3 = lin(ks[5], H, A * N)
    wv1, bv1 = lin(ks[6], S, H); wv2, bv2 = lin(ks[7], H, H); wv3, bv3 = lin(ks[8], H, N)
    wc, bc = lin(ks[9], C, H)
    wq1, bq1 = lin(ks[10], H, H)
    wq2, bq2 = lin(ks[11], H, 1)
    we1, be1 = lin(ks[12], N * A + S, H)
    we2, be2 = lin(ks[13], H, H)

    pis = (jnp.pi * jnp.arange(C, dtype=f32)).reshape(1, C)

    return dict(
        pis=pis,
        wa1=wa1, ba1=ba1, wa2=wa2, ba2=ba2, wa3=wa3, ba3=ba3,
        wb1=wb1, bb1=bb1, wb2=wb2, bb2=bb2, wb3=wb3, bb3=bb3,
        wv1=wv1, bv1=bv1, wv2=wv2, bv2=bv2, wv3=wv3, bv3=bv3,
        wc=wc, bc=bc, wq1=wq1, bq1=bq1, wq2=wq2, bq2=bq2,
        we1=we1, be1=be1, we2=we2, be2=be2,
    )


def pack_kernel_params(p, S, A, N, C, H, Ne, mxu_dtype=jnp.bfloat16):
    """Build the fused / packed kernel-side parameter arrays."""
    f32 = jnp.float32
    NA = N * A
    P = N * Ne + N
    P_pad = _round_up(max(P, 1), 128)
    O3 = 2 * NA + N
    O3_pad = _round_up(max(O3, 1), 128)

    # ---- fused first layer: [agent_qs | state] -> [hyp1 | hyp2 | V | embed] (4H)
    zpad = jnp.zeros((NA, H), f32)
    wf1 = jnp.concatenate([
        jnp.concatenate([zpad, p['wa1']], axis=0),
        jnp.concatenate([zpad, p['wb1']], axis=0),
        jnp.concatenate([zpad, p['wv1']], axis=0),
        p['we1'],
    ], axis=1)                                                              # (NA+S, 4H)
    bf1 = jnp.concatenate([p['ba1'], p['bb1'], p['bv1'], p['be1']], axis=1)  # (1, 4H)

    # ---- fused block-diagonal second layer (4H, 4H)
    def blkdiag(ms):
        R = sum(m.shape[0] for m in ms)
        Cc = sum(m.shape[1] for m in ms)
        out = jnp.zeros((R, Cc), f32)
        r = c = 0
        for m in ms:
            out = out.at[r:r + m.shape[0], c:c + m.shape[1]].set(m)
            r += m.shape[0]; c += m.shape[1]
        return out
    wf2 = blkdiag([p['wa2'], p['wb2'], p['wv2'], p['we2']])                  # (4H, 4H)
    bf2 = jnp.concatenate([p['ba2'], p['bb2'], p['bv2'], p['be2']], axis=1)  # (1, 4H)

    # ---- fused third layer (hypernet heads only), 128-lane padded output
    wf3 = jnp.zeros((4 * H, O3_pad), f32)
    wf3 = wf3.at[0:H, 0:NA].set(p['wa3'])
    wf3 = wf3.at[H:2 * H, NA:2 * NA].set(p['wb3'])
    wf3 = wf3.at[2 * H:3 * H, 2 * NA:2 * NA + N].set(p['wv3'])
    bf3 = jnp.concatenate([p['ba3'], p['bb3'], p['bv3'],
                           jnp.zeros((1, O3_pad - O3), f32)], axis=1)        # (1, 128)

    # ---- single fused 0/1 output scatter matrix (2NA+N+Ne, 128) ----
    summat = jnp.repeat(jnp.eye(N, dtype=f32), A, axis=0)                    # (NA, N)
    r1 = jnp.repeat(jnp.eye(N, dtype=f32), Ne, axis=1)                       # (N, N*Ne)
    b_w1 = jnp.concatenate([summat @ r1, jnp.zeros((NA, N), f32)], axis=1)   # w1*aq -> q_tot
    b_w2 = jnp.concatenate([jnp.zeros((NA, N * Ne), f32), summat], axis=1)   # w2*aq -> q_tot2
    b_v = jnp.concatenate([r1, jnp.eye(N, dtype=f32)], axis=1)               # v -> both
    b_q = jnp.concatenate([jnp.tile(jnp.eye(Ne, dtype=f32), (1, N)),
                           jnp.zeros((Ne, N), f32)], axis=1)                 # qjt -> q_tot
    scat = jnp.concatenate([b_w1, b_w2, b_v, b_q], axis=0)                   # (80, P)
    scat = jnp.pad(scat, ((0, 0), (0, P_pad - P)))                           # (80, 128)

    d = mxu_dtype
    return dict(
        pis=p['pis'],
        wf1=wf1.astype(d), bf1=bf1,
        wf2=wf2.astype(d), bf2=bf2,
        wf3=wf3.astype(d), bf3=bf3,
        wc=p['wc'].astype(d), bc=p['bc'],
        wq1=p['wq1'].astype(d), bq1=p['bq1'],
        wq2=p['wq2'].T,     # (1, H) f32 row for the lane reduction
        bq2=p['bq2'],       # (1, 1) f32
        scat=scat,          # (2NA+N+Ne, 128) f32
    )


# ----------------------------------------------------------------------------- wrapper
def sample_taus(key, bs, ts, n_env, mode, risk_env='neutral'):
    # TODO(synk): torch.rand tau sampling + mode/risk selection stays host-side glue.
    taus = jax.random.uniform(key, (bs, ts, n_env, 1), jnp.float32)
    if mode == 'approx':
        if risk_env == 'neutral':
            pass
        elif risk_env == 'averse':
            taus = taus * 0.25
        elif risk_env == 'seek':
            taus = taus * 0.25 + 0.75
        else:
            raise ValueError(risk_env)
    return taus


def qdist_mixer_forward(agent_qs, states, hidden_states, taus_env, kparams, *, block_b=512):
    bs, ts, N, A = agent_qs.shape
    S = states.shape[-1]
    Ne = taus_env.shape[2]
    assert states.shape == (bs, ts, S)
    assert hidden_states.shape[:3] == (bs, ts, A)   # unused by forward (as in torch)

    NA = N * A
    H = kparams['wq1'].shape[0]
    P = N * Ne + N
    P_pad = kparams['scat'].shape[1]
    B = bs * ts
    K_in = NA + S + Ne

    # fused [agent_qs | state | taus] input -> one row-blocked DMA stream
    x = jnp.concatenate([
        agent_qs.reshape(B, NA).astype(jnp.float32),
        states.reshape(B, S).astype(jnp.float32),
        taus_env.reshape(B, Ne).astype(jnp.float32)], axis=-1)

    # ---- block sizing: largest block <= block_b (rows multiple of 8); only force a
    # 2-way split on dual-TensorCore parts and only when each half keeps >=128 rows.
    bb = min(block_b, _round_up(B, 8))
    bb = max(8, (bb // 8) * 8)
    if _is_dual_tensorcore() and B >= 256 and pl.cdiv(B, bb) < 2:
        bb = _round_up(pl.cdiv(B, 2), 8)
    grid = pl.cdiv(B, bb)
    B_pad = grid * bb
    if B_pad != B:
        x = jnp.pad(x, ((0, B_pad - B), (0, 0)))

    plist = [kparams[k] for k in PARAM_ORDER]
    row_spec = lambda w: pl.BlockSpec((bb, w), lambda i: (i, 0))
    full_specs = [pl.BlockSpec(pp.shape, lambda i, nd=pp.ndim: (0,) * nd) for pp in plist]

    # scoped-VMEM bump only needed for large blocks (v5e default is 16 MiB)
    if bb >= 1024:
        vmem_limit = 64 * 1024 * 1024
    elif bb >= 512:
        vmem_limit = 32 * 1024 * 1024
    else:
        vmem_limit = None

    # advisory cost estimate
    C = kparams['pis'].shape[1]
    O3_pad = kparams['wf3'].shape[1]
    K_pack = kparams['scat'].shape[0]
    flops = 2 * B_pad * (
        (NA + S) * 4 * H          # fused layer 1
        + (4 * H) * (4 * H)       # fused block-diag layer 2
        + (4 * H) * O3_pad        # fused hypernet heads
        + Ne * (C * H + H * H + H)  # cos embed + Qjt hidden + lane reduce
        + K_pack * P_pad          # fused output scatter
    )
    transcendentals = B_pad * Ne * C
    bytes_accessed = 4 * B_pad * (K_in + P_pad) + sum(
        int(pp.size) * pp.dtype.itemsize for pp in plist)

    kernel = make_qdist_kernel(NA, S, N, Ne, H)

    out = pl.pallas_call(
        kernel,
        out_shape=jax.ShapeDtypeStruct((B_pad, P_pad), jnp.float32),
        grid_spec=pltpu.PrefetchScalarGridSpec(
            num_scalar_prefetch=0,
            grid=(grid,),
            in_specs=[row_spec(K_in)] + full_specs,
            out_specs=pl.BlockSpec((bb, P_pad), lambda i: (i, 0)),
        ),
        compiler_params=pltpu.CompilerParams(
            dimension_semantics=("parallel",),
            vmem_limit_bytes=vmem_limit),
        cost_estimate=pl.CostEstimate(
            flops=int(flops),
            transcendentals=int(transcendentals),
            bytes_accessed=int(bytes_accessed)),
    )(x, *plist)

    out = out[:B]
    q_tot = out[:, :N * Ne].reshape(bs, ts, N, Ne, 1)
    q_tot2 = out[:, N * Ne:P].reshape(bs, ts, N, 1, 1)
    return q_tot, q_tot2, taus_env.reshape(bs, ts, 1, Ne, 1)


# ----------------------------------------------------------------------------- reference
def reference_forward(agent_qs, states, taus_env, params, mxu_dtype=jnp.float32):
    """Pure-JAX mirror of the torch forward. mxu_dtype=bf16 matches the kernel's
    MXU operand precision (f32 accumulation, f32 elementwise)."""
    bs, ts, N, A = agent_qs.shape
    p = params
    relu = jax.nn.relu
    d = mxu_dtype
    f32 = jnp.float32

    def lin(x, w, b):
        return jnp.dot(x.astype(d), w.astype(d), preferred_element_type=f32) + b[0]

    def mlp3(x, tag):
        h = relu(lin(x, p['w%s1' % tag], p['b%s1' % tag]))
        h = relu(lin(h, p['w%s2' % tag], p['b%s2' % tag]))
        return lin(h, p['w%s3' % tag], p['b%s3' % tag])

    w1 = jnp.abs(mlp3(states, 'a')).reshape(bs, ts, N, A)
    w2 = jnp.abs(mlp3(states, 'b')).reshape(bs, ts, N, A)
    v = mlp3(states, 'v')                                                  # (bs,ts,N)

    ct = jnp.cos(taus_env * p['pis'].reshape(1, 1, 1, -1))                 # (bs,ts,Ne,C)
    cemb = relu(lin(ct, p['wc'], p['bc']))                                 # (bs,ts,Ne,H)

    aq_e = agent_qs.reshape(bs, ts, 1, N * A)
    cat = jnp.concatenate([aq_e, states[:, :, None, :]], axis=-1)
    e = relu(lin(cat, p['we1'], p['be1']))
    e = relu(lin(e, p['we2'], p['be2']))                                   # (bs,ts,1,H)

    q1 = relu(lin(e * cemb, p['wq1'], p['bq1']))                           # (bs,ts,Ne,H)
    # final Linear(H,1) kept in f32 to match the kernel's f32 lane reduction
    qjt = jnp.sum(q1 * p['wq2'][:, 0], axis=-1, keepdims=True) + p['bq2'][0, 0]

    Ne = taus_env.shape[2]
    q_tot = (qjt.reshape(bs, ts, 1, Ne, 1)
             + (w1 * agent_qs).sum(-1).reshape(bs, ts, N, 1, 1)
             + v.reshape(bs, ts, N, 1, 1))
    q_tot2 = (w2 * agent_qs).sum(-1).reshape(bs, ts, N, 1, 1) + v.reshape(bs, ts, N, 1, 1)
    return q_tot, q_tot2, taus_env.reshape(bs, ts, 1, Ne, 1)


# ----------------------------------------------------------------------------- main
if __name__ == "__main__":
    # synthetic "args": n_agents=4, dist_N=8, state_shape=(32,), n_cos=64,
    # dist_N_env=8, rnn_hidden_dim=16, hidden_dim=64
    bs, ts = 2, 8
    A, N, S, C, H, Ne, R = 4, 8, 32, 64, 64, 8, 16

    root = jax.random.PRNGKey(0)
    kp, k1, k2, k3, kt = jax.random.split(root, 5)

    raw_params = init_params(kp, S, A, N, C, H)
    kparams = pack_kernel_params(raw_params, S, A, N, C, H, Ne, mxu_dtype=jnp.bfloat16)

    agent_qs = jax.random.normal(k1, (bs, ts, N, A), jnp.float32)
    states = jax.random.normal(k2, (bs, ts, S), jnp.float32)
    hidden_states = jax.random.normal(k3, (bs, ts, A, R), jnp.float32)   # unused by forward
    taus_env = sample_taus(kt, bs, ts, Ne, mode='policy')

    q_tot, q_tot2, taus_out = qdist_mixer_forward(
        agent_qs, states, hidden_states, taus_env, kparams)
    jax.block_until_ready((q_tot, q_tot2, taus_out))

    # reference with matching bf16 MXU operand precision (f32 accumulation)
    r_tot, r_tot2, r_taus = reference_forward(
        agent_qs, states, taus_env, raw_params, mxu_dtype=jnp.bfloat16)

    assert q_tot.shape == (bs, ts, N, Ne, 1)
    assert q_tot2.shape == (bs, ts, N, 1, 1)
    assert taus_out.shape == (bs, ts, 1, Ne, 1)
    assert jnp.allclose(q_tot, r_tot, rtol=1e-2, atol=1e-2)
    assert jnp.allclose(q_tot2, r_tot2, rtol=1e-2, atol=1e-2)
    assert jnp.allclose(taus_out, r_taus)

    print("KERNEL_OK")
</pallas_src>

<mosaic_0001>
module attributes {stable_mosaic.version = 11 : i64} {
  func.func @qdist_kernel(%arg0: i32, %arg1: memref<16x72xf32, #tpu.memory_space<vmem>>, %arg2: memref<1x64xf32, #tpu.memory_space<vmem>>, %arg3: memref<64x256xbf16, #tpu.memory_space<vmem>>, %arg4: memref<1x256xf32, #tpu.memory_space<vmem>>, %arg5: memref<256x256xbf16, #tpu.memory_space<vmem>>, %arg6: memref<1x256xf32, #tpu.memory_space<vmem>>, %arg7: memref<256x128xbf16, #tpu.memory_space<vmem>>, %arg8: memref<1x128xf32, #tpu.memory_space<vmem>>, %arg9: memref<64x64xbf16, #tpu.memory_space<vmem>>, %arg10: memref<1x64xf32, #tpu.memory_space<vmem>>, %arg11: memref<64x64xbf16, #tpu.memory_space<vmem>>, %arg12: memref<1x64xf32, #tpu.memory_space<vmem>>, %arg13: memref<1x64xf32, #tpu.memory_space<vmem>>, %arg14: memref<1x1xf32, #tpu.memory_space<vmem>>, %arg15: memref<80x128xf32, #tpu.memory_space<vmem>>, %arg16: memref<16x128xf32, #tpu.memory_space<vmem>>) attributes {dimension_semantics = [#tpu.dimension_semantics<parallel>], iteration_bounds = array<i64: 1>, scalar_prefetch = 0 : i64, scratch_operands = 0 : i64, tpu.core_type = #tpu.core_type<tc>, window_params = [{transform_indices = @transform_0, window_bounds = array<i64: 16, 72>}, {pipeline_mode = #tpu.pipeline_mode<synchronous>, transform_indices = @transform_1, window_bounds = array<i64: 1, 64>}, {pipeline_mode = #tpu.pipeline_mode<synchronous>, transform_indices = @transform_2, window_bounds = array<i64: 64, 256>}, {pipeline_mode = #tpu.pipeline_mode<synchronous>, transform_indices = @transform_3, window_bounds = array<i64: 1, 256>}, {pipeline_mode = #tpu.pipeline_mode<synchronous>, transform_indices = @transform_4, window_bounds = array<i64: 256, 256>}, {pipeline_mode = #tpu.pipeline_mode<synchronous>, transform_indices = @transform_5, window_bounds = array<i64: 1, 256>}, {pipeline_mode = #tpu.pipeline_mode<synchronous>, transform_indices = @transform_6, window_bounds = array<i64: 256, 128>}, {pipeline_mode = #tpu.pipeline_mode<synchronous>, transform_indices = @transform_7, window_bounds = array<i64: 1, 128>}, {pipeline_mode = #tpu.pipeline_mode<synchronous>, transform_indices = @transform_8, window_bounds = array<i64: 64, 64>}, {pipeline_mode = #tpu.pipeline_mode<synchronous>, transform_indices = @transform_9, window_bounds = array<i64: 1, 64>}, {pipeline_mode = #tpu.pipeline_mode<synchronous>, transform_indices = @transform_10, window_bounds = array<i64: 64, 64>}, {pipeline_mode = #tpu.pipeline_mode<synchronous>, transform_indices = @transform_11, window_bounds = array<i64: 1, 64>}, {pipeline_mode = #tpu.pipeline_mode<synchronous>, transform_indices = @transform_12, window_bounds = array<i64: 1, 64>}, {pipeline_mode = #tpu.pipeline_mode<synchronous>, transform_indices = @transform_13, window_bounds = array<i64: 1, 1>}, {pipeline_mode = #tpu.pipeline_mode<synchronous>, transform_indices = @transform_14, window_bounds = array<i64: 80, 128>}, {transform_indices = @transform_15, window_bounds = array<i64: 16, 128>}]} {
    %c0 = arith.constant 0 : index
    %c0_0 = arith.constant 0 : index
    %0 = vector.load %arg1[%c0, %c0_0] : memref<16x72xf32, #tpu.memory_space<vmem>>, vector<16x72xf32>
    %1 = vector.extract_strided_slice %0 {offsets = [0, 0], sizes = [16, 32], strides = [1, 1]} : vector<16x72xf32> to vector<16x32xf32>
    %2 = vector.extract_strided_slice %0 {offsets = [0, 0], sizes = [16, 64], strides = [1, 1]} : vector<16x72xf32> to vector<16x64xf32>
    %3 = vector.extract_strided_slice %0 {offsets = [0, 64], sizes = [16, 8], strides = [1, 1]} : vector<16x72xf32> to vector<16x8xf32>
    %4 = arith.truncf %2 : vector<16x64xf32> to vector<16x64xbf16>
    %c0_1 = arith.constant 0 : index
    %c0_2 = arith.constant 0 : index
    %5 = vector.load %arg3[%c0_1, %c0_2] : memref<64x256xbf16, #tpu.memory_space<vmem>>, vector<64x256xbf16>
    %cst = arith.constant dense<0.000000e+00> : vector<16x256xf32>
    %6 = tpu.matmul %4, %5, %cst {dimension_numbers = #tpu.dot_dimension_numbers<[1], [0], [0], [1], [0, 0, 1, 1], [], []>} : vector<16x64xbf16>, vector<64x256xbf16>, vector<16x256xf32> -> vector<16x256xf32>
    %c0_3 = arith.constant 0 : index
    %c0_4 = arith.constant 0 : index
    %7 = vector.load %arg4[%c0_3, %c0_4] : memref<1x256xf32, #tpu.memory_space<vmem>>, vector<1x256xf32>
    %8 = vector.broadcast %7 : vector<1x256xf32> to vector<16x256xf32>
    %9 = arith.addf %6, %8 : vector<16x256xf32>
    %cst_5 = arith.constant 0.000000e+00 : f32
    %10 = vector.broadcast %cst_5 : f32 to vector<16x256xf32>
    %11 = arith.maximumf %9, %10 : vector<16x256xf32>
    %12 = arith.truncf %11 : vector<16x256xf32> to vector<16x256xbf16>
    %c0_6 = arith.constant 0 : index
    %c0_7 = arith.constant 0 : index
    %13 = vector.load %arg5[%c0_6, %c0_7] : memref<256x256xbf16, #tpu.memory_space<vmem>>, vector<256x256xbf16>
    %cst_8 = arith.constant dense<0.000000e+00> : vector<16x256xf32>
    %14 = tpu.matmul %12, %13, %cst_8 {dimension_numbers = #tpu.dot_dimension_numbers<[1], [0], [0], [1], [0, 0, 1, 1], [], []>} : vector<16x256xbf16>, vector<256x256xbf16>, vector<16x256xf32> -> vector<16x256xf32>
    %c0_9 = arith.constant 0 : index
    %c0_10 = arith.constant 0 : index
    %15 = vector.load %arg6[%c0_9, %c0_10] : memref<1x256xf32, #tpu.memory_space<vmem>>, vector<1x256xf32>
    %16 = vector.broadcast %15 : vector<1x256xf32> to vector<16x256xf32>
    %17 = arith.addf %14, %16 : vector<16x256xf32>
    %cst_11 = arith.constant 0.000000e+00 : f32
    %18 = vector.broadcast %cst_11 : f32 to vector<16x256xf32>
    %19 = arith.maximumf %17, %18 : vector<16x256xf32>
    %20 = arith.truncf %19 : vector<16x256xf32> to vector<16x256xbf16>
    %c0_12 = arith.constant 0 : index
    %c0_13 = arith.constant 0 : index
    %21 = vector.load %arg7[%c0_12, %c0_13] : memref<256x128xbf16, #tpu.memory_space<vmem>>, vector<256x128xbf16>
    %cst_14 = arith.constant dense<0.000000e+00> : vector<16x128xf32>
    %22 = tpu.matmul %20, %21, %cst_14 {dimension_numbers = #tpu.dot_dimension_numbers<[1], [0], [0], [1], [0, 0, 1, 1], [], []>} : vector<16x256xbf16>, vector<256x128xbf16>, vector<16x128xf32> -> vector<16x128xf32>
    %c0_15 = arith.constant 0 : index
    %c0_16 = arith.constant 0 : index
    %23 = vector.load %arg8[%c0_15, %c0_16] : memref<1x128xf32, #tpu.memory_space<vmem>>, vector<1x128xf32>
    %24 = vector.broadcast %23 : vector<1x128xf32> to vector<16x128xf32>
    %25 = arith.addf %22, %24 : vector<16x128xf32>
    %26 = vector.extract_strided_slice %25 {offsets = [0, 0], sizes = [16, 32], strides = [1, 1]} : vector<16x128xf32> to vector<16x32xf32>
    %27 = math.absf %26 : vector<16x32xf32>
    %28 = vector.extract_strided_slice %25 {offsets = [0, 32], sizes = [16, 32], strides = [1, 1]} : vector<16x128xf32> to vector<16x32xf32>
    %29 = math.absf %28 : vector<16x32xf32>
    %30 = vector.extract_strided_slice %25 {offsets = [0, 64], sizes = [16, 8], strides = [1, 1]} : vector<16x128xf32> to vector<16x8xf32>
    %31 = vector.extract_strided_slice %19 {offsets = [0, 192], sizes = [16, 64], strides = [1, 1]} : vector<16x256xf32> to vector<16x64xf32>
    %32 = vector.shape_cast %3 : vector<16x8xf32> to vector<16x8x1xf32>
    %c0_17 = arith.constant 0 : index
    %c0_18 = arith.constant 0 : index
    %33 = vector.load %arg2[%c0_17, %c0_18] : memref<1x64xf32, #tpu.memory_space<vmem>>, vector<1x64xf32>
    %34 = vector.shape_cast %33 : vector<1x64xf32> to vector<1x1x64xf32>
    %35 = vector.broadcast %32 : vector<16x8x1xf32> to vector<16x8x64xf32>
    %36 = vector.broadcast %34 : vector<1x1x64xf32> to vector<16x8x64xf32>
    %37 = arith.mulf %35, %36 : vector<16x8x64xf32>
    %38 = math.cos %37 : vector<16x8x64xf32>
    %39 = vector.shape_cast %38 : vector<16x8x64xf32> to vector<128x64xf32>
    %40 = arith.truncf %39 : vector<128x64xf32> to vector<128x64xbf16>
    %c0_19 = arith.constant 0 : index
    %c0_20 = arith.constant 0 : index
    %41 = vector.load %arg9[%c0_19, %c0_20] : memref<64x64xbf16, #tpu.memory_space<vmem>>, vector<64x64xbf16>
    %cst_21 = arith.constant dense<0.000000e+00> : vector<128x64xf32>
    %42 = tpu.matmul %40, %41, %cst_21 {dimension_numbers = #tpu.dot_dimension_numbers<[1], [0], [0], [1], [0, 0, 1, 1], [], []>} : vector<128x64xbf16>, vector<64x64xbf16>, vector<128x64xf32> -> vector<128x64xf32>
    %c0_22 = arith.constant 0 : index
    %c0_23 = arith.constant 0 : index
    %43 = vector.load %arg10[%c0_22, %c0_23] : memref<1x64xf32, #tpu.memory_space<vmem>>, vector<1x64xf32>
    %44 = vector.broadcast %43 : vector<1x64xf32> to vector<128x64xf32>
    %45 = arith.addf %42, %44 : vector<128x64xf32>
    %cst_24 = arith.constant 0.000000e+00 : f32
    %46 = vector.broadcast %cst_24 : f32 to vector<128x64xf32>
    %47 = arith.maximumf %45, %46 : vector<128x64xf32>
    %48 = vector.shape_cast %47 : vector<128x64xf32> to vector<16x8x64xf32>
    %49 = vector.shape_cast %31 : vector<16x64xf32> to vector<16x1x64xf32>
    %50 = vector.broadcast %49 : vector<16x1x64xf32> to vector<16x8x64xf32>
    %51 = arith.mulf %48, %50 : vector<16x8x64xf32>
    %52 = vector.shape_cast %51 : vector<16x8x64xf32> to vector<128x64xf32>
    %53 = arith.truncf %52 : vector<128x64xf32> to vector<128x64xbf16>
    %c0_25 = arith.constant 0 : index
    %c0_26 = arith.constant 0 : index
    %54 = vector.load %arg11[%c0_25, %c0_26] : memref<64x64xbf16, #tpu.memory_space<vmem>>, vector<64x64xbf16>
    %cst_27 = arith.constant dense<0.000000e+00> : vector<128x64xf32>
    %55 = tpu.matmul %53, %54, %cst_27 {dimension_numbers = #tpu.dot_dimension_numbers<[1], [0], [0], [1], [0, 0, 1, 1], [], []>} : vector<128x64xbf16>, vector<64x64xbf16>, vector<128x64xf32> -> vector<128x64xf32>
    %c0_28 = arith.constant 0 : index
    %c0_29 = arith.constant 0 : index
    %56 = vector.load %arg12[%c0_28, %c0_29] : memref<1x64xf32, #tpu.memory_space<vmem>>, vector<1x64xf32>
    %57 = vector.broadcast %56 : vector<1x64xf32> to vector<128x64xf32>
    %58 = arith.addf %55, %57 : vector<128x64xf32>
    %cst_30 = arith.constant 0.000000e+00 : f32
    %59 = vector.broadcast %cst_30 : f32 to vector<128x64xf32>
    %60 = arith.maximumf %58, %59 : vector<128x64xf32>
    %c0_31 = arith.constant 0 : index
    %c0_32 = arith.constant 0 : index
    %61 = vector.load %arg13[%c0_31, %c0_32] : memref<1x64xf32, #tpu.memory_space<vmem>>, vector<1x64xf32>
    %62 = vector.broadcast %61 : vector<1x64xf32> to vector<128x64xf32>
    %63 = arith.mulf %60, %62 : vector<128x64xf32>
    %64 = vector.shape_cast %63 : vector<128x64xf32> to vector<16x8x64xf32>
    %cst_33 = arith.constant dense<0.000000e+00> : vector<16x8xf32>
    %65 = vector.multi_reduction <add>, %64, %cst_33 [2] : vector<16x8x64xf32> to vector<16x8xf32>
    %c0_34 = arith.constant 0 : index
    %c0_35 = arith.constant 0 : index
    %66 = vector.load %arg14[%c0_34, %c0_35] : memref<1x1xf32, #tpu.memory_space<vmem>>, vector<1x1xf32>
    %67 = vector.broadcast %66 : vector<1x1xf32> to vector<16x8xf32>
    %68 = arith.addf %65, %67 : vector<16x8xf32>
    %69 = arith.mulf %27, %1 : vector<16x32xf32>
    %70 = arith.mulf %29, %1 : vector<16x32xf32>
    %71 = tpu.concatenate %69, %70, %30, %68 in 1 : vector<16x32xf32>, vector<16x32xf32>, vector<16x8xf32>, vector<16x8xf32> -> vector<16x80xf32>
    %c0_36 = arith.constant 0 : index
    %c0_37 = arith.constant 0 : index
    %72 = vector.load %arg15[%c0_36, %c0_37] : memref<80x128xf32, #tpu.memory_space<vmem>>, vector<80x128xf32>
    %cst_38 = arith.constant dense<0.000000e+00> : vector<16x128xf32>
    %73 = tpu.matmul %71, %72, %cst_38 {dimension_numbers = #tpu.dot_dimension_numbers<[1], [0], [0], [1], [0, 0, 1, 1], [], []>} : vector<16x80xf32>, vector<80x128xf32>, vector<16x128xf32> -> vector<16x128xf32>
    %c0_39 = arith.constant 0 : index
    %c0_40 = arith.constant 0 : index
    %74 = vector.load %arg16[%c0_39, %c0_40] : memref<16x128xf32, #tpu.memory_space<vmem>>, vector<16x128xf32>
    tpu.vector_store %arg16[%c0_39, %c0_40], %73 {strides = array<i32>} : memref<16x128xf32, #tpu.memory_space<vmem>>, vector<16x128xf32>,
    return
  }
  func.func @transform_0(%arg0: i32) -> (i32, i32) {
    %c0_i32 = arith.constant 0 : i32
    %c0_i32_0 = arith.constant 0 : i32
    return %arg0, %c0_i32 : i32, i32
  }
  func.func @transform_1(%arg0: i32) -> (i32, i32) {
    %c0_i32 = arith.constant 0 : i32
    %c0_i32_0 = arith.constant 0 : i32
    %c0_i32_1 = arith.constant 0 : i32
    return %c0_i32, %c0_i32_0 : i32, i32
  }
  func.func @transform_2(%arg0: i32) -> (i32, i32) {
    %c0_i32 = arith.constant 0 : i32
    %c0_i32_0 = arith.constant 0 : i32
    %c0_i32_1 = arith.constant 0 : i32
    return %c0_i32, %c0_i32_0 : i32, i32
  }
  func.func @transform_3(%arg0: i32) -> (i32, i32) {
    %c0_i32 = arith.constant 0 : i32
    %c0_i32_0 = arith.constant 0 : i32
    %c0_i32_1 = arith.constant 0 : i32
    return %c0_i32, %c0_i32_0 : i32, i32
  }
  func.func @transform_4(%arg0: i32) -> (i32, i32) {
    %c0_i32 = arith.constant 0 : i32
    %c0_i32_0 = arith.constant 0 : i32
    %c0_i32_1 = arith.constant 0 : i32
    return %c0_i32, %c0_i32_0 : i32, i32
  }
  func.func @transform_5(%arg0: i32) -> (i32, i32) {
    %c0_i32 = arith.constant 0 : i32
    %c0_i32_0 = arith.constant 0 : i32
    %c0_i32_1 = arith.constant 0 : i32
    return %c0_i32, %c0_i32_0 : i32, i32
  }
  func.func @transform_6(%arg0: i32) -> (i32, i32) {
    %c0_i32 = arith.constant 0 : i32
    %c0_i32_0 = arith.constant 0 : i32
    %c0_i32_1 = arith.constant 0 : i32
    return %c0_i32, %c0_i32_0 : i32, i32
  }
  func.func @transform_7(%arg0: i32) -> (i32, i32) {
    %c0_i32 = arith.constant 0 : i32
    %c0_i32_0 = arith.constant 0 : i32
    %c0_i32_1 = arith.constant 0 : i32
    return %c0_i32, %c0_i32_0 : i32, i32
  }
  func.func @transform_8(%arg0: i32) -> (i32, i32) {
    %c0_i32 = arith.constant 0 : i32
    %c0_i32_0 = arith.constant 0 : i32
    %c0_i32_1 = arith.constant 0 : i32
    return %c0_i32, %c0_i32_0 : i32, i32
  }
  func.func @transform_9(%arg0: i32) -> (i32, i32) {
    %c0_i32 = arith.constant 0 : i32
    %c0_i32_0 = arith.constant 0 : i32
    %c0_i32_1 = arith.constant 0 : i32
    return %c0_i32, %c0_i32_0 : i32, i32
  }
  func.func @transform_10(%arg0: i32) -> (i32, i32) {
    %c0_i32 = arith.constant 0 : i32
    %c0_i32_0 = arith.constant 0 : i32
    %c0_i32_1 = arith.constant 0 : i32
    return %c0_i32, %c0_i32_0 : i32, i32
  }
  func.func @transform_11(%arg0: i32) -> (i32, i32) {
    %c0_i32 = arith.constant 0 : i32
    %c0_i32_0 = arith.constant 0 : i32
    %c0_i32_1 = arith.constant 0 : i32
    return %c0_i32, %c0_i32_0 : i32, i32
  }
  func.func @transform_12(%arg0: i32) -> (i32, i32) {
    %c0_i32 = arith.constant 0 : i32
    %c0_i32_0 = arith.constant 0 : i32
    %c0_i32_1 = arith.constant 0 : i32
    return %c0_i32, %c0_i32_0 : i32, i32
  }
  func.func @transform_13(%arg0: i32) -> (i32, i32) {
    %c0_i32 = arith.constant 0 : i32
    %c0_i32_0 = arith.constant 0 : i32
    %c0_i32_1 = arith.constant 0 : i32
    return %c0_i32, %c0_i32_0 : i32, i32
  }
  func.func @transform_14(%arg0: i32) -> (i32, i32) {
    %c0_i32 = arith.constant 0 : i32
    %c0_i32_0 = arith.constant 0 : i32
    %c0_i32_1 = arith.constant 0 : i32
    return %c0_i32, %c0_i32_0 : i32, i32
  }
  func.func @transform_15(%arg0: i32) -> (i32, i32) {
    %c0_i32 = arith.constant 0 : i32
    %c0_i32_0 = arith.constant 0 : i32
    return %arg0, %c0_i32 : i32, i32
  }
}

</mosaic_0001>

<bundles_post_ra>
// kernel: tpu_custom_call.1
= control target key start
LH: loop header
LB: loop body
LE: loop exit
PB: predicated region body
PF: predicated region fallthrough
CT: control target
= control target key end

     0   :  { %s6305_s0 = inlined_call_operand.hbm [shape: f32[16,72], index: 0, kind: input, shape index: {}]   ;;  %s6306_s1 = inlined_call_operand.hbm [shape: f32[1,64], index: 1, kind: input, shape index: {}]   ;;  %s6307_s2 = inlined_call_operand.hbm [shape: bf16[64,256], index: 2, kind: input, shape index: {}]   ;;  %s6308_s3 = inlined_call_operand.vmem [shape: f32[1,256], index: 3, kind: input, shape index: {}]   ;;  %s6309_s4 = inlined_call_operand.hbm [shape: bf16[256,256], index: 4, kind: input, shape index: {}]   ;;  %s6310_s5 = inlined_call_operand.hbm [shape: f32[1,256], index: 5, kind: input, shape index: {}]   ;;  %s6311_s6 = inlined_call_operand.hbm [shape: bf16[256,128], index: 6, kind: input, shape index: {}]   ;;  %s6312_s7 = inlined_call_operand.hbm [shape: f32[1,128], index: 7, kind: input, shape index: {}]   ;;  %s6313_s8 = inlined_call_operand.vmem [shape: bf16[64,64], index: 8, kind: input, shape index: {}]   ;;  %s6314_s9 = inlined_call_operand.vmem [shape: f32[1,64], index: 9, kind: input, shape index: {}]   ;;  %s6315_s10 = inlined_call_operand.hbm [shape: bf16[64,64], index: 10, kind: input, shape index: {}]   ;;  %s6316_s11 = inlined_call_operand.vmem [shape: f32[1,64], index: 11, kind: input, shape index: {}]   ;;  %s6317_s12 = inlined_call_operand.vmem [shape: f32[1,64], index: 12, kind: input, shape index: {}]   ;;  %s6318_s13 = inlined_call_operand.<no memory space> [shape: f32[1,1], index: 13, kind: input, shape index: {}]   ;;  %s6319_s14 = inlined_call_operand.hbm [shape: f32[80,128], index: 14, kind: input, shape index: {}]   ;;  %s6320_s15 = inlined_call_operand.hbm [shape: f32[16,128], index: 15, kind: output, shape index: {}]  }
   0x1   :  { %v20_v0 = vstv %s6318_s13 }
   0x2   :  { %21 = vst [vmem:[#allocation2] sm:$0x1] %v20_v0 }
   0x3   :  { %22 = vsyncpa [#allocation4], 0 }
   0x4   :  { %23 = vsyncpa [#allocation7], 0 }
   0x5   :  { %24 = vsyncpa [#allocation10], 0 }
   0x6   :  { %25 = vsyncpa [#allocation13], 0 }
   0x7   :  { %26 = vsyncpa [#allocation16], 0 }
   0x8   :  { %27 = vsyncpa [#allocation5], 0  ;;  %s4225_s20 = smov [#allocation6]   ;;  %s3993_s24 = scalar_lea.hbm %s6306_s1, 16 }
   0x9   :  { %s46_s21 = sshll.u32 %s4225_s20, 4  ;;  %p3994_p0 = scmp.ne.s32.totalorder %s6306_s1, %s3993_s24  ;;  %s47_s21 = int_to_ptr.vmem [resolvable:$true] %s46_s21 }
   0xa   :  { %p3997_p1 = scmp.lt.u32.totalorder %s3993_s24, %s6306_s1 }
   0xc   :  { %p3999_p2 = pnand %p3997_p1, %p3994_p0 }
   0xe   :  { %4002 = shalt.err (!%p3999_p2)
}
   0xf   :  { %s4003_s28 = scalar_lea.vmem %s47_s21, 16  ;;  %s4007_s29 = scalar_lea.vmem %s47_s21, 32 }
  0x10   :  { %p4004_p3 = scmp.ne.s32.totalorder %s47_s21, %s4003_s28  ;;  %p4008_p4 = scmp.lt.s32.totalorder %s47_s21, %s47_s21 }
  0x11   :  { %p4009_p5 = scmp.lt.s32.totalorder %s4007_s29, %s4003_s28 }
  0x13   :  { %p4010_p6 = por %p4009_p5, %p4008_p4 }
  0x15   :  { %p4011_p7 = pnand %p4010_p6, %p4004_p3 }
  0x17   :  { %4014 = shalt.err (!%p4011_p7)
}
  0x18   :  { %49 = dma.hbm_to_vmem [thread:$0]  %s6306_s1, 16, %s47_s21, [#allocation7]  }
  0x19   :  { %s4226_s17 = smov [#allocation9]   ;;  %s4227_s19 = smov [#allocation12]  }
  0x1a   :  { %s69_s18 = sshll.u32 %s4226_s17, 4  ;;  %s91_s20 = sshll.u32 %s4227_s19, 4  ;;  %s70_s18 = int_to_ptr.vmem [resolvable:$true] %s69_s18  ;;  %s92_s20 = int_to_ptr.vmem [resolvable:$true] %s91_s20 }
  0x1b   :  { %s4015_s24 = scalar_lea.hbm %s6309_s4, 4096 }
  0x1c   :  { %p4016_p8 = scmp.ne.s32.totalorder %s6309_s4, %s4015_s24  ;;  %p4019_p9 = scmp.lt.u32.totalorder %s4015_s24, %s6309_s4 }
  0x1e   :  { %p4021_p10 = pnand %p4019_p9, %p4016_p8 }
  0x20   :  { %4024 = shalt.err (!%p4021_p10)
}
  0x21   :  { %s4025_s1 = scalar_lea.vmem %s70_s18, 4096  ;;  %p4030_p12 = scmp.lt.s32.totalorder %s70_s18, %s70_s18 }
  0x22   :  { %p4026_p11 = scmp.ne.s32.totalorder %s70_s18, %s4025_s1  ;;  %p4031_p13 = scmp.lt.s32.totalorder %s4025_s1, %s4025_s1 }
  0x24   :  { %p4032_p0 = por %p4031_p13, %p4030_p12 }
  0x26   :  { %p4033_p1 = pnand %p4032_p0, %p4026_p11 }
  0x28   :  { %4036 = shalt.err (!%p4033_p1)
}
  0x29   :  { %s4228_s21 = smov 128   ;;  %s4229_s28 = smov 8  }
  0x2a   :  { %75 = dma.hbm_to_vmem [thread:$0]  %s6309_s4, 4096, %s70_s18, [#allocation10], %s4228_s21, %s4228_s21, %s4229_s28  }
  0x2b   :  { %s4037_s19 = scalar_lea.hbm %s6311_s6, 2048 }
  0x2c   :  { %p4038_p2 = scmp.ne.s32.totalorder %s6311_s6, %s4037_s19  ;;  %p4041_p3 = scmp.lt.u32.totalorder %s4037_s19, %s6311_s6 }
  0x2e   :  { %p4043_p4 = pnand %p4041_p3, %p4038_p2 }
  0x30   :  { %4046 = shalt.err (!%p4043_p4)
}
  0x31   :  { %s4047_s26 = scalar_lea.vmem %s92_s20, 2048  ;;  %p4052_p6 = scmp.lt.s32.totalorder %s92_s20, %s92_s20 }
  0x32   :  { %p4048_p5 = scmp.ne.s32.totalorder %s92_s20, %s4047_s26  ;;  %p4053_p7 = scmp.lt.s32.totalorder %s4047_s26, %s4047_s26 }
  0x34   :  { %p4054_p8 = por %p4053_p7, %p4052_p6 }
  0x36   :  { %p4055_p9 = pnand %p4054_p8, %p4048_p5 }
  0x38   :  { %4058 = shalt.err (!%p4055_p9)
}
  0x39   :  { %s4230_s4 = smov 64   ;;  %s4231_s18 = smov 4  }
  0x3a   :  { %97 = dma.hbm_to_vmem [thread:$0]  %s6311_s6, 2048, %s92_s20, [#allocation13], %s4230_s4, %s4230_s4, %s4231_s18  }
  0x3b   :  { %s4232_s1 = smov [#allocation15]   ;;  %s4233_s30 = smov [#allocation3]  }
  0x3c   :  { %s117_s29 = sshll.u32 %s4232_s1, 4  ;;  %s33_s16 = sshll.u32 %s4233_s30, 4  ;;  %s118_s29 = int_to_ptr.vmem [resolvable:$true] %s117_s29  ;;  %s34_s16 = int_to_ptr.vmem [resolvable:$true] %s33_s16 }
  0x3d   :  { %s4059_s22 = scalar_lea.hbm %s6315_s10, 512 }
  0x3e   :  { %p4060_p10 = scmp.ne.s32.totalorder %s6315_s10, %s4059_s22  ;;  %p4063_p11 = scmp.lt.u32.totalorder %s4059_s22, %s6315_s10 }
  0x40   :  { %p4065_p12 = pnand %p4063_p11, %p4060_p10 }
  0x42   :  { %4068 = shalt.err (!%p4065_p12)
}
  0x43   :  { %s4069_s6 = scalar_lea.vmem %s118_s29, 512  ;;  %p4074_p0 = scmp.lt.s32.totalorder %s118_s29, %s118_s29 }
  0x44   :  { %p4070_p13 = scmp.ne.s32.totalorder %s118_s29, %s4069_s6  ;;  %p4075_p1 = scmp.lt.s32.totalorder %s4069_s6, %s4069_s6 }
  0x46   :  { %p4076_p2 = por %p4075_p1, %p4074_p0 }
  0x48   :  { %p4077_p3 = pnand %p4076_p2, %p4070_p13 }
  0x4a   :  { %4080 = shalt.err (!%p4077_p3)
}
  0x4b   :  { %123 = dma.hbm_to_vmem [thread:$0]  %s6315_s10, 512, %s118_s29, [#allocation16], %s4230_s4, %s4230_s4, %s4231_s18  }
  0x4c   :  { %s4081_s30 = scalar_lea.hbm %s6305_s0, 256 }
  0x4d   :  { %p4082_p4 = scmp.ne.s32.totalorder %s6305_s0, %s4081_s30  ;;  %p4085_p5 = scmp.lt.u32.totalorder %s4081_s30, %s6305_s0 }
  0x4f   :  { %p4087_p6 = pnand %p4085_p5, %p4082_p4 }
  0x51   :  { %4090 = shalt.err (!%p4087_p6)
}
  0x52   :  { %s4091_s24 = scalar_lea.vmem %s34_s16, 256  ;;  %p4096_p8 = scmp.lt.s32.totalorder %s34_s16, %s34_s16 }
  0x53   :  { %p4092_p7 = scmp.ne.s32.totalorder %s34_s16, %s4091_s24  ;;  %p4097_p9 = scmp.lt.s32.totalorder %s4091_s24, %s4091_s24 }
  0x55   :  { %p4098_p10 = por %p4097_p9, %p4096_p8 }
  0x57   :  { %p4099_p11 = pnand %p4098_p10, %p4092_p7 }
  0x59   :  { %4102 = shalt.err (!%p4099_p11)
}
  0x5a   :  { %39 = dma.hbm_to_vmem [thread:$0]  %s6305_s0, 256, %s34_s16, [#allocation4], %s4228_s21, %s4228_s21, %s4229_s28  }
  0x5b   :  { %s4234_s29 = smov [#allocation8]   ;;  %s4235_s26 = smov [#allocation11]  }
  0x5c   :  { %s55_s25 = sshll.u32 %s4234_s29, 4  ;;  %s82_s6 = sshll.u32 %s4235_s26, 4  ;;  %s56_s25 = int_to_ptr.vmem [resolvable:$true] %s55_s25  ;;  %s83_s6 = int_to_ptr.vmem [resolvable:$true] %s82_s6 }
  0x5d   :  { %s4103_s13 = scalar_lea.hbm %s6307_s2, 1024 }
  0x5e   :  { %p4104_p12 = scmp.ne.s32.totalorder %s6307_s2, %s4103_s13  ;;  %p4107_p13 = scmp.lt.u32.totalorder %s4103_s13, %s6307_s2 }
  0x60   :  { %p4109_p0 = pnand %p4107_p13, %p4104_p12 }
  0x62   :  { %4112 = shalt.err (!%p4109_p0)
}
  0x63   :  { %s4113_s0 = scalar_lea.vmem %s56_s25, 1024  ;;  %p4118_p2 = scmp.lt.s32.totalorder %s56_s25, %s56_s25 }
  0x64   :  { %p4114_p1 = scmp.ne.s32.totalorder %s56_s25, %s4113_s0  ;;  %p4119_p3 = scmp.lt.s32.totalorder %s4113_s0, %s4113_s0 }
  0x66   :  { %p4120_p4 = por %p4119_p3, %p4118_p2 }
  0x68   :  { %p4121_p5 = pnand %p4120_p4, %p4114_p1 }
  0x6a   :  { %4124 = shalt.err (!%p4121_p5)
}
  0x6b   :  { %61 = dma.hbm_to_vmem [thread:$0]  %s6307_s2, 1024, %s56_s25, [#allocation7], %s4228_s21, %s4228_s21, %s4229_s28  }
  0x6c   :  { %s4125_s10 = scalar_lea.hbm %s6310_s5, 32 }
  0x6d   :  { %p4126_p6 = scmp.ne.s32.totalorder %s6310_s5, %s4125_s10  ;;  %p4129_p7 = scmp.lt.u32.totalorder %s4125_s10, %s6310_s5 }
  0x6f   :  { %p4131_p8 = pnand %p4129_p7, %p4126_p6 }
  0x71   :  { %4134 = shalt.err (!%p4131_p8)
}
  0x72   :  { %s4135_s27 = scalar_lea.vmem %s83_s6, 32  ;;  %p4140_p10 = scmp.lt.s32.totalorder %s83_s6, %s83_s6 }
  0x73   :  { %p4136_p9 = scmp.ne.s32.totalorder %s83_s6, %s4135_s27  ;;  %p4141_p11 = scmp.lt.s32.totalorder %s4135_s27, %s4135_s27 }
  0x75   :  { %p4142_p12 = por %p4141_p11, %p4140_p10 }
  0x77   :  { %p4143_p13 = pnand %p4142_p12, %p4136_p9 }
  0x79   :  { %4146 = shalt.err (!%p4143_p13)
}
  0x7a   :  { %85 = dma.hbm_to_vmem [thread:$0]  %s6310_s5, 32, %s83_s6, [#allocation10]  }
  0x7b   :  { %s4236_s13 = smov [#allocation14]   ;;  %s4237_s30 = smov [#allocation17]  }
  0x7c   :  { %s104_s1 = sshll.u32 %s4236_s13, 4  ;;  %s135_s17 = sshll.u32 %s4237_s30, 4  ;;  %s105_s1 = int_to_ptr.vmem [resolvable:$true] %s104_s1  ;;  %s136_s17 = int_to_ptr.vmem [resolvable:$true] %s135_s17 }
  0x7d   :  { %s4147_s16 = scalar_lea.hbm %s6312_s7, 16 }
  0x7e   :  { %p4148_p0 = scmp.ne.s32.totalorder %s6312_s7, %s4147_s16  ;;  %p4151_p1 = scmp.lt.u32.totalorder %s4147_s16, %s6312_s7 }
  0x80   :  { %p4153_p2 = pnand %p4151_p1, %p4148_p0 }
  0x82   :  { %4156 = shalt.err (!%p4153_p2)
}
  0x83   :  { %s4157_s5 = scalar_lea.vmem %s105_s1, 16  ;;  %s4161_s6 = scalar_lea.vmem %s105_s1, 32 }
  0x84   :  { %p4158_p3 = scmp.ne.s32.totalorder %s105_s1, %s4157_s5  ;;  %p4162_p4 = scmp.lt.s32.totalorder %s105_s1, %s105_s1 }
  0x85   :  { %p4163_p5 = scmp.lt.s32.totalorder %s4161_s6, %s4157_s5 }
  0x87   :  { %p4164_p6 = por %p4163_p5, %p4162_p4 }
  0x89   :  { %p4165_p7 = pnand %p4164_p6, %p4158_p3 }
  0x8b   :  { %4168 = shalt.err (!%p4165_p7)
}
  0x8c   :  { %107 = dma.hbm_to_vmem [thread:$0]  %s6312_s7, 16, %s105_s1, [#allocation13]  }
  0x8d   :  { %s4169_s27 = scalar_lea.hbm %s6319_s14, 1280 }
  0x8e   :  { %p4170_p8 = scmp.ne.s32.totalorder %s6319_s14, %s4169_s27  ;;  %p4173_p9 = scmp.lt.u32.totalorder %s4169_s27, %s6319_s14 }
  0x90   :  { %p4175_p10 = pnand %p4173_p9, %p4170_p8 }
  0x92   :  { %4178 = shalt.err (!%p4175_p10)
}
  0x93   :  { %s4179_s19 = scalar_lea.vmem %s136_s17, 1280  ;;  %p4184_p12 = scmp.lt.s32.totalorder %s136_s17, %s136_s17 }
  0x94   :  { %p4180_p11 = scmp.ne.s32.totalorder %s136_s17, %s4179_s19  ;;  %p4185_p13 = scmp.lt.s32.totalorder %s4179_s19, %s4179_s19 }
  0x96   :  { %p4186_p0 = por %p4185_p13, %p4184_p12 }
  0x98   :  { %p4187_p1 = pnand %p4186_p0, %p4180_p11 }
  0x9a   :  { %4190 = shalt.err (!%p4187_p1)
}
  0x9b   :  { %141 = dma.hbm_to_vmem [thread:$0]  %s6319_s14, 1280, %s136_s17, [#allocation16], %s4228_s21, %s4228_s21, %s4229_s28  }
  0x9c   :  { %4213 = dma.done.wait [#allocation4], 256  }
  0x9d   :  { %4214 = vsyncadd [#allocation4], 4294967040 }
  0x9e   :  { %4215 = dma.done.wait [#allocation7], 1040  }
  0x9f   :  { %4216 = vsyncadd [#allocation7], 4294966256 }
  0xa0   :  { %4217 = dma.done.wait [#allocation10], 4128  }
  0xa1   :  { %4218 = vsyncadd [#allocation10], 4294963168 }
  0xa2   :  { %4219 = dma.done.wait [#allocation13], 2064  }
  0xa3   :  { %4220 = vsyncadd [#allocation13], 4294965232 }
  0xa4   :  { %4221 = dma.done.wait [#allocation16], 1792  }
  0xa5   :  { %4222 = vsyncadd [#allocation16], 4294965504  ;;  %v4238_v1 = vmov 0   ;;  %v6321_v2 = vlaneseq  ;;  %v3841_v4 = vld [vmem:[#allocation8 + $0x4] ss:$8 sps:$4 sm:$0xff]   ;;  %v171_v27 = vld [vmem:[#allocation3 + $0x8] sm:$0xff] }
  0xa6   :  { %269 = vmatprep.mubr.bf16.mxu0 %v4238_v1  ;;  %3839 = vset.pattern.permute.xlu1 %v4238_v1  ;;  %v3843_v5 = vld [vmem:[#allocation8] ss:$8 sps:$4 sm:$0xff]   ;;  %v3844_v6 = vld [vmem:[#allocation8 + $0x14] ss:$8 sps:$4 sm:$0xff]   ;;  %v3846_v9 = vld [vmem:[#allocation8 + $0x10] ss:$8 sps:$4 sm:$0xff]  }
  0xa7   :  { %3840 = vset.pattern.permute.xlu0 %v4238_v1  ;;  %v4456_v3 = vshrl.u32 %v6321_v2, 7  ;;  %237 = vmatprep.subr.bf16.mxu0 %v3841_v4  ;;  %v3847_v10 = vld [vmem:[#allocation8 + $0x24] ss:$8 sps:$4 sm:$0xff]   ;;  %v3849_v11 = vld [vmem:[#allocation8 + $0x20] ss:$8 sps:$4 sm:$0xff]   ;;  %vm6375_vm0 = vcmask 523264  }
  0xa8   :  { %238 = vmatpush1.bf16.msra.mxu0 %v3843_v5  ;;  %v170_v12 = vld [vmem:[#allocation3] sm:$0xff]  ;;  %v3855_v18 = vld [vmem:[#allocation9] ss:$8 sps:$4 sm:$0xff]  }
  0xa9   :  { %v4459_v7 = vsub.s32 0, %v4456_v3  ;;  %v735_v8 = vsub.s32 2, %v4456_v3  ;;  %239 = vmatprep.subr.bf16.mxu0 %v3844_v6  ;;  %v4463_v13 = vsub.s32 1, %v4456_v3  ;;  %v3853_v14 = vld [vmem:[#allocation9 + $0x4] ss:$8 sps:$4 sm:$0xff]   ;;  %v743_v17 = vsub.s32 3, %v4456_v3 }
  0xaa   :  { %v3850_v19 = vld [vmem:[#allocation8 + $0x34] ss:$8 sps:$4 sm:$0xff]   ;;  %490 = vmatprep.subr.bf16.mxu1 %v3853_v14  ;;  %v751_v21 = vsub.s32 4, %v4456_v3  ;;  %v3852_v22 = vld [vmem:[#allocation8 + $0x30] ss:$8 sps:$4 sm:$0xff]   ;;  %v759_v28 = vsub.s32 5, %v4456_v3  ;;  %v172_v32 = vpack.c.bf16 %v171_v27, %v170_v12 }
  0xab   :  { %v720_v15 = vrot.slane %v170_v12, %v4459_v7  ;;  %v736_v16 = vrot.slane %v170_v12, %v735_v8  ;;  %v3856_v20 = vld [vmem:[#allocation9 + $0x14] ss:$8 sps:$4 sm:$0xff]   ;;  %491 = vmatpush1.bf16.msra.mxu1 %v3855_v18  ;;  %v3858_v23 = vld [vmem:[#allocation9 + $0x10] ss:$8 sps:$4 sm:$0xff]   ;;  %v728_v24 = vrot.slane %v170_v12, %v4463_v13  ;;  %v3859_v25 = vld [vmem:[#allocation9 + $0x24] ss:$8 sps:$4 sm:$0xff]   ;;  %v744_v26 = vrot.slane %v170_v12, %v743_v17 }
  0xac   :  { %240 = vmatpush1.bf16.msra.mxu0 %v3846_v9  ;;  %492 = vmatprep.subr.bf16.mxu1 %v3856_v20  ;;  %v3861_v29 = vld [vmem:[#allocation9 + $0x20] ss:$8 sps:$4 sm:$0xff]   ;;  %v752_v30 = vrot.slane %v170_v12, %v751_v21  ;;  %v767_v31 = vsub.s32 6, %v4456_v3  ;;  %v3862_v33 = vld [vmem:[#allocation9 + $0x34] ss:$8 sps:$4 sm:$0xff]   ;;  %v760_v34 = vrot.slane %v170_v12, %v759_v28  ;;  %v775_v35 = vsub.s32 7, %v4456_v3 }
  0xad   :  { %241 = vmatprep.subr.bf16.mxu0 %v3847_v10  ;;  %723 = vbcast.lane.b32.xlu0 %v720_v15, 320  ;;  %v3864_v36 = vld [vmem:[#allocation9 + $0x30] ss:$8 sps:$4 sm:$0xff]   ;;  %v3865_v38 = vld [vmem:[#allocation9 + $0x44] ss:$8 sps:$4 sm:$0xff]   ;;  %v784_v41 = vrot.slane %v171_v27, %v4459_v7  ;;  %v792_v43 = vrot.slane %v171_v27, %v4463_v13  ;;  %v800_v46 = vrot.slane %v171_v27, %v735_v8 }
  0xae   :  { %739 = vbcast.lane.b32.xlu1 %v736_v16, 320  ;;  %v768_v37 = vrot.slane %v170_v12, %v767_v31  ;;  %v776_v39 = vrot.slane %v170_v12, %v775_v35  ;;  %v3867_v40 = vld [vmem:[#allocation9 + $0x40] ss:$8 sps:$4 sm:$0xff]   ;;  %v3868_v42 = vld [vmem:[#allocation9 + $0x54] ss:$8 sps:$4 sm:$0xff]   ;;  %v808_v48 = vrot.slane %v171_v27, %v743_v17  ;;  %v816_v50 = vrot.slane %v171_v27, %v751_v21 }
  0xaf   :  { %493 = vmatpush1.bf16.msra.mxu1 %v3858_v23  ;;  %v3870_v44 = vld [vmem:[#allocation9 + $0x50] ss:$8 sps:$4 sm:$0xff]   ;;  %v3871_v45 = vld [vmem:[#allocation9 + $0x64] ss:$8 sps:$4 sm:$0xff]   ;;  %v3873_v47 = vld [vmem:[#allocation9 + $0x60] ss:$8 sps:$4 sm:$0xff]   ;;  %v824_v52 = vrot.slane %v171_v27, %v759_v28  ;;  %v832_v54 = vrot.slane %v171_v27, %v767_v31  ;;  %v840_v56 = vrot.slane %v171_v27, %v775_v35 }
  0xb0   :  { %242 = vmatpush1.bf16.msra.mxu0 %v3849_v11  ;;  %494 = vmatprep.subr.bf16.mxu1 %v3859_v25  ;;  %v3874_v49 = vld [vmem:[#allocation9 + $0x74] ss:$8 sps:$4 sm:$0xff]   ;;  %v3876_v51 = vld [vmem:[#allocation9 + $0x70] ss:$8 sps:$4 sm:$0xff]   ;;  %v3877_v53 = vld [vmem:[#allocation9 + $0x84] ss:$8 sps:$4 sm:$0xff]  }
  0xb1   :  { %243 = vmatprep.subr.bf16.mxu0 %v3850_v19  ;;  %731 = vbcast.lane.b32.xlu0 %v728_v24, 320  ;;  %v3879_v55 = vld [vmem:[#allocation9 + $0x80] ss:$8 sps:$4 sm:$0xff]   ;;  %v3880_v57 = vld [vmem:[#allocation9 + $0x94] ss:$8 sps:$4 sm:$0xff]  }
  0xb2   :  { %747 = vbcast.lane.b32.xlu1 %v744_v26, 320  ;;  %v3882_v58 = vld [vmem:[#allocation9 + $0x90] ss:$8 sps:$4 sm:$0xff]   ;;  %v3883_v59 = vld [vmem:[#allocation9 + $0xa4] ss:$8 sps:$4 sm:$0xff]  }
  0xb3   :  { %495 = vmatpush1.bf16.msra.mxu1 %v3861_v29  ;;  %v3885_v60 = vld [vmem:[#allocation9 + $0xa0] ss:$8 sps:$4 sm:$0xff]   ;;  %v3886_v61 = vld [vmem:[#allocation9 + $0xb4] ss:$8 sps:$4 sm:$0xff]   ;;  %v3888_v62 = vld [vmem:[#allocation9 + $0xb0] ss:$8 sps:$4 sm:$0xff]  }
  0xb4   :  { %244 = vmatpush1.bf16.msra.mxu0 %v3852_v22  ;;  %496 = vmatprep.subr.bf16.mxu1 %v3862_v33  ;;  %v3889_v63 = vld [vmem:[#allocation9 + $0xc4] ss:$8 sps:$4 sm:$0xff]   ;;  %v3891_v0 = vld [vmem:[#allocation9 + $0xc0] ss:$8 sps:$4 sm:$0xff]   ;;  %v3892_v1 = vld [vmem:[#allocation9 + $0xd4] ss:$8 sps:$4 sm:$0xff]  }
  0xb5   :  { %755 = vbcast.lane.b32.xlu0 %v752_v30, 320  ;;  %v3894_v4 = vld [vmem:[#allocation9 + $0xd0] ss:$8 sps:$4 sm:$0xff]   ;;  %v3895_v5 = vld [vmem:[#allocation9 + $0xe4] ss:$8 sps:$4 sm:$0xff]  }
  0xb6   :  { %763 = vbcast.lane.b32.xlu1 %v760_v34, 320  ;;  %v3897_v6 = vld [vmem:[#allocation9 + $0xe0] ss:$8 sps:$4 sm:$0xff]   ;;  %v3898_v8 = vld [vmem:[#allocation9 + $0xf4] ss:$8 sps:$4 sm:$0xff]  }
  0xb7   :  { %3458 = vmatmul.mubr.msk.bf16.vlgmr.msra.gmra.mrb[0].mxu0 %vm6375_vm0, %v172_v32  ;;  %497 = vmatpush1.bf16.msra.mxu1 %v3864_v36  ;;  %v3900_v9 = vld [vmem:[#allocation9 + $0xf0] ss:$8 sps:$4 sm:$0xff]   ;;  %v4479_v10 = vld [vmem:[#allocation6] ss:$0 sm:$0xff] }
  0xb8   :  { %498 = vmatprep.subr.bf16.mxu1 %v3865_v38 }
  0xb9   :  { %771 = vbcast.lane.b32.xlu0 %v768_v37, 320 }
  0xba   :  { %779 = vbcast.lane.b32.xlu1 %v776_v39, 320 }
  0xbb   :  { %499 = vmatpush1.bf16.msra.mxu1 %v3867_v40 }
  0xbc   :  { %500 = vmatprep.subr.bf16.mxu1 %v3868_v42 }
  0xbd   :  { %787 = vbcast.lane.b32.xlu0 %v784_v41, 320 }
  0xbe   :  { %795 = vbcast.lane.b32.xlu1 %v792_v43, 320 }
  0xbf   :  { %501 = vmatpush1.bf16.msra.mxu1 %v3870_v44 }
  0xc0   :  { %502 = vmatprep.subr.bf16.mxu1 %v3871_v45  ;;  %v6339_v45 = vmov 683565275  }
  0xc1   :  { %803 = vbcast.lane.b32.xlu0 %v800_v46, 320 }
  0xc2   :  { %811 = vbcast.lane.b32.xlu1 %v808_v48, 320 }
  0xc3   :  { %503 = vmatpush1.bf16.msra.mxu1 %v3873_v47  ;;  %v6327_v47 = vmov 2475754826  }
  0xc4   :  { %504 = vmatprep.subr.bf16.mxu1 %v3874_v49  ;;  %v6332_v49 = vmov 2131351028  }
  0xc5   :  { %819 = vbcast.lane.b32.xlu0 %v816_v50, 320 }
  0xc6   :  { %827 = vbcast.lane.b32.xlu1 %v824_v52, 320 }
  0xc7   :  { %505 = vmatpush1.bf16.msra.mxu1 %v3876_v51  ;;  %v6330_v51 = vmov 2102212464  }
  0xc8   :  { %506 = vmatprep.subr.bf16.mxu1 %v3877_v53  ;;  %v6336_v53 = vmov 920167782  }
  0xc9   :  { %835 = vbcast.lane.b32.xlu0 %v832_v54, 320 }
  0xca   :  { %843 = vbcast.lane.b32.xlu1 %v840_v56, 320 }
  0xcb   :  { %507 = vmatpush1.bf16.msra.mxu1 %v3879_v55 }
  0xcc   :  { %508 = vmatprep.subr.bf16.mxu1 %v3880_v57 }
  0xcf   :  { %509 = vmatpush1.bf16.msra.mxu1 %v3882_v58 }
  0xd0   :  { %510 = vmatprep.subr.bf16.mxu1 %v3883_v59 }
  0xd3   :  { %511 = vmatpush1.bf16.msra.mxu1 %v3885_v60 }
  0xd4   :  { %512 = vmatprep.subr.bf16.mxu1 %v3886_v61  ;;  %v6324_v61 = vmov 1326507024  }
  0xd7   :  { %513 = vmatpush1.bf16.msra.mxu1 %v3888_v62 }
  0xd8   :  { %514 = vmatprep.subr.bf16.mxu1 %v3889_v63 }
  0xdb   :  { %515 = vmatpush1.bf16.msra.mxu1 %v3891_v0 }
  0xdc   :  { %516 = vmatprep.subr.bf16.mxu1 %v3892_v1 }
  0xdf   :  { %517 = vmatpush1.bf16.msra.mxu1 %v3894_v4 }
  0xe0   :  { %518 = vmatprep.subr.bf16.mxu1 %v3895_v5 }
  0xe3   :  { %519 = vmatpush1.bf16.msra.mxu1 %v3897_v6 }
  0xe4   :  { %520 = vmatprep.subr.bf16.mxu1 %v3898_v8 }
  0xe7   :  { %521 = vmatpush1.bf16.msra.mxu1 %v3900_v9 }
 0x11f   :  { %v724_v11 = vpop.permute.xlu0 %723 }
 0x120   :  { %v4482_v12 = vmul.f32 %v4479_v10, %v724_v11  ;;  %v740_v14 = vpop.permute.xlu1 %739 }
 0x121   :  { %v4485_v15 = vmul.f32 %v4479_v10, %v740_v14 }
 0x122   :  { %v868_v16 = vand.u32 2147483647, %v4482_v12  ;;  %v871_v17 = vand.u32 2139095040, %v4482_v12 }
 0x123   :  { %v1074_v18 = vand.u32 2147483647, %v4485_v15  ;;  %v1077_v19 = vand.u32 2139095040, %v4485_v15  ;;  %v732_v20 = vpop.permute.xlu0 %731 }
 0x124   :  { %v872_v21 = vshrl.u32 %v871_v17, 23  ;;  %v4492_v22 = vmul.f32 %v4479_v10, %v732_v20  ;;  %v875_v23 = vand.u32 8388607, %v868_v16 }
 0x125   :  { %v1078_v24 = vshrl.u32 %v1077_v19, 23  ;;  %v1081_v25 = vand.u32 8388607, %v1074_v18 }
 0x126   :  { %v3509_v26 = vadd.s32 4294967169, %v872_v21  ;;  %v974_v28 = vand.u32 2139095040, %v4492_v22  ;;  %v876_v30 = vor.u32 8388608, %v875_v23  ;;  %v971_v39 = vand.u32 2147483647, %v4492_v22 }
 0x127   :  { %v3517_v27 = vadd.s32 4294967169, %v1078_v24  ;;  %v1082_v31 = vor.u32 8388608, %v1081_v25 }
 0x128   :  { %v878_v29 = vadd.s32 1, %v3509_v26  ;;  %v975_v33 = vshrl.u32 %v974_v28, 23  ;;  %v4500_v40 = vshll.u32 %v876_v30, 8 }
 0x129   :  { %v1084_v32 = vadd.s32 1, %v3517_v27  ;;  %v4504_v43 = vshll.u32 %v1082_v31, 8 }
 0x12a   :  { %vm879_vm1 = vcmp.gt.s32.totalorder %v878_v29, 0  ;;  %v3513_v35 = vadd.s32 4294967169, %v975_v33 }
 0x12b   :  { %v880_v34 = vsel %vm879_vm1, %v878_v29, 0  ;;  %vm1085_vm2 = vcmp.gt.s32.totalorder %v1084_v32, 0 }
 0x12c   :  { %v881_v36 = vshrl.u32 %v880_v34, 5  ;;  %v882_v37 = vand.u32 31, %v880_v34  ;;  %v1086_v38 = vsel %vm1085_vm2, %v1084_v32, 0  ;;  %v4511_v55 = vadd.s32 1, %v3513_v35 }
 0x12d   :  { %v4502_v41 = vshrl.u32 %v1086_v38, 5  ;;  %v1088_v42 = vand.u32 31, %v1086_v38 }
 0x12e   :  { %v883_v44 = vsub.s32 32, %v882_v37  ;;  %v885_v46 = vshll.u32 %v6339_v45, %v882_v37  ;;  %v888_v48 = vshll.u32 %v6327_v47, %v882_v37  ;;  %v891_v50 = vshll.u32 %v6332_v49, %v882_v37 }
 0x12f   :  { %v894_v52 = vshll.u32 %v6330_v51, %v882_v37  ;;  %v897_v54 = vshll.u32 %v6336_v53, %v882_v37  ;;  %vm900_vm3 = vcmp.lt.s32.totalorder %v881_v36, 1  ;;  %vm901_vm4 = vcmp.lt.s32.totalorder %v881_v36, 2 }
 0x130   :  { %v884_v56 = vshrl.u32 %v6339_v45, %v883_v44  ;;  %v886_v57 = vshrl.u32 %v6327_v47, %v883_v44  ;;  %v889_v58 = vshrl.u32 %v6332_v49, %v883_v44  ;;  %v892_v59 = vshrl.u32 %v6330_v51, %v883_v44 }
 0x131   :  { %v895_v60 = vshrl.u32 %v6336_v53, %v883_v44  ;;  %v898_v62 = vshrl.u32 %v6324_v61, %v883_v44  ;;  %vm903_vm5 = vcmp.lt.s32.totalorder %v881_v36, 4  ;;  %v1089_v4 = vsub.s32 32, %v1088_v42 }
 0x132   :  { %v887_v63 = vor.u32 %v886_v57, %v885_v46  ;;  %v890_v0 = vor.u32 %v889_v58, %v888_v48  ;;  %v893_v1 = vor.u32 %v892_v59, %v891_v50  ;;  %vm902_vm6 = vcmp.lt.s32.totalorder %v881_v36, 3 }
 0x133   :  { %v896_v5 = vor.u32 %v895_v60, %v894_v52  ;;  %v899_v6 = vor.u32 %v898_v62, %v897_v54  ;;  %v1091_v8 = vshll.u32 %v6339_v45, %v1088_v42  ;;  %v1094_v23 = vshll.u32 %v6327_v47, %v1088_v42 }
 0x134   :  { %v904_v9 = vsel %vm900_vm3, %v884_v56, %v887_v63  ;;  %v905_v11 = vsel %vm903_vm5, %v893_v1, 2102212464  ;;  %v908_v14 = vsel %vm900_vm3, %v887_v63, %v890_v0  ;;  %v912_v17 = vsel %vm900_vm3, %v890_v0, %v893_v1 }
 0x135   :  { %v906_v19 = vsel %vm902_vm6, %v890_v0, %v905_v11  ;;  %v909_v20 = vsel %vm903_vm5, %v896_v5, 920167782  ;;  %v913_v21 = vsel %vm903_vm5, %v899_v6, 1326507024  ;;  %v1090_v26 = vshrl.u32 %v6339_v45, %v1089_v4 }
 0x136   :  { %v910_v24 = vsel %vm902_vm6, %v893_v1, %v909_v20  ;;  %v914_v25 = vsel %vm902_vm6, %v896_v5, %v913_v21  ;;  %v1092_v27 = vshrl.u32 %v6327_v47, %v1089_v4  ;;  %v907_v28 = vsel %vm901_vm4, %v904_v9, %v906_v19 }
 0x137   :  { %v911_v29 = vsel %vm901_vm4, %v908_v14, %v910_v24  ;;  %v915_v30 = vsel %vm901_vm4, %v912_v17, %v914_v25  ;;  %v1095_v31 = vshrl.u32 %v6332_v49, %v1089_v4  ;;  %v1097_v44 = vshll.u32 %v6332_v49, %v1088_v42  ;;  %v748_v14 = vpop.permute.xlu1 %747 }
 0x138   :  { %v4531_v32 = vmul.u32.u64.low %v4500_v40, %v915_v30  ;;  %v4532_v33 = vmul.u32.u64.high %v4500_v40, %v915_v30, %v4531_v32  ;;  %v4535_v34 = vmul.u32.u64.low %v4500_v40, %v911_v29  ;;  %v4536_v35 = vmul.u32.u64.high %v4500_v40, %v911_v29, %v4535_v34 }
 0x139   :  { %v1093_v37 = vor.u32 %v1092_v27, %v1091_v8  ;;  %v1096_v38 = vor.u32 %v1095_v31, %v1094_v23  ;;  %v1098_v46 = vshrl.u32 %v6330_v51, %v1089_v4  ;;  %v1100_v36 = vshll.u32 %v6330_v51, %v1088_v42 }
 0x13a   :  { %v1101_v48 = vshrl.u32 %v6336_v53, %v1089_v4  ;;  %v1103_v50 = vshll.u32 %v6336_v53, %v1088_v42  ;;  %v1104_v52 = vshrl.u32 %v6324_v61, %v1089_v4  ;;  %v923_v54 = vmul.u32 %v4500_v40, %v907_v28 }
 0x13b   :  { %v1099_v56 = vor.u32 %v1098_v46, %v1097_v44  ;;  %vm1106_vm7 = vcmp.lt.s32.totalorder %v4502_v41, 1  ;;  %vm1107_vm8 = vcmp.lt.s32.totalorder %v4502_v41, 2  ;;  %vm925_vm9 = vc.u32 %v4532_v33, %v4535_v34 }
 0x13c   :  { %v926_v57 = vadd.s32 1, %v4536_v35  ;;  %v1102_v58 = vor.u32 %v1101_v48, %v1100_v36  ;;  %vm1108_vm10 = vcmp.lt.s32.totalorder %v4502_v41, 3  ;;  %v1105_v59 = vor.u32 %v1104_v52, %v1103_v50 }
 0x13d   :  { %vm1109_vm11 = vcmp.lt.s32.totalorder %v4502_v41, 4  ;;  %v1110_v42 = vsel %vm1106_vm7, %v1090_v26, %v1093_v37  ;;  %v1114_v60 = vsel %vm1106_vm7, %v1093_v37, %v1096_v38  ;;  %v1118_v0 = vsel %vm1106_vm7, %v1096_v38, %v1099_v56 }
 0x13e   :  { %v927_v40 = vsel %vm925_vm9, %v926_v57, %v4536_v35  ;;  %v1111_v62 = vsel %vm1109_vm11, %v1099_v56, 2102212464  ;;  %v1115_v63 = vsel %vm1109_vm11, %v1102_v58, 920167782  ;;  %v1119_v6 = vsel %vm1109_vm11, %v1105_v59, 1326507024 }
 0x13f   :  { %v928_v1 = vadd.s32 %v927_v40, %v923_v54  ;;  %v1112_v4 = vsel %vm1108_vm10, %v1096_v38, %v1111_v62  ;;  %v1116_v5 = vsel %vm1108_vm10, %v1099_v56, %v1115_v63  ;;  %v1120_v11 = vsel %vm1108_vm10, %v1102_v58, %v1119_v6 }
 0x140   :  { %v1113_v8 = vsel %vm1107_vm8, %v1110_v42, %v1112_v4  ;;  %v1117_v9 = vsel %vm1107_vm8, %v1114_v60, %v1116_v5  ;;  %vm982_vm12 = vcmp.gt.s32.totalorder %v4511_v55, 0  ;;  %v1121_v19 = vsel %vm1107_vm8, %v1118_v0, %v1120_v11 }
 0x141   :  { %v929_v17 = vadd.s32 536870912, %v928_v1  ;;  %v4562_v20 = vmul.u32.u64.low %v4504_v43, %v1117_v9  ;;  %v4563_v21 = vmul.u32.u64.high %v4504_v43, %v1117_v9, %v4562_v20  ;;  %v978_v25 = vand.u32 8388607, %v971_v39 }
 0x142   :  { %v4567_v23 = vmul.u32.u64.low %v4504_v43, %v1121_v19  ;;  %v4568_v24 = vmul.u32.u64.high %v4504_v43, %v1121_v19, %v4567_v23  ;;  %v983_v26 = vsel %vm982_vm12, %v4511_v55, 0  ;;  %v4576_v41 = vmul.f32 %v4479_v10, %v748_v14 }
 0x143   :  { %v4573_v27 = vshrl.u32 %v929_v17, 30  ;;  %v985_v28 = vand.u32 31, %v983_v26  ;;  %v1129_v29 = vmul.u32 %v4504_v43, %v1113_v8  ;;  %v1132_v31 = vadd.s32 1, %v4563_v21 }
 0x144   :  { %6399 = vst [vmem:[#allocation25_spill] sm:$0xff] %v4576_v41  ;;  %vm1131_vm13 = vc.u32 %v4568_v24, %v4562_v20  ;;  %v979_v35 = vor.u32 8388608, %v978_v25  ;;  %v1180_v46 = vand.u32 2139095040, %v4576_v41  ;;  %v984_v36 = vshrl.u32 %v983_v26, 5 }
 0x145   :  { %v931_v30 = vshll.u32 %v4573_v27, 30  ;;  %v986_v32 = vsub.s32 32, %v985_v28  ;;  %v988_v37 = vshll.u32 %v6339_v45, %v985_v28  ;;  %v1133_v38 = vsel %vm1131_vm13, %v1132_v31, %v4563_v21 }
 0x146   :  { %v991_v44 = vshll.u32 %v6327_v47, %v985_v28  ;;  %v1134_v43 = vadd.s32 %v1133_v38, %v1129_v29  ;;  %v994_v54 = vshll.u32 %v6332_v49, %v985_v28  ;;  %v997_v57 = vshll.u32 %v6330_v51, %v985_v28 }
 0x147   :  { %v4584_v55 = vsub.s32 %v928_v1, %v931_v30  ;;  %v989_v48 = vshrl.u32 %v6327_v47, %v986_v32  ;;  %v992_v50 = vshrl.u32 %v6332_v49, %v986_v32  ;;  %v995_v56 = vshrl.u32 %v6330_v51, %v986_v32 }
 0x148   :  { %v1135_v58 = vadd.s32 536870912, %v1134_v43  ;;  %v987_v59 = vshrl.u32 %v6339_v45, %v986_v32  ;;  %v998_v60 = vshrl.u32 %v6336_v53, %v986_v32  ;;  %v1000_v63 = vshll.u32 %v6336_v53, %v985_v28 }
 0x149   :  { %v934_v52 = vsub.s32 0, %v4584_v55  ;;  %v990_v42 = vor.u32 %v989_v48, %v988_v37  ;;  %v993_v62 = vor.u32 %v992_v50, %v991_v44  ;;  %v1001_v0 = vshrl.u32 %v6324_v61, %v986_v32 }
 0x14a   :  { %v4600_v1 = vshrl.u32 %v1135_v58, 30  ;;  %v996_v4 = vor.u32 %v995_v56, %v994_v54  ;;  %v999_v5 = vor.u32 %v998_v60, %v997_v57  ;;  %vm1003_vm14 = vcmp.lt.s32.totalorder %v984_v36, 1 }
 0x14b   :  { %v3510_v40 = vmin.u32 %v934_v52, %v4584_v55  ;;  %vm1005_vm15 = vcmp.lt.s32.totalorder %v984_v36, 3  ;;  %vm1006_vm1 = vcmp.lt.s32.totalorder %v984_v36, 4  ;;  %v1181_v8 = vshrl.u32 %v1180_v46, 23 }
 0x14c   :  { %v1137_v9 = vshll.u32 %v4600_v1, 30  ;;  %v1002_v11 = vor.u32 %v1001_v0, %v1000_v63  ;;  %vm1004_vm2 = vcmp.lt.s32.totalorder %v984_v36, 2  ;;  %v1008_v14 = vsel %vm1006_vm1, %v996_v4, 2102212464 }
 0x14d   :  { %v936_v6 = vclz %v3510_v40  ;;  %v1011_v19 = vsel %vm1003_vm14, %v990_v42, %v993_v62  ;;  %v1012_v21 = vsel %vm1006_vm1, %v999_v5, 920167782  ;;  %v1019_v23 = vshll.u32 %v979_v35, 8 }
 0x14e   :  { %v4606_v25 = vsub.s32 %v1134_v43, %v1137_v9  ;;  %v1007_v26 = vsel %vm1003_vm14, %v987_v59, %v990_v42  ;;  %v1009_v28 = vsel %vm1005_vm15, %v993_v62, %v1008_v14  ;;  %v1013_v29 = vsel %vm1005_vm15, %v996_v4, %v1012_v21 }
 0x14f   :  { %v3511_v17 = vadd.s32 4294967294, %v936_v6  ;;  %v924_v30 = vadd.s32 %v4535_v34, %v4532_v33  ;;  %v1014_v31 = vsel %vm1004_vm2, %v1011_v19, %v1013_v29  ;;  %v1015_v32 = vsel %vm1003_vm14, %v993_v62, %v996_v4  ;;  %v181_v6 = vld [vmem:[%s6308_s3] sm:$0x3] }
 0x150   :  { %v1140_v38 = vsub.s32 0, %v4606_v25  ;;  %v1016_v35 = vsel %vm1006_vm1, %v1002_v11, 1326507024  ;;  %v3521_v44 = vadd.s32 4294967169, %v1181_v8  ;;  %v1010_v48 = vsel %vm1004_vm2, %v1007_v26, %v1009_v28 }
 0x151   :  { %vm3512_vm3 = vcmp.lt.s32.totalorder %v3511_v17, 0  ;;  %v1017_v50 = vsel %vm1005_vm15, %v999_v5, %v1016_v35  ;;  %v4621_v34 = vmul.u32.u64.low %v1019_v23, %v1014_v31  ;;  %v4622_v54 = vmul.u32.u64.high %v1019_v23, %v1014_v31, %v4621_v34 }
 0x152   :  { %v939_v37 = vsel %vm3512_vm3, 0, %v3511_v17  ;;  %v3518_v52 = vmin.u32 %v1140_v38, %v4606_v25  ;;  %v1018_v33 = vsel %vm1004_vm2, %v1015_v32, %v1017_v50  ;;  %v1177_v59 = vand.u32 2147483647, %v4576_v41  ;;  %v764_v38 = vpop.permute.xlu1 %763 }
 0x153   :  { %v940_v46 = vsub.s32 32, %v939_v37  ;;  %v944_v43 = vsub.s32 4294967266, %v939_v37  ;;  %v4625_v57 = vmul.u32.u64.low %v1019_v23, %v1018_v33  ;;  %v4626_v58 = vmul.u32.u64.high %v1019_v23, %v1018_v33, %v4625_v57 }
 0x154   :  { %v1142_v42 = vclz %v3518_v52  ;;  %v1187_v60 = vadd.s32 1, %v3521_v44  ;;  %v941_v40 = vshll.u32 %v4584_v55, %v939_v37  ;;  %v1026_v0 = vmul.u32 %v1019_v23, %v1010_v48 }
 0x155   :  { %v945_v56 = vadd.s32 127, %v944_v43  ;;  %v942_v62 = vshrl.u32 %v924_v30, %v940_v46  ;;  %v1029_v36 = vadd.s32 1, %v4622_v54  ;;  %vm1028_vm5 = vc.u32 %v4626_v58, %v4621_v34 }
 0x156   :  { %v3519_v4 = vadd.s32 4294967294, %v1142_v42  ;;  %vm1188_vm4 = vcmp.gt.s32.totalorder %v1187_v60, 0  ;;  %v1184_v5 = vand.u32 8388607, %v1177_v59  ;;  %v1130_v55 = vadd.s32 %v4562_v20, %v4568_v24 }
 0x157   :  { %v946_v63 = vshll.u32 %v945_v56, 23  ;;  %v1030_v8 = vsel %vm1028_vm5, %v1029_v36, %v4622_v54  ;;  %v1189_v9 = vsel %vm1188_vm4, %v1187_v60, 0  ;;  %v943_v11 = vor.u32 %v942_v62, %v941_v40 }
 0x158   :  { %vm3520_vm6 = vcmp.lt.s32.totalorder %v3519_v4, 0  ;;  %v1031_v19 = vadd.s32 %v1030_v8, %v1026_v0  ;;  %v1191_v26 = vand.u32 31, %v1189_v9  ;;  %v4642_v28 = vrot.slane %v181_v6, %v4459_v7 }
 0x159   :  { %v947_v14 = vor.u32 4788187, %v946_v63  ;;  %v1145_v17 = vsel %vm3520_vm6, 0, %v3519_v4  ;;  %v4645_v29 = vrot.slane %v181_v6, %v4463_v13  ;;  %v1185_v31 = vor.u32 8388608, %v1184_v5 }
 0x15a   :  { %v1146_v21 = vsub.s32 32, %v1145_v17  ;;  %v1150_v23 = vsub.s32 4294967266, %v1145_v17  ;;  %v1032_v30 = vadd.s32 536870912, %v1031_v19  ;;  %v1147_v20 = vshll.u32 %v4606_v25, %v1145_v17 }
 0x15b   :  { %v1192_v37 = vsub.s32 32, %v1191_v26  ;;  %v948_v35 = vand.u32 2147483647, %v947_v14  ;;  %v950_v44 = vcvt.s32.f32 %v943_v11  ;;  %v1190_v43 = vshrl.u32 %v1189_v9, 5 }
 0x15c   :  { %v1148_v24 = vshrl.u32 %v1130_v55, %v1146_v21  ;;  %v1151_v32 = vadd.s32 127, %v1150_v23  ;;  %v4648_v46 = vshrl.u32 %v1032_v30, 30  ;;  %v1194_v50 = vshll.u32 %v6339_v45, %v1191_v26 }
 0x15d   :  { %v1195_v52 = vshrl.u32 %v6327_v47, %v1192_v37  ;;  %v1197_v33 = vshll.u32 %v6327_v47, %v1191_v26  ;;  %v1160_v54 = vsub.s32 4, %v4600_v1  ;;  %v1198_v56 = vshrl.u32 %v6332_v49, %v1192_v37 }
 0x15e   :  { %v1152_v48 = vshll.u32 %v1151_v32, 23  ;;  %v1034_v25 = vshll.u32 %v4648_v46, 30  ;;  %v4657_v57 = vmul.f32 %v4479_v10, %v764_v38  ;;  %v1149_v42 = vor.u32 %v1148_v24, %v1147_v20 }
 0x15f   :  { %v1200_v40 = vshll.u32 %v6332_v49, %v1191_v26  ;;  %v4660_v62 = vshll.u32 %v1185_v31, 8  ;;  %v951_v63 = vmul.f32 %v950_v44, %v948_v35  ;;  %vm1209_vm7 = vcmp.lt.s32.totalorder %v1190_v43, 1 }
 0x160   :  { %6400 = vst [vmem:[#allocation26_spill] sm:$0xff] %v4657_v57  ;;  %v1153_v60 = vor.u32 4788187, %v1152_v48  ;;  %v4662_v0 = vsub.s32 %v1031_v19, %v1034_v25  ;;  %vm1210_vm8 = vcmp.lt.s32.totalorder %v1190_v43, 2  ;;  %vm870_vm9 = vcmp.lt.s32.totalorder %v4482_v12, 0 }
 0x161   :  { %v1193_v4 = vshrl.u32 %v6339_v45, %v1192_v37  ;;  %v1196_v36 = vor.u32 %v1195_v52, %v1194_v50  ;;  %v1199_v5 = vor.u32 %v1198_v56, %v1197_v33  ;;  %v1201_v6 = vshrl.u32 %v6330_v51, %v1192_v37 }
 0x162   :  { %v1037_v55 = vsub.s32 0, %v4662_v0  ;;  %v1203_v8 = vshll.u32 %v6330_v51, %v1191_v26  ;;  %v1204_v9 = vshrl.u32 %v6336_v53, %v1192_v37  ;;  %v1206_v11 = vshll.u32 %v6336_v53, %v1191_v26 }
 0x163   :  { %v1154_v14 = vand.u32 2147483647, %v1153_v60  ;;  %v1156_v17 = vcvt.s32.f32 %v1149_v42  ;;  %v1202_v19 = vor.u32 %v1201_v6, %v1200_v40  ;;  %v1207_v21 = vshrl.u32 %v6324_v61, %v1192_v37 }
 0x164   :  { %v3514_v23 = vmin.u32 %v1037_v55, %v4662_v0  ;;  %v1205_v30 = vor.u32 %v1204_v9, %v1203_v8  ;;  %vm1211_vm10 = vcmp.lt.s32.totalorder %v1190_v43, 3  ;;  %vm1212_vm11 = vcmp.lt.s32.totalorder %v1190_v43, 4 }
 0x165   :  { %v1208_v31 = vor.u32 %v1207_v21, %v1206_v11  ;;  %v1213_v20 = vsel %vm1209_vm7, %v1193_v4, %v1196_v36  ;;  %v1214_v24 = vsel %vm1212_vm11, %v1202_v19, 2102212464  ;;  %v1217_v32 = vsel %vm1209_vm7, %v1196_v36, %v1199_v5  ;;  %v756_v11 = vpop.permute.xlu0 %755 }
 0x166   :  { %v1039_v38 = vclz %v3514_v23  ;;  %v1215_v35 = vsel %vm1211_vm10, %v1199_v5, %v1214_v24  ;;  %v1218_v26 = vsel %vm1212_vm11, %v1205_v30, 920167782  ;;  %v1221_v44 = vsel %vm1209_vm7, %v1199_v5, %v1202_v19 }
 0x167   :  { %v952_v48 = vxor.u32 2147483648, %v951_v63  ;;  %v1219_v37 = vsel %vm1211_vm10, %v1202_v19, %v1218_v26  ;;  %v1222_v50 = vsel %vm1212_vm11, %v1208_v31, 1326507024  ;;  %v1386_v52 = vand.u32 2139095040, %v4657_v57 }
 0x168   :  { %v1157_v33 = vmul.f32 %v1156_v17, %v1154_v14  ;;  %v3515_v25 = vadd.s32 4294967294, %v1039_v38  ;;  %v1220_v56 = vsel %vm1210_vm8, %v1217_v32, %v1219_v37  ;;  %v1223_v42 = vsel %vm1211_vm10, %v1205_v30, %v1222_v50 }
 0x169   :  { %v1216_v60 = vsel %vm1210_vm8, %v1213_v20, %v1215_v35  ;;  %v1224_v40 = vsel %vm1210_vm8, %v1221_v44, %v1223_v42  ;;  %v4684_v4 = vmul.u32.u64.low %v4660_v62, %v1220_v56  ;;  %v4685_v36 = vmul.u32.u64.high %v4660_v62, %v1220_v56, %v4684_v4 }
 0x16a   :  { %v954_v5 = vsub.s32 4, %v4573_v27  ;;  %vm1076_vm12 = vcmp.lt.s32.totalorder %v4485_v15, 0  ;;  %v4691_v6 = vmul.u32.u64.low %v4660_v62, %v1224_v40  ;;  %v4692_v55 = vmul.u32.u64.high %v4660_v62, %v1224_v40, %v4691_v6 }
 0x16b   :  { %vm4696_vm13 = vcmp.le.f32.partialorder %v868_v16, 0.7853982  ;;  %vm4702_vm14 = vcmp.le.f32.partialorder %v1074_v18, 0.7853982  ;;  %vm3516_vm15 = vcmp.lt.s32.totalorder %v3515_v25, 0  ;;  %v1387_v9 = vshrl.u32 %v1386_v52, 23 }
 0x16c   :  { %v953_v14 = vsel %vm870_vm9, %v952_v48, %v951_v63  ;;  %vm973_vm1 = vcmp.lt.s32.totalorder %v4492_v22, 0  ;;  %v1232_v17 = vmul.u32 %v4660_v62, %v1216_v60  ;;  %v1383_v16 = vand.u32 2147483647, %v4657_v57 }
 0x16d   :  { %v1158_v19 = vxor.u32 2147483648, %v1157_v33  ;;  %v1161_v18 = vsel %vm1076_vm12, %v1160_v54, %v4600_v1  ;;  %v1235_v21 = vadd.s32 1, %v4685_v36  ;;  %v3529_v23 = vadd.s32 4294967169, %v1387_v9 }
 0x16e   :  { %v4720_v63 = vsel %vm870_vm9, %v954_v5, %v4573_v27  ;;  %v1042_v30 = vsel %vm3516_vm15, 0, %v3515_v25  ;;  %vm1234_vm2 = vc.u32 %v4692_v55, %v4684_v4  ;;  %v4725_v62 = vmul.f32 %v4479_v10, %v756_v11 }
 0x16f   :  { %v956_v31 = vsel %vm4696_vm13, %v4482_v12, %v953_v14  ;;  %v1057_v1 = vsub.s32 4, %v4648_v46  ;;  %v1236_v54 = vsel %vm1234_vm2, %v1235_v21, %v4685_v36  ;;  %v1393_v20 = vadd.s32 1, %v3529_v23 }
 0x170   :  { %v1163_v27 = vsel %vm4702_vm14, 0, %v1161_v18  ;;  %v1027_v24 = vadd.s32 %v4621_v34, %v4626_v58  ;;  %v1237_v32 = vadd.s32 %v1236_v54, %v1232_v17  ;;  %v1390_v38 = vand.u32 8388607, %v1383_v16 }
 0x171   :  { %v1159_v35 = vsel %vm1076_vm12, %v1158_v19, %v1157_v33  ;;  %v1043_v26 = vsub.s32 32, %v1042_v30  ;;  %v1047_v44 = vsub.s32 4294967266, %v1042_v30  ;;  %vm1394_vm3 = vcmp.gt.s32.totalorder %v1393_v20, 0 }
 0x172   :  { %3925 = vcosq.f32 %v956_v31  ;;  %v1238_v37 = vadd.s32 536870912, %v1237_v32  ;;  %v1395_v50 = vsel %vm1394_vm3, %v1393_v20, 0  ;;  %v4743_v52 = vand.u32 3, %v1163_v27  ;;  %v780_v20 = vpop.permute.xlu1 %779 }
 0x173   :  { %3927 = vsinq.f32 %v956_v31  ;;  %v4748_v34 = vsel %vm973_vm1, %v1057_v1, %v4648_v46  ;;  %v1397_v58 = vand.u32 31, %v1395_v50  ;;  %v4753_v33 = vsel %vm4702_vm14, %v4485_v15, %v1159_v35 }
 0x174   :  { %v1044_v25 = vshll.u32 %v4662_v0, %v1042_v30  ;;  %v4756_v56 = vshrl.u32 %v1238_v37, 30  ;;  %v1391_v42 = vor.u32 8388608, %v1390_v38  ;;  %v1045_v60 = vshrl.u32 %v1027_v24, %v1043_v26 }
 0x175   :  { %v1048_v40 = vadd.s32 127, %v1047_v44  ;;  %v1396_v36 = vshrl.u32 %v1395_v50, 5  ;;  %v1398_v5 = vsub.s32 32, %v1397_v58  ;;  %v1400_v46 = vshll.u32 %v6339_v45, %v1397_v58 }
 0x176   :  { %v1240_v6 = vshll.u32 %v4756_v56, 30  ;;  %v1403_v9 = vshll.u32 %v6327_v47, %v1397_v58  ;;  %v1409_v11 = vshll.u32 %v6330_v51, %v1397_v58  ;;  %v1406_v0 = vshll.u32 %v6332_v49, %v1397_v58 }
 0x177   :  { %v1401_v43 = vshrl.u32 %v6327_v47, %v1398_v5  ;;  %v1404_v14 = vshrl.u32 %v6332_v49, %v1398_v5  ;;  %v1407_v17 = vshrl.u32 %v6330_v51, %v1398_v5  ;;  %v1410_v18 = vshrl.u32 %v6336_v53, %v1398_v5 }
 0x178   :  { %v4766_v19 = vsub.s32 %v1237_v32, %v1240_v6  ;;  %v6323_v21 = vand.u32 2147483647, %v4725_v62  ;;  %v1283_v23 = vand.u32 2139095040, %v4725_v62  ;;  %v4771_v30 = vor.u32 %v1045_v60, %v1044_v25 }
 0x179   :  { %v1049_v31 = vshll.u32 %v1048_v40, 23  ;;  %v1399_v1 = vshrl.u32 %v6339_v45, %v1398_v5  ;;  %v4774_v54 = vshll.u32 %v1391_v42, 8  ;;  %vm4778_vm4 = vcmp.le.f32.partialorder %v971_v39, 0.7853982 }
 0x17a   :  { %v1243_v24 = vsub.s32 0, %v4766_v19  ;;  %v1402_v32 = vor.u32 %v1401_v43, %v1400_v46  ;;  %v1405_v38 = vor.u32 %v1404_v14, %v1403_v9  ;;  %v1411_v35 = vor.u32 %v1410_v18, %v1409_v11 }
 0x17b   :  { %v1408_v26 = vor.u32 %v1407_v17, %v1406_v0  ;;  %v1412_v44 = vshll.u32 %v6336_v53, %v1397_v58  ;;  %v1413_v37 = vshrl.u32 %v6324_v61, %v1398_v5  ;;  %vm1415_vm5 = vcmp.lt.s32.totalorder %v1396_v36, 1 }
 0x17c   :  { %v4785_v50 = vpop.eup %3925  ;;  %v3522_v25 = vmin.u32 %v1243_v24, %v4766_v19  ;;  %vm1417_vm6 = vcmp.lt.s32.totalorder %v1396_v36, 3  ;;  %v1284_v39 = vshrl.u32 %v1283_v23, 23  ;;  %v4789_v42 = vmul.f32 %v4479_v10, %v780_v20 }
 0x17d   :  { %v4791_v60 = vpop.eup %3927  ;;  %v1414_v40 = vor.u32 %v1413_v37, %v1412_v44  ;;  %vm1416_vm7 = vcmp.lt.s32.totalorder %v1396_v36, 2  ;;  %vm1418_vm8 = vcmp.lt.s32.totalorder %v1396_v36, 4  ;;  %v1419_v6 = vsel %vm1415_vm5, %v1399_v1, %v1402_v32 }
 0x17e   :  { %6407 = vst [vmem:[#allocation27_spill] sm:$0xff] %v4789_v42  ;;  %v1245_v58 = vclz %v3522_v25  ;;  %v1420_v46 = vsel %vm1418_vm8, %v1408_v26, 2102212464  ;;  %v1423_v5 = vsel %vm1415_vm5, %v1402_v32, %v1405_v38  ;;  %v1424_v9 = vsel %vm1418_vm8, %v1411_v35, 920167782  ;;  %v772_v25 = vpop.permute.xlu0 %771 }
 0x17f   :  { %v1421_v11 = vsel %vm1417_vm6, %v1405_v38, %v1420_v46  ;;  %v1425_v43 = vsel %vm1417_vm6, %v1408_v26, %v1424_v9  ;;  %v1427_v14 = vsel %vm1415_vm5, %v1405_v38, %v1408_v26  ;;  %v1428_v0 = vsel %vm1418_vm8, %v1414_v40, 1326507024 }
 0x180   :  { %v1050_v17 = vor.u32 4788187, %v1049_v31  ;;  %v3523_v18 = vadd.s32 4294967294, %v1245_v58  ;;  %v1426_v23 = vsel %vm1416_vm7, %v1423_v5, %v1425_v43  ;;  %v1429_v20 = vsel %vm1417_vm6, %v1411_v35, %v1428_v0 }
 0x181   :  { %v1422_v1 = vsel %vm1416_vm7, %v1419_v6, %v1421_v11  ;;  %v1430_v24 = vsel %vm1416_vm7, %v1427_v14, %v1429_v20  ;;  %v4803_v32 = vmul.u32.u64.low %v4774_v54, %v1426_v23  ;;  %v4804_v44 = vmul.u32.u64.high %v4774_v54, %v1426_v23, %v4803_v32 }
 0x182   :  { %vm3524_vm9 = vcmp.lt.s32.totalorder %v3523_v18, 0  ;;  %v4808_v37 = vmul.u32.u64.low %v4774_v54, %v1430_v24  ;;  %v4809_v38 = vmul.u32.u64.high %v4774_v54, %v1430_v24, %v4808_v37  ;;  %v3525_v31 = vadd.s32 4294967169, %v1284_v39 }
 0x183   :  { %3929 = vcosq.f32 %v4753_v33  ;;  %v1248_v26 = vsel %vm3524_vm9, 0, %v3523_v18  ;;  %v4817_v36 = vand.u32 8388607, %v6323_v21  ;;  %v1051_v40 = vand.u32 2147483647, %v1050_v17 }
 0x184   :  { %v1053_v6 = vcvt.s32.f32 %v4771_v30  ;;  %v1438_v58 = vmul.u32 %v4774_v54, %v1422_v1  ;;  %v1290_v46 = vadd.s32 1, %v3525_v31  ;;  %3931 = vsinq.f32 %v4753_v33 }
 0x185   :  { %v1233_v39 = vadd.s32 %v4684_v4, %v4692_v55  ;;  %v1441_v5 = vadd.s32 1, %v4804_v44  ;;  %v1592_v9 = vand.u32 2139095040, %v4789_v42  ;;  %v1249_v43 = vsub.s32 32, %v1248_v26 }
 0x186   :  { %v1253_v14 = vsub.s32 4294967266, %v1248_v26  ;;  %vm1440_vm10 = vc.u32 %v4809_v38, %v4803_v32  ;;  %v4829_v30 = vmul.f32 %v4479_v10, %v772_v25  ;;  %v1288_v4 = vor.u32 8388608, %v4817_v36 }
 0x187   :  { %v1442_v33 = vsel %vm1440_vm10, %v1441_v5, %v4804_v44  ;;  %vm1291_vm11 = vcmp.gt.s32.totalorder %v1290_v46, 0  ;;  %v4835_v18 = vmul.f32 %v1053_v6, %v1051_v40  ;;  %v6322_v20 = vand.u32 2147483647, %v4789_v42 }
 0x188   :  { %6408 = vst [vmem:[#allocation28_spill] sm:$0xff] %v4829_v30  ;;  %v1443_v23 = vadd.s32 %v1442_v33, %v1438_v58  ;;  %v1263_v24 = vsub.s32 4, %v4756_v56  ;;  %v1292_v37 = vsel %vm1291_vm11, %v1290_v46, 0  ;;  %v1593_v31 = vshrl.u32 %v1592_v9, 23 }
 0x189   :  { %v1250_v36 = vshll.u32 %v4766_v19, %v1248_v26  ;;  %v1251_v25 = vshrl.u32 %v1233_v39, %v1249_v43  ;;  %v1254_v5 = vadd.s32 127, %v1253_v14  ;;  %v1294_v6 = vand.u32 31, %v1292_v37 }
 0x18a   :  { %v271_v11 = vpop.f32.mrb[0].mxu0  ;;  %v1444_v40 = vadd.s32 536870912, %v1443_v23  ;;  %v1055_v2 = vxor.u32 2147483648, %v4835_v18  ;;  %v3537_v26 = vadd.s32 4294967169, %v1593_v31  ;;  %vm1179_vm12 = vcmp.lt.s32.totalorder %v4576_v41, 0 }
 0x18b   :  { %v272_v54 = vadd.f32 %v271_v11, %v4642_v28  ;;  %v273_v0 = vpop.f32.mrb[1].mxu0  ;;  %v1295_v19 = vsub.s32 32, %v1294_v6  ;;  %v1255_v43 = vshll.u32 %v1254_v5, 23  ;;  %v1297_v14 = vshll.u32 %v6339_v45, %v1294_v6 }
 0x18c   :  { %v274_v55 = vadd.f32 %v273_v0, %v4645_v29  ;;  %v275_v17 = vpop.f32.mrb[2].mxu0  ;;  %vm4915_vm7 = vcmp.le.f32.partialorder %v1177_v59, 0.7853982  ;;  %vm1385_vm8 = vcmp.lt.s32.totalorder %v4657_v57, 0 }
 0x18d   :  { %v276_v1 = vadd.f32 %v275_v17, %v4642_v28  ;;  %v277_v10 = vpop.f32.mrb[3].mxu0  ;;  %v280_v11 = vmax.f32 %v272_v54, 0.0  ;;  %v4845_v28 = vand.u32 8388607, %v6322_v20  ;;  %v4847_v46 = vpop.eup %3929  ;;  %v1300_v54 = vshll.u32 %v6327_v47, %v1294_v6 }
 0x18e   :  { %v278_v44 = vadd.f32 %v277_v10, %v4645_v29  ;;  %v281_v58 = vmax.f32 %v274_v55, 0.0  ;;  %6409 = vst [vmem:[#allocation29_spill] sm:$0xff] %v4847_v46  ;;  %v4849_v29 = vshrl.u32 %v1444_v40, 30  ;;  %v4853_v55 = vpop.eup %3931  ;;  %v4855_v17 = vor.u32 %v1251_v25, %v1250_v36 }
 0x18f   :  { %v282_v0 = vmax.f32 %v276_v1, 0.0  ;;  %6410 = vst [vmem:[#allocation30_spill] sm:$0xff] %v4853_v55  ;;  %v1298_v10 = vshrl.u32 %v6327_v47, %v1295_v19  ;;  %v1301_v31 = vshrl.u32 %v6332_v49, %v1295_v19  ;;  %v1304_v5 = vshrl.u32 %v6330_v51, %v1295_v19 }
 0x190   :  { %v283_v33 = vmax.f32 %v278_v44, 0.0  ;;  %v1446_v1 = vshll.u32 %v4849_v29, 30  ;;  %v1303_v44 = vshll.u32 %v6332_v49, %v1294_v6  ;;  %v1307_v36 = vshrl.u32 %v6336_v53, %v1295_v19 }
 0x191   :  { %v284_v9 = vpack.c.bf16 %v282_v0, %v280_v11  ;;  %v1293_v11 = vshrl.u32 %v1292_v37, 5  ;;  %v1306_v0 = vshll.u32 %v6330_v51, %v1294_v6  ;;  %v4866_v25 = vshll.u32 %v1288_v4, 8 }
 0x192   :  { %v285_v39 = vpack.c.bf16 %v283_v33, %v281_v58  ;;  %v4863_v40 = vsub.s32 %v1443_v23, %v1446_v1  ;;  %v1597_v58 = vor.u32 8388608, %v4845_v28  ;;  %v1256_v33 = vor.u32 4788187, %v1255_v43 }
 0x193   :  { %v1296_v35 = vshrl.u32 %v6339_v45, %v1295_v19  ;;  %v1302_v37 = vor.u32 %v1301_v31, %v1300_v54  ;;  %v1305_v20 = vor.u32 %v1304_v5, %v1303_v44  ;;  %v1308_v21 = vor.u32 %v1307_v36, %v1306_v0 }
 0x194   :  { %522 = vmatprep.mubr.bf16.mxu1 %v285_v39  ;;  %v1299_v39 = vor.u32 %v1298_v10, %v1297_v14  ;;  %v1449_v48 = vsub.s32 0, %v4863_v40  ;;  %v1309_v23 = vshll.u32 %v6336_v53, %v1294_v6  ;;  %v1310_v4 = vshrl.u32 %v6324_v61, %v1295_v19 }
 0x195   :  { %523 = vmatmul.mubr.bf16.vlgmr.msra.gmra.mrb[0].mxu1 %v284_v9  ;;  %v1259_v9 = vcvt.s32.f32 %v4855_v17  ;;  %vm1312_vm14 = vcmp.lt.s32.totalorder %v1293_v11, 1  ;;  %v1599_v1 = vadd.s32 1, %v3537_v26  ;;  %vm1313_vm15 = vcmp.lt.s32.totalorder %v1293_v11, 2 }
 0x196   :  { %v3530_v28 = vmin.u32 %v1449_v48, %v4863_v40  ;;  %vm1314_vm2 = vcmp.lt.s32.totalorder %v1293_v11, 3  ;;  %vm1315_vm3 = vcmp.lt.s32.totalorder %v1293_v11, 4  ;;  %v1311_v43 = vor.u32 %v1310_v4, %v1309_v23 }
 0x197   :  { %v1316_v14 = vsel %vm1312_vm14, %v1296_v35, %v1299_v39  ;;  %v1317_v54 = vsel %vm1315_vm3, %v1305_v20, 2102212464  ;;  %v1320_v10 = vsel %vm1312_vm14, %v1299_v39, %v1302_v37  ;;  %v1321_v5 = vsel %vm1315_vm3, %v1308_v21, 920167782 }
 0x198   :  { %v1451_v31 = vclz %v3530_v28  ;;  %v1318_v44 = vsel %vm1314_vm2, %v1302_v37, %v1317_v54  ;;  %v1324_v6 = vsel %vm1312_vm14, %v1302_v37, %v1305_v20  ;;  %v1257_v0 = vand.u32 2147483647, %v1256_v33 }
 0x199   :  { %v1322_v17 = vsel %vm1314_vm2, %v1305_v20, %v1321_v5  ;;  %v1325_v19 = vsel %vm1315_vm3, %v1311_v43, 1326507024  ;;  %vm1600_vm5 = vcmp.gt.s32.totalorder %v1599_v1, 0  ;;  %v1319_v48 = vsel %vm1313_vm15, %v1316_v14, %v1318_v44 }
 0x19a   :  { %v3531_v26 = vadd.s32 4294967294, %v1451_v31  ;;  %v1323_v36 = vsel %vm1313_vm15, %v1320_v10, %v1322_v17  ;;  %v1326_v23 = vsel %vm1314_vm2, %v1308_v21, %v1325_v19  ;;  %v1601_v37 = vsel %vm1600_vm5, %v1599_v1, 0 }
 0x19b   :  { %v1327_v35 = vsel %vm1313_vm15, %v1324_v6, %v1326_v23  ;;  %v4883_v39 = vmul.u32.u64.low %v4866_v25, %v1323_v36  ;;  %v4884_v4 = vmul.u32.u64.high %v4866_v25, %v1323_v36, %v4883_v39  ;;  %v1439_v20 = vadd.s32 %v4803_v32, %v4809_v38 }
 0x19c   :  { %vm3532_vm6 = vcmp.lt.s32.totalorder %v3531_v26, 0  ;;  %v4890_v33 = vmul.u32.u64.low %v4866_v25, %v1327_v35  ;;  %v4891_v28 = vmul.u32.u64.high %v4866_v25, %v1327_v35, %v4890_v33  ;;  %v1056_v21 = vsel %vm973_vm1, %v1055_v2, %v4835_v18 }
 0x19d   :  { %v4903_v11 = vsel %vm1179_vm12, %v1263_v24, %v4756_v56  ;;  %v1454_v1 = vsel %vm3532_vm6, 0, %v3531_v26  ;;  %v1603_v32 = vand.u32 31, %v1601_v37  ;;  %v1335_v14 = vmul.u32 %v4866_v25, %v1319_v48 }
 0x19e   :  { %v1455_v38 = vsub.s32 32, %v1454_v1  ;;  %v1459_v43 = vsub.s32 4294967266, %v1454_v1  ;;  %v4906_v54 = vshll.u32 %v1597_v58, 8  ;;  %v1260_v10 = vmul.f32 %v1259_v9, %v1257_v0 }
 0x19f   :  { %v1456_v31 = vshll.u32 %v4863_v40, %v1454_v1  ;;  %v1338_v2 = vadd.s32 1, %v4884_v4  ;;  %v1604_v18 = vsub.s32 32, %v1603_v32  ;;  %vm1337_vm1 = vc.u32 %v4891_v28, %v4883_v39 }
 0x1a0   :  { %v1457_v44 = vshrl.u32 %v1439_v20, %v1455_v38  ;;  %v1460_v5 = vadd.s32 127, %v1459_v43  ;;  %v1606_v56 = vshll.u32 %v6339_v45, %v1603_v32  ;;  %v1609_v58 = vshll.u32 %v6327_v47, %v1603_v32 }
 0x1a1   :  { %v1339_v25 = vsel %vm1337_vm1, %v1338_v2, %v4884_v4  ;;  %v1607_v40 = vshrl.u32 %v6327_v47, %v1604_v18  ;;  %v1610_v9 = vshrl.u32 %v6332_v49, %v1604_v18  ;;  %v1602_v17 = vshrl.u32 %v1601_v37, 5 }
 0x1a2   :  { %v1461_v6 = vshll.u32 %v1460_v5, 23  ;;  %v1340_v0 = vadd.s32 %v1339_v25, %v1335_v14  ;;  %v1612_v19 = vshll.u32 %v6332_v49, %v1603_v32  ;;  %v1261_v26 = vxor.u32 2147483648, %v1260_v10 }
 0x1a3   :  { %v1458_v48 = vor.u32 %v1457_v44, %v1456_v31  ;;  %v1613_v59 = vshrl.u32 %v6330_v51, %v1604_v18  ;;  %v1615_v36 = vshll.u32 %v6330_v51, %v1603_v32  ;;  %v1608_v4 = vor.u32 %v1607_v40, %v1606_v56 }
 0x1a4   :  { %v1462_v23 = vor.u32 4788187, %v1461_v6  ;;  %v1341_v35 = vadd.s32 536870912, %v1340_v0  ;;  %v1616_v20 = vshrl.u32 %v6336_v53, %v1604_v18  ;;  %v1611_v33 = vor.u32 %v1610_v9, %v1609_v58 }
 0x1a5   :  { %v1614_v1 = vor.u32 %v1613_v59, %v1612_v19  ;;  %v1618_v38 = vshll.u32 %v6336_v53, %v1603_v32  ;;  %v1619_v43 = vshrl.u32 %v6324_v61, %v1604_v18  ;;  %v1605_v14 = vshrl.u32 %v6339_v45, %v1604_v18 }
 0x1a6   :  { %v4930_v37 = vshrl.u32 %v1341_v35, 30  ;;  %v1617_v31 = vor.u32 %v1616_v20, %v1615_v36  ;;  %vm1621_vm9 = vcmp.lt.s32.totalorder %v1602_v17, 1  ;;  %v1465_v2 = vcvt.s32.f32 %v1458_v48 }
 0x1a7   :  { %v1620_v44 = vor.u32 %v1619_v43, %v1618_v38  ;;  %vm1622_vm10 = vcmp.lt.s32.totalorder %v1602_v17, 2  ;;  %vm1624_vm11 = vcmp.lt.s32.totalorder %v1602_v17, 4  ;;  %v1463_v5 = vand.u32 2147483647, %v1462_v23 }
 0x1a8   :  { %v1343_v56 = vshll.u32 %v4930_v37, 30  ;;  %vm1623_vm14 = vcmp.lt.s32.totalorder %v1602_v17, 3  ;;  %v1626_v25 = vsel %vm1624_vm11, %v1614_v1, 2102212464  ;;  %vm4936_vm15 = vcmp.le.f32.partialorder %v1383_v16, 0.7853982 }
 0x1a9   :  { %v6413_v32 = vmov 0  ;;  %v1629_v40 = vsel %vm1621_vm9, %v1608_v4, %v1611_v33  ;;  %v1630_v18 = vsel %vm1624_vm11, %v1617_v31, 920167782  ;;  %v1633_v58 = vsel %vm1621_vm9, %v1611_v33, %v1614_v1 }
 0x1aa   :  { %v6414_v32 = vsel %vm4936_vm15, 4294967295, %v6413_v32  ;;  %v1634_v9 = vsel %vm1624_vm11, %v1620_v44, 1326507024  ;;  %v1059_v6 = vsel %vm4778_vm4, %v4492_v22, %v1056_v21  ;;  %v1266_v19 = vsel %vm4915_vm7, 0, %v4903_v11 }
 0x1ab   :  { %6415 = vst [vmem:[#allocation31_spill] sm:$0xff] %v6414_v32  ;;  %v1469_v48 = vsub.s32 4, %v4849_v29  ;;  %v4949_v16 = vsub.s32 %v1340_v0, %v1343_v56  ;;  %v1625_v59 = vsel %vm1621_vm9, %v1605_v14, %v1608_v4  ;;  %v1627_v36 = vsel %vm1623_vm14, %v1611_v33, %v1626_v25 }
 0x1ac   :  { %v1631_v23 = vsel %vm1623_vm14, %v1614_v1, %v1630_v18  ;;  %v1635_v35 = vsel %vm1623_vm14, %v1617_v31, %v1634_v9  ;;  %v1466_v20 = vmul.f32 %v1465_v2, %v1463_v5  ;;  %v1262_v44 = vsel %vm1179_vm12, %v1261_v26, %v1260_v10 }
 0x1ad   :  { %v1346_v38 = vsub.s32 0, %v4949_v16  ;;  %v1632_v43 = vsel %vm1622_vm10, %v1629_v40, %v1631_v23  ;;  %v1636_v21 = vsel %vm1622_vm10, %v1633_v58, %v1635_v35  ;;  %v1489_v0 = vand.u32 2139095040, %v4829_v30  ;;  %v796_v58 = vpop.permute.xlu1 %795  ;;  %v4996_v35 = vld [vmem:[#allocation6] ss:$0 sm:$0xff] }
 0x1ae   :  { %v4958_v11 = vmul.u32.u64.low %v4906_v54, %v1636_v21  ;;  %v4959_v61 = vmul.u32.u64.high %v4906_v54, %v1636_v21, %v4958_v11  ;;  %v1628_v33 = vsel %vm1622_vm10, %v1625_v59, %v1627_v36  ;;  %v4969_v31 = vand.u32 3, %v1266_v19 }
 0x1af   :  { %v3526_v4 = vmin.u32 %v1346_v38, %v4949_v16  ;;  %v4965_v1 = vmul.u32.u64.low %v4906_v54, %v1632_v43  ;;  %v4966_v14 = vmul.u32.u64.high %v4906_v54, %v1632_v43, %v4965_v1  ;;  %v4974_v10 = vsel %vm1385_vm8, %v1469_v48, %v4849_v29 }
 0x1b0   :  { %6416 = vst [vmem:[#allocation32_spill] sm:$0xff] %v4969_v31  ;;  %6417 = vst [vmem:[#allocation33_spill] sm:$0xff] %v4974_v10  ;;  %vm1282_vm12 = vcmp.lt.s32.totalorder %v4725_v62, 0  ;;  %v1490_v26 = vshrl.u32 %v1489_v0, 23  ;;  %v1265_v17 = vsel %vm4915_vm7, %v4576_v41, %v1262_v44  ;;  %v1467_v2 = vxor.u32 2147483648, %v1466_v20 }
 0x1b1   :  { %v1348_v5 = vclz %v3526_v4  ;;  %v6326_v56 = vand.u32 2147483647, %v4829_v30  ;;  %3933 = vcosq.f32 %v1059_v6  ;;  %v1644_v25 = vmul.u32 %v4906_v54, %v1628_v33 }
 0x1b2   :  { %vm1646_vm2 = vc.u32 %v4959_v61, %v4965_v1  ;;  %v3533_v40 = vadd.s32 4294967169, %v1490_v26  ;;  %3935 = vsinq.f32 %v1059_v6  ;;  %v1647_v24 = vadd.s32 1, %v4966_v14 }
 0x1b3   :  { %v3527_v18 = vadd.s32 4294967294, %v1348_v5  ;;  %3937 = vcosq.f32 %v1265_v17  ;;  %v1336_v9 = vadd.s32 %v4883_v39, %v4891_v28  ;;  %v1366_v19 = vsub.s32 4, %v4930_v37  ;;  %v788_v39 = vpop.permute.xlu0 %787 }
 0x1b4   :  { %v1496_v54 = vadd.s32 1, %v3533_v40  ;;  %v1468_v48 = vsel %vm1385_vm8, %v1467_v2, %v1466_v20  ;;  %v1648_v6 = vsel %vm1646_vm2, %v1647_v24, %v4966_v14  ;;  %v1493_v59 = vand.u32 8388607, %v6326_v56 }
 0x1b5   :  { %vm3528_vm3 = vcmp.lt.s32.totalorder %v3527_v18, 0  ;;  %v1649_v23 = vadd.s32 %v1648_v6, %v1644_v25  ;;  %v4999_v38 = vmul.f32 %v4996_v35, %v796_v58  ;;  %3939 = vsinq.f32 %v1265_v17 }
 0x1b6   :  { %v1351_v36 = vsel %vm3528_vm3, 0, %v3527_v18  ;;  %vm1497_vm5 = vcmp.gt.s32.totalorder %v1496_v54, 0  ;;  %v5004_v20 = vsel %vm4936_vm15, %v4657_v57, %v1468_v48  ;;  %v5009_v44 = vsel %vm1282_vm12, %v1366_v19, %v4930_v37 }
 0x1b7   :  { %6418 = vst [vmem:[#allocation34_spill] sm:$0xff] %v4999_v38  ;;  %v1352_v28 = vsub.s32 32, %v1351_v36  ;;  %v1356_v43 = vsub.s32 4294967266, %v1351_v36  ;;  %v1498_v21 = vsel %vm1497_vm5, %v1496_v54, 0  ;;  %6419 = vst [vmem:[#allocation35_spill] sm:$0xff] %v5009_v44  ;;  %v1650_v11 = vadd.s32 536870912, %v1649_v23 }
 0x1b8   :  { %v1500_v0 = vand.u32 31, %v1498_v21  ;;  %v1353_v4 = vshll.u32 %v4949_v16, %v1351_v36  ;;  %v5013_v26 = vmul.f32 %v4996_v35, %v788_v39  ;;  %v1494_v2 = vor.u32 8388608, %v1493_v59 }
 0x1b9   :  { %v1354_v33 = vshrl.u32 %v1336_v9, %v1352_v28  ;;  %v1357_v14 = vadd.s32 127, %v1356_v43  ;;  %v5015_v17 = vshrl.u32 %v1650_v11, 30  ;;  %v1798_v25 = vand.u32 2139095040, %v4999_v38 }
 0x1ba   :  { %6420 = vst [vmem:[#allocation36_spill] sm:$0xff] %v5013_v26  ;;  %v1501_v5 = vsub.s32 32, %v1500_v0  ;;  %v1503_v18 = vshll.u32 %v6339_v45, %v1500_v0  ;;  %v1506_v37 = vshll.u32 %v6327_v47, %v1500_v0  ;;  %v1509_v24 = vshll.u32 %v6332_v49, %v1500_v0 }
 0x1bb   :  { %v1358_v40 = vshll.u32 %v1357_v14, 23  ;;  %v5021_v58 = vpop.eup %3933  ;;  %v1652_v16 = vshll.u32 %v5015_v17, 30  ;;  %v1499_v9 = vshrl.u32 %v1498_v21, 5  ;;  %v1512_v54 = vshll.u32 %v6330_v51, %v1500_v0 }
 0x1bc   :  { %v1504_v19 = vshrl.u32 %v6327_v47, %v1501_v5  ;;  %v5026_v48 = vpop.eup %3935  ;;  %v1355_v6 = vor.u32 %v1354_v33, %v1353_v4  ;;  %v1507_v36 = vshrl.u32 %v6332_v49, %v1501_v5  ;;  %v1510_v39 = vshrl.u32 %v6330_v51, %v1501_v5 }
 0x1bd   :  { %v1359_v59 = vor.u32 4788187, %v1358_v40  ;;  %v5030_v28 = vpop.eup %3937  ;;  %v5032_v43 = vsub.s32 %v1649_v23, %v1652_v16  ;;  %v1513_v11 = vshrl.u32 %v6336_v53, %v1501_v5  ;;  %v5035_v14 = vshll.u32 %v1494_v2, 8 }
 0x1be   :  { %6421 = vst [vmem:[#allocation37_spill] sm:$0xff] %v5030_v28  ;;  %v1799_v21 = vshrl.u32 %v1798_v25, 23  ;;  %v1502_v29 = vshrl.u32 %v6339_v45, %v1501_v5  ;;  %v1505_v56 = vor.u32 %v1504_v19, %v1503_v18  ;;  %v1508_v47 = vor.u32 %v1507_v36, %v1506_v37 }
 0x1bf   :  { %v1511_v10 = vor.u32 %v1510_v39, %v1509_v24  ;;  %v1655_v4 = vsub.s32 0, %v5032_v43  ;;  %v1514_v33 = vor.u32 %v1513_v11, %v1512_v54  ;;  %v1515_v40 = vshll.u32 %v6336_v53, %v1500_v0  ;;  %v5041_v32 = vpop.eup %3939 }
 0x1c0   :  { %v6422_v51 = vmov 1326507024   ;;  %6423 = vst [vmem:[#allocation38_spill] sm:$0xff] %v5041_v32  ;;  %v1360_v23 = vand.u32 2147483647, %v1359_v59  ;;  %v1362_v16 = vcvt.s32.f32 %v1355_v6  ;;  %vm1518_vm6 = vcmp.lt.s32.totalorder %v1499_v9, 1 }
 0x1c1   :  { %v1516_v49 = vshrl.u32 %v6422_v51, %v1501_v5  ;;  %vm1520_vm1 = vcmp.lt.s32.totalorder %v1499_v9, 3  ;;  %vm1591_vm7 = vcmp.lt.s32.totalorder %v4789_v42, 0  ;;  %v3538_v2 = vmin.u32 %v1655_v4, %v5032_v43 }
 0x1c2   :  { %vm1519_vm8 = vcmp.lt.s32.totalorder %v1499_v9, 2  ;;  %vm1521_vm9 = vcmp.lt.s32.totalorder %v1499_v9, 4  ;;  %v1522_v18 = vsel %vm1518_vm6, %v1502_v29, %v1505_v56  ;;  %v1526_v24 = vsel %vm1518_vm6, %v1505_v56, %v1508_v47 }
 0x1c3   :  { %v1517_v25 = vor.u32 %v1516_v49, %v1515_v40  ;;  %v1523_v37 = vsel %vm1521_vm9, %v1511_v10, 2102212464  ;;  %v1527_v19 = vsel %vm1521_vm9, %v1514_v33, 920167782  ;;  %v6424_v0 = vand.u32 2147483647, %v4725_v62 }
 0x1c4   :  { %v6425_v5 = vmov 0  ;;  %v1657_v54 = vclz %v3538_v2  ;;  %v1524_v6 = vsel %vm1520_vm1, %v1508_v47, %v1523_v37  ;;  %v1528_v59 = vsel %vm1520_vm1, %v1511_v10, %v1527_v19 }
 0x1c5   :  { %vm5047_vm10 = vcmp.le.f32.partialorder %v6424_v0, 0.7853982  ;;  %v1530_v36 = vsel %vm1518_vm6, %v1508_v47, %v1511_v10  ;;  %v1529_v49 = vsel %vm1519_vm8, %v1526_v24, %v1528_v59  ;;  %v1531_v39 = vsel %vm1521_vm9, %v1517_v25, 1326507024 }
 0x1c6   :  { %v6426_v5 = vsel %vm5047_vm10, 4294967295, %v6425_v5  ;;  %v6335_v29 = vand.u32 2147483647, %v4999_v38  ;;  %v3545_v11 = vadd.s32 4294967169, %v1799_v21  ;;  %v1363_v56 = vmul.f32 %v1362_v16, %v1360_v23 }
 0x1c7   :  { %6427 = vst [vmem:[#allocation39_spill] sm:$0xff] %v6426_v5  ;;  %v6428_v4 = vand.u32 2147483647, %v4789_v42  ;;  %v6429_v40 = vmov 0  ;;  %v3539_v0 = vadd.s32 4294967294, %v1657_v54  ;;  %v1675_v2 = vsub.s32 4, %v5015_v17 }
 0x1c8   :  { %v1532_v37 = vsel %vm1520_vm1, %v1514_v33, %v1531_v39  ;;  %v1525_v47 = vsel %vm1519_vm8, %v1522_v18, %v1524_v6  ;;  %v5066_v25 = vmul.u32.u64.low %v5035_v14, %v1529_v49  ;;  %v5067_v24 = vmul.u32.u64.high %v5035_v14, %v1529_v49, %v5066_v25  ;;  %v812_v49 = vpop.permute.xlu1 %811  ;;  %v804_v39 = vpop.permute.xlu0 %803 }
 0x1c9   :  { %vm5057_vm11 = vcmp.le.f32.partialorder %v6428_v4, 0.7853982  ;;  %v1533_v10 = vsel %vm1519_vm8, %v1530_v36, %v1532_v37  ;;  %v1645_v21 = vadd.s32 %v4965_v1, %v4959_v61  ;;  %vm3540_vm14 = vcmp.lt.s32.totalorder %v3539_v0, 0 }
 0x1ca   :  { %v6430_v40 = vsel %vm5057_vm11, 4294967295, %v6429_v40  ;;  %v5073_v23 = vmul.u32.u64.low %v5035_v14, %v1533_v10  ;;  %v5074_v16 = vmul.u32.u64.high %v5035_v14, %v1533_v10, %v5073_v23  ;;  %3941 = vcosq.f32 %v5004_v20 }
 0x1cb   :  { %6431 = vst [vmem:[#allocation40_spill] sm:$0xff] %v6430_v40  ;;  %v1660_v33 = vsel %vm3540_vm14, 0, %v3539_v0  ;;  %v1805_v19 = vadd.s32 1, %v3545_v11  ;;  %v6338_v9 = vand.u32 2147483647, %v5013_v26  ;;  %v1541_v6 = vmul.u32 %v5035_v14, %v1525_v47 }
 0x1cc   :  { %v1661_v18 = vsub.s32 32, %v1660_v33  ;;  %v1665_v54 = vsub.s32 4294967266, %v1660_v33  ;;  %v1802_v59 = vand.u32 8388607, %v6335_v29  ;;  %v1364_v36 = vxor.u32 2147483648, %v1363_v56 }
 0x1cd   :  { %v5084_v61 = vsel %vm1591_vm7, %v1675_v2, %v5015_v17  ;;  %v1544_v1 = vadd.s32 1, %v5067_v24  ;;  %vm1806_vm2 = vcmp.gt.s32.totalorder %v1805_v19, 0  ;;  %v1662_v11 = vshll.u32 %v5032_v43, %v1660_v33 }
 0x1ce   :  { %6432 = vst [vmem:[#allocation41_spill] sm:$0xff] %v5084_v61  ;;  %v1663_v4 = vshrl.u32 %v1645_v21, %v1661_v18  ;;  %v1666_v0 = vadd.s32 127, %v1665_v54  ;;  %vm1543_vm3 = vc.u32 %v5074_v16, %v5066_v25  ;;  %3943 = vsinq.f32 %v5004_v20 }
 0x1cf   :  { %v1545_v17 = vsel %vm1543_vm3, %v1544_v1, %v5067_v24  ;;  %v1807_v2 = vsel %vm1806_vm2, %v1805_v19, 0  ;;  %v5096_v10 = vmul.f32 %v4996_v35, %v812_v49  ;;  %v5099_v43 = vmul.f32 %v4996_v35, %v804_v39 }
 0x1d0   :  { %v1667_v37 = vshll.u32 %v1666_v0, 23  ;;  %v1546_v47 = vadd.s32 %v1545_v17, %v1541_v6  ;;  %v1803_v20 = vor.u32 8388608, %v1802_v59  ;;  %v1809_v23 = vand.u32 31, %v1807_v2 }
 0x1d1   :  { %6433 = vst [vmem:[#allocation42_spill] sm:$0xff] %v5096_v10  ;;  %6434 = vst [vmem:[#allocation43_spill] sm:$0xff] %v5099_v43  ;;  %v1695_v33 = vand.u32 2139095040, %v5013_v26  ;;  %v1365_v24 = vsel %vm1282_vm12, %v1364_v36, %v1363_v56  ;;  %v1664_v19 = vor.u32 %v1663_v4, %v1662_v11  ;;  %v5109_v54 = vand.u32 8388607, %v6338_v9 }
 0x1d2   :  { %v1547_v18 = vadd.s32 536870912, %v1546_v47  ;;  %v1808_v6 = vshrl.u32 %v1807_v2, 5  ;;  %v1810_v1 = vsub.s32 32, %v1809_v23  ;;  %v1812_v49 = vshll.u32 %v6339_v45, %v1809_v23 }
 0x1d3   :  { %v6435_v39 = vmov 2475754826   ;;  %v1668_v17 = vor.u32 4788187, %v1667_v37  ;;  %v6436_v21 = vmov 2131351028   ;;  %v1671_v9 = vcvt.s32.f32 %v1664_v19 }
 0x1d4   :  { %v1815_v0 = vshll.u32 %v6435_v39, %v1809_v23  ;;  %v5113_v59 = vshrl.u32 %v1547_v18, 30  ;;  %v1818_v14 = vshll.u32 %v6436_v21, %v1809_v23  ;;  %v6437_v29 = vmov 2102212464   ;;  %v5117_v56 = vpop.eup %3941 }
 0x1d5   :  { %v1821_v53 = vshll.u32 %v6437_v29, %v1809_v23  ;;  %6438 = vst [vmem:[#allocation44_spill] sm:$0xff] %v5117_v56  ;;  %v1813_v36 = vshrl.u32 %v6435_v39, %v1810_v1  ;;  %v1816_v11 = vshrl.u32 %v6436_v21, %v1810_v1  ;;  %v1819_v4 = vshrl.u32 %v6437_v29, %v1810_v1 }
 0x1d6   :  { %v1696_v2 = vshrl.u32 %v1695_v33, 23  ;;  %v1549_v45 = vshll.u32 %v5113_v59, 30  ;;  %v6439_v61 = vmov 920167782   ;;  %v1825_v28 = vshrl.u32 %v6422_v51, %v1810_v1 }
 0x1d7   :  { %v1822_v37 = vshrl.u32 %v6439_v61, %v1810_v1  ;;  %v1824_v18 = vshll.u32 %v6439_v61, %v1809_v23  ;;  %v1814_v57 = vor.u32 %v1813_v36, %v1812_v49  ;;  %v1817_v44 = vor.u32 %v1816_v11, %v1815_v0 }
 0x1d8   :  { %vm1827_vm12 = vcmp.lt.s32.totalorder %v1808_v6, 1  ;;  %v1669_v56 = vand.u32 2147483647, %v1668_v17  ;;  %v5126_v32 = vsub.s32 %v1546_v47, %v1549_v45  ;;  %v1820_v31 = vor.u32 %v1819_v4, %v1818_v14  ;;  %v5128_v41 = vpop.eup %3943 }
 0x1d9   :  { %v1823_v46 = vor.u32 %v1822_v37, %v1821_v53  ;;  %6440 = vst [vmem:[#allocation45_spill] sm:$0xff] %v5128_v41  ;;  %v5133_v33 = vsel %vm5047_vm10, %v4725_v62, %v1365_v24  ;;  %v6441_v19 = vmov 683565275   ;;  %vm1829_vm5 = vcmp.lt.s32.totalorder %v1808_v6, 3 }
 0x1da   :  { %v1811_v55 = vshrl.u32 %v6441_v19, %v1810_v1  ;;  %v1843_v23 = vshll.u32 %v1803_v20, 8  ;;  %v1552_v49 = vsub.s32 0, %v5126_v32  ;;  %v1826_v0 = vor.u32 %v1825_v28, %v1824_v18 }
 0x1db   :  { %vm1828_vm6 = vcmp.lt.s32.totalorder %v1808_v6, 2  ;;  %vm1830_vm1 = vcmp.lt.s32.totalorder %v1808_v6, 4  ;;  %v1835_v14 = vsel %vm1827_vm12, %v1814_v57, %v1817_v44  ;;  %v3541_v47 = vadd.s32 4294967169, %v1696_v2 }
 0x1dc   :  { %v1832_v45 = vsel %vm1830_vm1, %v1820_v31, 2102212464  ;;  %v1836_v53 = vsel %vm1830_vm1, %v1823_v46, 920167782  ;;  %v1672_v17 = vmul.f32 %v1671_v9, %v1669_v56  ;;  %v3534_v36 = vmin.u32 %v1552_v49, %v5126_v32 }
 0x1dd   :  { %v1837_v24 = vsel %vm1829_vm5, %v1820_v31, %v1836_v53  ;;  %v1700_v11 = vor.u32 8388608, %v5109_v54  ;;  %v1831_v1 = vsel %vm1827_vm12, %v1811_v55, %v1814_v57  ;;  %v1833_v20 = vsel %vm1829_vm5, %v1817_v44, %v1832_v45 }
 0x1de   :  { %v1838_v28 = vsel %vm1828_vm6, %v1835_v14, %v1837_v24  ;;  %v1839_v4 = vsel %vm1827_vm12, %v1817_v44, %v1820_v31  ;;  %v1554_v37 = vclz %v3534_v36  ;;  %v1840_v18 = vsel %vm1830_vm1, %v1826_v0, 1326507024 }
 0x1df   :  { %v5145_v41 = vmul.u32.u64.low %v1843_v23, %v1838_v28  ;;  %v5146_v5 = vmul.u32.u64.high %v1843_v23, %v1838_v28, %v5145_v41  ;;  %3945 = vcosq.f32 %v5133_v33  ;;  %v1841_v9 = vsel %vm1829_vm5, %v1823_v46, %v1840_v18 }
 0x1e0   :  { %v1702_v56 = vadd.s32 1, %v3541_v47  ;;  %v1673_v57 = vxor.u32 2147483648, %v1672_v17  ;;  %v3535_v55 = vadd.s32 4294967294, %v1554_v37  ;;  %v1834_v2 = vsel %vm1828_vm6, %v1831_v1, %v1833_v20 }
 0x1e1   :  { %v1842_v49 = vsel %vm1828_vm6, %v1839_v4, %v1841_v9  ;;  %v1542_v31 = vadd.s32 %v5066_v25, %v5074_v16  ;;  %v1853_v45 = vadd.s32 1, %v5146_v5  ;;  %v5160_v14 = vshll.u32 %v1700_v11, 8 }
 0x1e2   :  { %v5156_v44 = vmul.u32.u64.low %v1843_v23, %v1842_v49  ;;  %v5157_v0 = vmul.u32.u64.high %v1843_v23, %v1842_v49, %v5156_v44  ;;  %vm1703_vm8 = vcmp.gt.s32.totalorder %v1702_v56, 0  ;;  %vm3536_vm9 = vcmp.lt.s32.totalorder %v3535_v55, 0 }
 0x1e3   :  { %v1704_v46 = vsel %vm1703_vm8, %v1702_v56, 0  ;;  %v1557_v53 = vsel %vm3536_vm9, 0, %v3535_v55  ;;  %v1850_v36 = vmul.u32 %v1843_v23, %v1834_v2  ;;  %v5165_v6 = vsel %vm1591_vm7, %v1673_v57, %v1672_v17 }
 0x1e4   :  { %v1706_v24 = vand.u32 31, %v1704_v46  ;;  %v1558_v25 = vsub.s32 32, %v1557_v53  ;;  %v1559_v16 = vshll.u32 %v5126_v32, %v1557_v53  ;;  %v1562_v1 = vsub.s32 4294967266, %v1557_v53 }
 0x1e5   :  { %vm1852_vm14 = vc.u32 %v5157_v0, %v5145_v41  ;;  %v2004_v28 = vand.u32 2139095040, %v5096_v10  ;;  %v1705_v9 = vshrl.u32 %v1704_v46, 5  ;;  %vm1488_vm7 = vcmp.lt.s32.totalorder %v4829_v30, 0 }
 0x1e6   :  { %v1707_v20 = vsub.s32 32, %v1706_v24  ;;  %v1709_v11 = vshll.u32 %v6441_v19, %v1706_v24  ;;  %v1560_v4 = vshrl.u32 %v1542_v31, %v1558_v25  ;;  %v1563_v37 = vadd.s32 127, %v1562_v1 }
 0x1e7   :  { %v1854_v23 = vsel %vm1852_vm14, %v1853_v45, %v5146_v5  ;;  %v1712_v18 = vshll.u32 %v6435_v39, %v1706_v24  ;;  %v1715_v2 = vshll.u32 %v6436_v21, %v1706_v24  ;;  %v1718_v45 = vshll.u32 %v6437_v29, %v1706_v24 }
 0x1e8   :  { %v1855_v17 = vadd.s32 %v1854_v23, %v1850_v36  ;;  %v1710_v56 = vshrl.u32 %v6435_v39, %v1707_v20  ;;  %v1713_v32 = vshrl.u32 %v6436_v21, %v1707_v20  ;;  %v1561_v57 = vor.u32 %v1560_v4, %v1559_v16 }
 0x1e9   :  { %v1564_v55 = vshll.u32 %v1563_v37, 23  ;;  %v1716_v49 = vshrl.u32 %v6437_v29, %v1707_v20  ;;  %v5178_v44 = vpop.eup %3945  ;;  %v2005_v53 = vshrl.u32 %v2004_v28, 23  ;;  %v1719_v1 = vshrl.u32 %v6439_v61, %v1707_v20 }
 0x1ea   :  { %6442 = vst [vmem:[#allocation46_spill] sm:$0xff] %v5178_v44  ;;  %v1856_v31 = vadd.s32 536870912, %v1855_v17  ;;  %v1711_v5 = vor.u32 %v1710_v56, %v1709_v11  ;;  %v1568_v36 = vcvt.s32.f32 %v1561_v57  ;;  %v1714_v25 = vor.u32 %v1713_v32, %v1712_v18 }
 0x1eb   :  { %v1565_v46 = vor.u32 4788187, %v1564_v55  ;;  %v1721_v4 = vshll.u32 %v6439_v61, %v1706_v24  ;;  %v1722_v37 = vshrl.u32 %v6422_v51, %v1707_v20  ;;  %vm1724_vm2 = vcmp.lt.s32.totalorder %v1705_v9, 1 }
 0x1ec   :  { %v5183_v16 = vshrl.u32 %v1856_v31, 30  ;;  %v6443_v23 = vand.u32 2147483647, %v4829_v30  ;;  %v6444_v47 = vmov 0  ;;  %v1708_v28 = vshrl.u32 %v6441_v19, %v1707_v20 }
 0x1ed   :  { %v1566_v11 = vand.u32 2147483647, %v1565_v46  ;;  %v1717_v56 = vor.u32 %v1716_v49, %v1715_v2  ;;  %v1720_v18 = vor.u32 %v1719_v1, %v1718_v45  ;;  %v1723_v57 = vor.u32 %v1722_v37, %v1721_v4 }
 0x1ee   :  { %vm5189_vm3 = vcmp.le.f32.partialorder %v6443_v23, 0.7853982  ;;  %v1858_v32 = vshll.u32 %v5183_v16, 30  ;;  %vm1726_vm12 = vcmp.lt.s32.totalorder %v1705_v9, 3  ;;  %vm1727_vm5 = vcmp.lt.s32.totalorder %v1705_v9, 4 }
 0x1ef   :  { %v6445_v47 = vsel %vm5189_vm3, 4294967295, %v6444_v47  ;;  %v1569_v24 = vmul.f32 %v1568_v36, %v1566_v11  ;;  %vm1725_vm6 = vcmp.lt.s32.totalorder %v1705_v9, 2  ;;  %v1729_v55 = vsel %vm1727_vm5, %v1717_v56, 2102212464 }
 0x1f0   :  { %6446 = vst [vmem:[#allocation47_spill] sm:$0xff] %v6445_v47  ;;  %v1732_v31 = vsel %vm1724_vm2, %v1711_v5, %v1714_v25  ;;  %v5197_v23 = vsub.s32 %v1855_v17, %v1858_v32  ;;  %v1733_v54 = vsel %vm1727_vm5, %v1720_v18, 920167782  ;;  %v3553_v46 = vadd.s32 4294967169, %v2005_v53 }
 0x1f1   :  { %v6447_v20 = vand.u32 2147483647, %v5096_v10  ;;  %v1570_v49 = vxor.u32 2147483648, %v1569_v24  ;;  %v1728_v45 = vsel %vm1724_vm2, %v1708_v28, %v1711_v5  ;;  %v1730_v1 = vsel %vm1726_vm12, %v1714_v25, %v1729_v55 }
 0x1f2   :  { %v1734_v36 = vsel %vm1726_vm12, %v1717_v56, %v1733_v54  ;;  %v1861_v4 = vsub.s32 0, %v5197_v23  ;;  %v1736_v17 = vsel %vm1724_vm2, %v1714_v25, %v1717_v56  ;;  %v1737_v11 = vsel %vm1727_vm5, %v1723_v57, 1326507024 }
 0x1f3   :  { %v2008_v2 = vand.u32 8388607, %v6447_v20  ;;  %v1735_v37 = vsel %vm1725_vm6, %v1732_v31, %v1734_v36  ;;  %v6448_v53 = vsub.s32 4, %v5113_v59  ;;  %v1738_v5 = vsel %vm1726_vm12, %v1720_v18, %v1737_v11 }
 0x1f4   :  { %v5218_v28 = vmul.u32.u64.low %v5160_v14, %v1735_v37  ;;  %v5219_v54 = vmul.u32.u64.high %v5160_v14, %v1735_v37, %v5218_v28  ;;  %v5226_v25 = vsel %vm5057_vm11, %v4789_v42, %v5165_v6  ;;  %v3546_v56 = vmin.u32 %v1861_v4, %v5197_v23 }
 0x1f5   :  { %v5214_v32 = vsel %vm1488_vm7, %v6448_v53, %v5113_v59  ;;  %v1731_v57 = vsel %vm1725_vm6, %v1728_v45, %v1730_v1  ;;  %v1739_v59 = vsel %vm1725_vm6, %v1736_v17, %v1738_v5  ;;  %3947 = vsinq.f32 %v5133_v33 }
 0x1f6   :  { %6449 = vst [vmem:[#allocation48_spill] sm:$0xff] %v5214_v32  ;;  %v5233_v18 = vmul.u32.u64.low %v5160_v14, %v1739_v59  ;;  %v5234_v55 = vmul.u32.u64.high %v5160_v14, %v1739_v59, %v5233_v18  ;;  %v2011_v31 = vadd.s32 1, %v3553_v46  ;;  %v1571_v20 = vsel %vm1488_vm7, %v1570_v49, %v1569_v24 }
 0x1f7   :  { %v1863_v36 = vclz %v3546_v56  ;;  %v2009_v4 = vor.u32 8388608, %v2008_v2  ;;  %3949 = vcosq.f32 %v5226_v25  ;;  %v1747_v9 = vmul.u32 %v5160_v14, %v1731_v57 }
 0x1f8   :  { %v1750_v33 = vadd.s32 1, %v5219_v54  ;;  %vm2012_vm1 = vcmp.gt.s32.totalorder %v2011_v31, 0  ;;  %v1851_v45 = vadd.s32 %v5145_v41, %v5157_v0  ;;  %v5250_v49 = vsel %vm5189_vm3, %v4829_v30, %v1571_v20 }
 0x1f9   :  { %v3547_v46 = vadd.s32 4294967294, %v1863_v36  ;;  %v2013_v1 = vsel %vm2012_vm1, %v2011_v31, 0  ;;  %vm1749_vm8 = vc.u32 %v5234_v55, %v5218_v28  ;;  %v5256_v17 = vshll.u32 %v2009_v4, 8 }
 0x1fa   :  { %v2015_v14 = vand.u32 31, %v2013_v1  ;;  %v1751_v37 = vsel %vm1749_vm8, %v1750_v33, %v5219_v54  ;;  %v1901_v41 = vand.u32 2139095040, %v5099_v43  ;;  %v2014_v20 = vshrl.u32 %v2013_v1, 5 }
 0x1fb   :  { %vm3548_vm9 = vcmp.lt.s32.totalorder %v3547_v46, 0  ;;  %v1752_v11 = vadd.s32 %v1751_v37, %v1747_v9  ;;  %vm1797_vm14 = vcmp.lt.s32.totalorder %v4999_v38, 0  ;;  %v6452_v47 = vand.u32 2147483647, %v4999_v38 }
 0x1fc   :  { %v1866_v0 = vsel %vm3548_vm9, 0, %v3547_v46  ;;  %v2016_v53 = vsub.s32 32, %v2015_v14  ;;  %v2018_v5 = vshll.u32 %v6441_v19, %v2015_v14  ;;  %v2021_v18 = vshll.u32 %v6435_v39, %v2015_v14 }
 0x1fd   :  { %v1867_v56 = vsub.s32 32, %v1866_v0  ;;  %v1868_v57 = vshll.u32 %v5197_v23, %v1866_v0  ;;  %v1871_v59 = vsub.s32 4294967266, %v1866_v0  ;;  %v1753_v31 = vadd.s32 536870912, %v1752_v11 }
 0x1fe   :  { %v2019_v36 = vshrl.u32 %v6435_v39, %v2016_v53  ;;  %v2022_v54 = vshrl.u32 %v6436_v21, %v2016_v53  ;;  %v2024_v46 = vshll.u32 %v6436_v21, %v2015_v14  ;;  %v2025_v9 = vshrl.u32 %v6437_v29, %v2016_v53 }
 0x1ff   :  { %v1869_v4 = vshrl.u32 %v1851_v45, %v1867_v56  ;;  %v1872_v33 = vadd.s32 127, %v1871_v59  ;;  %v5266_v37 = vpop.eup %3947  ;;  %v5268_v6 = vshrl.u32 %v1753_v31, 30  ;;  %v2017_v23 = vshrl.u32 %v6441_v19, %v2016_v53 }
 0x200   :  { %6450 = vst [vmem:[#allocation49_spill] sm:$0xff] %v5266_v37  ;;  %v2020_v0 = vor.u32 %v2019_v36, %v2018_v5  ;;  %v2027_v2 = vshll.u32 %v6437_v29, %v2015_v14  ;;  %v2023_v42 = vor.u32 %v2022_v54, %v2021_v18  ;;  %v2028_v45 = vshrl.u32 %v6439_v61, %v2016_v53 }
 0x201   :  { %v1870_v1 = vor.u32 %v1869_v4, %v1868_v57  ;;  %v1873_v24 = vshll.u32 %v1872_v33, 23  ;;  %v5274_v56 = vpop.eup %3949  ;;  %v1755_v59 = vshll.u32 %v5268_v6, 30  ;;  %v2026_v40 = vor.u32 %v2025_v9, %v2024_v46 }
 0x202   :  { %6451 = vst [vmem:[#allocation50_spill] sm:$0xff] %v5274_v56  ;;  %v2030_v31 = vshll.u32 %v6439_v61, %v2015_v14  ;;  %v2031_v30 = vshrl.u32 %v6422_v51, %v2016_v53  ;;  %v2029_v36 = vor.u32 %v2028_v45, %v2027_v2  ;;  %vm2033_vm7 = vcmp.lt.s32.totalorder %v2014_v20, 1 }
 0x203   :  { %v1874_v32 = vor.u32 4788187, %v1873_v24  ;;  %v1877_v5 = vcvt.s32.f32 %v1870_v1  ;;  %vm5281_vm2 = vcmp.le.f32.partialorder %v6452_v47, 0.7853982  ;;  %v6453_v57 = vmov 0 }
 0x204   :  { %v6454_v57 = vsel %vm5281_vm2, 4294967295, %v6453_v57  ;;  %v5285_v18 = vsub.s32 %v1752_v11, %v1755_v59  ;;  %v2032_v54 = vor.u32 %v2031_v30, %v2030_v31  ;;  %v1902_v4 = vshrl.u32 %v1901_v41, 23 }
 0x205   :  { %6455 = vst [vmem:[#allocation51_spill] sm:$0xff] %v6454_v57  ;;  %v6456_v33 = vand.u32 2147483647, %v5099_v43  ;;  %v1875_v14 = vand.u32 2147483647, %v1874_v32  ;;  %vm1694_vm12 = vcmp.lt.s32.totalorder %v5013_v26, 0  ;;  %v2037_v47 = vsel %vm2033_vm7, %v2017_v23, %v2020_v0 }
 0x206   :  { %vm2034_vm5 = vcmp.lt.s32.totalorder %v2014_v20, 2  ;;  %vm2035_vm6 = vcmp.lt.s32.totalorder %v2014_v20, 3  ;;  %vm2036_vm1 = vcmp.lt.s32.totalorder %v2014_v20, 4  ;;  %v1758_v24 = vsub.s32 0, %v5285_v18 }
 0x207   :  { %v1905_v46 = vand.u32 8388607, %v6456_v33  ;;  %v2038_v2 = vsel %vm2036_vm1, %v2026_v40, 2102212464  ;;  %v2041_v53 = vsel %vm2033_vm7, %v2020_v0, %v2023_v42  ;;  %v1878_v11 = vmul.f32 %v1877_v5, %v1875_v14 }
 0x208   :  { %v2039_v30 = vsel %vm2035_vm6, %v2023_v42, %v2038_v2  ;;  %v2042_v41 = vsel %vm2036_vm1, %v2029_v36, 920167782  ;;  %v2045_v9 = vsel %vm2033_vm7, %v2023_v42, %v2026_v40  ;;  %v3542_v32 = vmin.u32 %v1758_v24, %v5285_v18 }
 0x209   :  { %v1778_v1 = vsub.s32 4, %v5268_v6  ;;  %v2043_v45 = vsel %vm2035_vm6, %v2026_v40, %v2042_v41  ;;  %v2046_v59 = vsel %vm2036_vm1, %v2032_v54, 1326507024  ;;  %v1879_v31 = vxor.u32 2147483648, %v1878_v11  ;;  %v828_v54 = vpop.permute.xlu1 %827 }
 0x20a   :  { %v6457_v33 = vand.u32 2147483647, %v5013_v26  ;;  %v6458_v23 = vmov 0  ;;  %v2040_v0 = vsel %vm2034_vm5, %v2037_v47, %v2039_v30  ;;  %v2044_v5 = vsel %vm2034_vm5, %v2041_v53, %v2043_v45 }
 0x20b   :  { %v2047_v42 = vsel %vm2035_vm6, %v2029_v36, %v2046_v59  ;;  %v1760_v14 = vclz %v3542_v32  ;;  %v5309_v2 = vmul.u32.u64.low %v5256_v17, %v2044_v5  ;;  %v5310_v40 = vmul.u32.u64.high %v5256_v17, %v2044_v5, %v5309_v2 }
 0x20c   :  { %vm5300_vm8 = vcmp.le.f32.partialorder %v6457_v33, 0.7853982  ;;  %v2048_v24 = vsel %vm2034_vm5, %v2045_v9, %v2047_v42  ;;  %3951 = vsinq.f32 %v5226_v25  ;;  %v3549_v47 = vadd.s32 4294967169, %v1902_v4 }
 0x20d   :  { %v6459_v23 = vsel %vm5300_vm8, 4294967295, %v6458_v23  ;;  %v5315_v41 = vmul.u32.u64.low %v5256_v17, %v2048_v24  ;;  %v5316_v33 = vmul.u32.u64.high %v5256_v17, %v2048_v24, %v5315_v41  ;;  %3953 = vcosq.f32 %v5250_v49 }
 0x20e   :  { %6460 = vst [vmem:[#allocation52_spill] sm:$0xff] %v6459_v23  ;;  %v1880_v36 = vsel %vm1797_vm14, %v1879_v31, %v1878_v11  ;;  %v6461_v20 = vsub.s32 4, %v5183_v16  ;;  %v3543_v30 = vadd.s32 4294967294, %v1760_v14  ;;  %v1748_v25 = vadd.s32 %v5218_v28, %v5234_v55 }
 0x20f   :  { %v2056_v9 = vmul.u32 %v5256_v17, %v2040_v0  ;;  %v1908_v32 = vadd.s32 1, %v3549_v47  ;;  %v5332_v4 = vmul.f32 %v4996_v35, %v828_v54  ;;  %v5337_v11 = vsel %vm1694_vm12, %v1778_v1, %v5268_v6 }
 0x210   :  { %v5326_v53 = vsel %vm1797_vm14, %v6461_v20, %v5183_v16  ;;  %vm3544_vm9 = vcmp.lt.s32.totalorder %v3543_v30, 0  ;;  %6463 = vst [vmem:[#allocation54_spill] sm:$0xff] %v5337_v11  ;;  %v2059_v45 = vadd.s32 1, %v5310_v40  ;;  %v1906_v16 = vor.u32 8388608, %v1905_v46 }
 0x211   :  { %6462 = vst [vmem:[#allocation53_spill] sm:$0xff] %v5326_v53  ;;  %v1883_v59 = vsel %vm5281_vm2, %v4999_v38, %v1880_v36  ;;  %v1763_v28 = vsel %vm3544_vm9, 0, %v3543_v30  ;;  %vm2058_vm14 = vc.u32 %v5316_v33, %v5309_v2  ;;  %vm1909_vm7 = vcmp.gt.s32.totalorder %v1908_v32, 0 }
 0x212   :  { %v1764_v55 = vsub.s32 32, %v1763_v28  ;;  %v1765_v17 = vshll.u32 %v5285_v18, %v1763_v28  ;;  %v1768_v31 = vsub.s32 4294967266, %v1763_v28  ;;  %v2060_v0 = vsel %vm2058_vm14, %v2059_v45, %v5310_v40 }
 0x213   :  { %3955 = vsinq.f32 %v5250_v49  ;;  %v2061_v46 = vadd.s32 %v2060_v0, %v2056_v9  ;;  %v1910_v1 = vsel %vm1909_vm7, %v1908_v32, 0  ;;  %v5354_v54 = vshll.u32 %v1906_v16, 8 }
 0x214   :  { %v1766_v5 = vshrl.u32 %v1748_v25, %v1764_v55  ;;  %v1769_v42 = vadd.s32 127, %v1768_v31  ;;  %v1912_v24 = vand.u32 31, %v1910_v1  ;;  %3957 = vcosq.f32 %v1883_v59 }
 0x215   :  { %v2062_v18 = vadd.s32 536870912, %v2061_v46  ;;  %v2210_v36 = vand.u32 2139095040, %v5332_v4  ;;  %v1911_v25 = vshrl.u32 %v1910_v1, 5  ;;  %3959 = vsinq.f32 %v1883_v59 }
 0x216   :  { %v1767_v49 = vor.u32 %v1766_v5, %v1765_v17  ;;  %v1770_v41 = vshll.u32 %v1769_v42, 23  ;;  %v1913_v47 = vsub.s32 32, %v1912_v24  ;;  %v5358_v20 = vpop.eup %3951  ;;  %v1915_v9 = vshll.u32 %v6441_v19, %v1912_v24 }
 0x217   :  { %6464 = vst [vmem:[#allocation55_spill] sm:$0xff] %v5358_v20  ;;  %v5360_v30 = vshrl.u32 %v2062_v18, 30  ;;  %v1918_v32 = vshll.u32 %v6435_v39, %v1912_v24  ;;  %v5364_v45 = vpop.eup %3953  ;;  %v1921_v55 = vshll.u32 %v6436_v21, %v1912_v24  ;;  %v1924_v17 = vshll.u32 %v6437_v29, %v1912_v24 }
 0x218   :  { %6465 = vst [vmem:[#allocation56_spill] sm:$0xff] %v5364_v45  ;;  %v1771_v16 = vor.u32 4788187, %v1770_v41  ;;  %v1916_v28 = vshrl.u32 %v6435_v39, %v1913_v47  ;;  %v1774_v31 = vcvt.s32.f32 %v1767_v49  ;;  %v1919_v5 = vshrl.u32 %v6436_v21, %v1913_v47 }
 0x219   :  { %v2064_v0 = vshll.u32 %v5360_v30, 30  ;;  %v1922_v1 = vshrl.u32 %v6437_v29, %v1913_v47  ;;  %v1925_v18 = vshrl.u32 %v6439_v61, %v1913_v47  ;;  %v1927_v6 = vshll.u32 %v6439_v61, %v1912_v24 }
 0x21a   :  { %v1772_v42 = vand.u32 2147483647, %v1771_v16  ;;  %v1917_v14 = vor.u32 %v1916_v28, %v1915_v9  ;;  %v1920_v40 = vor.u32 %v1919_v5, %v1918_v32  ;;  %v2211_v38 = vshrl.u32 %v2210_v36, 23 }
 0x21b   :  { %v5374_v41 = vsub.s32 %v2061_v46, %v2064_v0  ;;  %v1914_v53 = vshrl.u32 %v6441_v19, %v1913_v47  ;;  %v1923_v49 = vor.u32 %v1922_v1, %v1921_v55  ;;  %v1926_v57 = vor.u32 %v1925_v18, %v1924_v17 }
 0x21c   :  { %v1928_v11 = vshrl.u32 %v6422_v51, %v1913_v47  ;;  %v1775_v20 = vmul.f32 %v1774_v31, %v1772_v42  ;;  %vm1930_vm5 = vcmp.lt.s32.totalorder %v1911_v25, 1  ;;  %vm1932_vm6 = vcmp.lt.s32.totalorder %v1911_v25, 3  ;;  %v820_v42 = vpop.permute.xlu0 %819 }
 0x21d   :  { %v5378_v56 = vpop.eup %3955  ;;  %v2067_v59 = vsub.s32 0, %v5374_v41  ;;  %vm1931_vm1 = vcmp.lt.s32.totalorder %v1911_v25, 2  ;;  %vm1933_vm9 = vcmp.lt.s32.totalorder %v1911_v25, 4  ;;  %v6467_v46 = vand.u32 2147483647, %v5332_v4  ;;  %v3901_v25 = vld [vmem:[#allocation12 + $0x40] sm:$0xff]  }
 0x21e   :  { %6466 = vst [vmem:[#allocation57_spill] sm:$0xff] %v5378_v56  ;;  %v1929_v16 = vor.u32 %v1928_v11, %v1927_v6  ;;  %v5383_v36 = vpop.eup %3957  ;;  %v1935_v32 = vsel %vm1933_vm9, %v1923_v49, 2102212464  ;;  %v1938_v47 = vsel %vm1930_vm5, %v1917_v14, %v1920_v40  ;;  %v1939_v28 = vsel %vm1933_vm9, %v1926_v57, 920167782  ;;  %3603 = vmatprep.subr.bf16.mxu0 %v3901_v25 }
 0x21f   :  { %v2214_v24 = vand.u32 8388607, %v6467_v46  ;;  %6468 = vst [vmem:[#allocation58_spill] sm:$0xff] %v5383_v36  ;;  %v3554_v9 = vmin.u32 %v2067_v59, %v5374_v41  ;;  %v1934_v55 = vsel %vm1930_vm5, %v1914_v53, %v1917_v14  ;;  %v1936_v17 = vsel %vm1932_vm6, %v1920_v40, %v1935_v32 }
 0x220   :  { %v1940_v11 = vsel %vm1932_vm6, %v1923_v49, %v1939_v28  ;;  %v3561_v6 = vadd.s32 4294967169, %v2211_v38  ;;  %v1776_v31 = vxor.u32 2147483648, %v1775_v20  ;;  %v1942_v1 = vsel %vm1930_vm5, %v1920_v40, %v1923_v49 }
 0x221   :  { %v2069_v0 = vclz %v3554_v9  ;;  %v1941_v5 = vsel %vm1931_vm1, %v1938_v47, %v1940_v11  ;;  %v2057_v18 = vadd.s32 %v5309_v2, %v5316_v33  ;;  %v1943_v59 = vsel %vm1933_vm9, %v1929_v16, 1326507024  ;;  %v5404_v47 = vpop.eup %3959 }
 0x222   :  { %v5398_v46 = vmul.u32.u64.low %v5354_v54, %v1941_v5  ;;  %v5399_v53 = vmul.u32.u64.high %v5354_v54, %v1941_v5, %v5398_v46  ;;  %v1937_v38 = vsel %vm1931_vm1, %v1934_v55, %v1936_v17  ;;  %v1944_v9 = vsel %vm1932_vm6, %v1926_v57, %v1943_v59  ;;  %6469 = vst [vmem:[#allocation59_spill] sm:$0xff] %v5404_v47  ;;  %v3902_v5 = vld [vmem:[#allocation12] sm:$0xff]  }
 0x223   :  { %v3555_v14 = vadd.s32 4294967294, %v2069_v0  ;;  %v2215_v32 = vor.u32 8388608, %v2214_v24  ;;  %v1945_v49 = vsel %vm1931_vm1, %v1942_v1, %v1944_v9  ;;  %v2217_v2 = vadd.s32 1, %v3561_v6  ;;  %v3903_v1 = vld [vmem:[#allocation12 + $0x48] sm:$0xff]   ;;  %3604 = vmatpush3.bf16.msra.mxu0 %v3902_v5 }
 0x224   :  { %v5409_v33 = vmul.f32 %v4996_v35, %v820_v42  ;;  %v1777_v16 = vsel %vm1694_vm12, %v1776_v31, %v1775_v20  ;;  %v5414_v28 = vmul.u32.u64.low %v5354_v54, %v1945_v49  ;;  %v5415_v55 = vmul.u32.u64.high %v5354_v54, %v1945_v49, %v5414_v28  ;;  %3605 = vmatprep.subr.bf16.mxu0 %v3903_v1 }
 0x225   :  { %vm3556_vm14 = vcmp.lt.s32.totalorder %v3555_v14, 0  ;;  %v1953_v24 = vmul.u32 %v5354_v54, %v1937_v38  ;;  %v1956_v17 = vadd.s32 1, %v5399_v53  ;;  %vm2218_vm7 = vcmp.gt.s32.totalorder %v2217_v2, 0  ;;  %v3904_v38 = vld [vmem:[#allocation12 + $0x8] sm:$0xff]  }
 0x226   :  { %v2072_v57 = vsel %vm3556_vm14, 0, %v3555_v14  ;;  %v2219_v0 = vsel %vm2218_vm7, %v2217_v2, 0  ;;  %v5423_v20 = vsel %vm5300_vm8, %v5013_v26, %v1777_v16  ;;  %v5425_v42 = vshll.u32 %v2215_v32, 8  ;;  %v3905_v16 = vld [vmem:[#allocation12 + $0x50] sm:$0xff]  }
 0x227   :  { %v2073_v11 = vsub.s32 32, %v2072_v57  ;;  %v2074_v6 = vshll.u32 %v5374_v41, %v2072_v57  ;;  %v2077_v35 = vsub.s32 4294967266, %v2072_v57  ;;  %v2221_v31 = vand.u32 31, %v2219_v0  ;;  %3606 = vmatpush3.bf16.msra.mxu0 %v3904_v38 }
 0x228   :  { %vm1955_vm12 = vc.u32 %v5415_v55, %v5398_v46  ;;  %v5430_v41 = vshrl.u32 %v2219_v0, 5  ;;  %vm2003_vm5 = vcmp.lt.s32.totalorder %v5096_v10, 0  ;;  %v6471_v5 = vmov 0  ;;  %3607 = vmatprep.subr.bf16.mxu0 %v3905_v16 }
 0x229   :  { %v2075_v59 = vshrl.u32 %v2057_v18, %v2073_v11  ;;  %v2078_v14 = vadd.s32 127, %v2077_v35  ;;  %v1957_v9 = vsel %vm1955_vm12, %v1956_v17, %v5399_v53  ;;  %v2222_v49 = vsub.s32 32, %v2221_v31 }
 0x22a   :  { %v2224_v32 = vshll.u32 %v6441_v19, %v2221_v31  ;;  %v2227_v2 = vshll.u32 %v6435_v39, %v2221_v31  ;;  %v1958_v57 = vadd.s32 %v1957_v9, %v1953_v24  ;;  %v2230_v0 = vshll.u32 %v6436_v21, %v2221_v31 }
 0x22b   :  { %v2076_v18 = vor.u32 %v2075_v59, %v2074_v6  ;;  %v2079_v28 = vshll.u32 %v2078_v14, 23  ;;  %v2225_v11 = vshrl.u32 %v6435_v39, %v2222_v49  ;;  %v2228_v35 = vshrl.u32 %v6436_v21, %v2222_v49  ;;  %v3906_v14 = vld [vmem:[#allocation12 + $0x10] sm:$0xff]  }
 0x22c   :  { %v2231_v53 = vshrl.u32 %v6437_v29, %v2222_v49  ;;  %v6470_v17 = vand.u32 2147483647, %v5096_v10  ;;  %vm1900_vm1 = vcmp.lt.s32.totalorder %v5099_v43, 0  ;;  %v1959_v24 = vadd.s32 536870912, %v1958_v57  ;;  %3608 = vmatpush3.bf16.msra.mxu0 %v3906_v14 }
 0x22d   :  { %v2080_v1 = vor.u32 4788187, %v2079_v28  ;;  %v2083_v6 = vcvt.s32.f32 %v2076_v18  ;;  %v2233_v59 = vshll.u32 %v6437_v29, %v2221_v31  ;;  %v2223_v9 = vshrl.u32 %v6441_v19, %v2222_v49 }
 0x22e   :  { %vm5443_vm6 = vcmp.le.f32.partialorder %v6470_v17, 0.7853982  ;;  %v2226_v25 = vor.u32 %v2225_v11, %v2224_v32  ;;  %v2229_v40 = vor.u32 %v2228_v35, %v2227_v2  ;;  %v2234_v54 = vshrl.u32 %v6439_v61, %v2222_v49  ;;  %v3907_v17 = vld [vmem:[#allocation12 + $0x58] sm:$0xff]  }
 0x22f   :  { %v6472_v5 = vsel %vm5443_vm6, 4294967295, %v6471_v5  ;;  %v2081_v36 = vand.u32 2147483647, %v2080_v1  ;;  %v1960_v47 = vshrl.u32 %v1959_v24, 30  ;;  %v2236_v28 = vshll.u32 %v6439_v61, %v2221_v31  ;;  %v3908_v31 = vld [vmem:[#allocation12 + $0x18] sm:$0xff]   ;;  %3609 = vmatprep.subr.bf16.mxu0 %v3907_v17 }
 0x230   :  { %6473 = vst [vmem:[#allocation60_spill] sm:$0xff] %v6472_v5  ;;  %v2237_v18 = vshrl.u32 %v6422_v51, %v2222_v49  ;;  %v2232_v26 = vor.u32 %v2231_v53, %v2230_v0  ;;  %v2235_v23 = vor.u32 %v2234_v54, %v2233_v59  ;;  %vm2239_vm9 = vcmp.lt.s32.totalorder %v5430_v41, 1  ;;  %v3909_v49 = vld [vmem:[#allocation12 + $0x60] sm:$0xff]   ;;  %3610 = vmatpush3.bf16.msra.mxu0 %v3908_v31 }
 0x231   :  { %v6474_v38 = vand.u32 2147483647, %v5409_v33  ;;  %v2084_v32 = vmul.f32 %v2083_v6, %v2081_v36  ;;  %v6475_v2 = vand.u32 2147483647, %v5099_v43  ;;  %v6476_v16 = vmov 0  ;;  %3611 = vmatprep.subr.bf16.mxu0 %v3909_v49 }
 0x232   :  { %v1961_v11 = vshll.u32 %v1960_v47, 30  ;;  %v2238_v35 = vor.u32 %v2237_v18, %v2236_v28  ;;  %vm2240_vm7 = vcmp.lt.s32.totalorder %v5430_v41, 2  ;;  %v1984_v54 = vsub.s32 4, %v1960_v47 }
 0x233   :  { %v5456_v45 = vand.u32 8388607, %v6474_v38  ;;  %vm5460_vm14 = vcmp.le.f32.partialorder %v6475_v2, 0.7853982  ;;  %vm2241_vm12 = vcmp.lt.s32.totalorder %v5430_v41, 3  ;;  %vm2242_vm0 = vcmp.lt.s32.totalorder %v5430_v41, 4 }
 0x234   :  { %v6477_v16 = vsel %vm5460_vm14, 4294967295, %v6476_v16  ;;  %v2243_v36 = vsel %vm2239_vm9, %v2223_v9, %v2226_v25  ;;  %v2085_v0 = vxor.u32 2147483648, %v2084_v32  ;;  %v5469_v53 = vsub.s32 %v1958_v57, %v1961_v11  ;;  %v3910_v38 = vld [vmem:[#allocation12 + $0x20] sm:$0xff]   ;;  %v3911_v2 = vld [vmem:[#allocation12 + $0x68] sm:$0xff]  }
 0x235   :  { %6478 = vst [vmem:[#allocation61_spill] sm:$0xff] %v6477_v16  ;;  %v2244_v1 = vsel %vm2242_vm0, %v2232_v26, 2102212464  ;;  %v2247_v6 = vsel %vm2239_vm9, %v2226_v25, %v2229_v40  ;;  %v2248_v59 = vsel %vm2242_vm0, %v2235_v23, 920167782  ;;  %v2251_v14 = vsel %vm2239_vm9, %v2229_v40, %v2232_v26  ;;  %3612 = vmatpush3.bf16.msra.mxu0 %v3910_v38 }
 0x236   :  { %v2245_v24 = vsel %vm2241_vm12, %v2229_v40, %v2244_v1  ;;  %v2252_v28 = vsel %vm2242_vm0, %v2238_v35, 1326507024  ;;  %v2086_v9 = vsel %vm2003_vm5, %v2085_v0, %v2084_v32  ;;  %v6479_v17 = vsub.s32 4, %v5360_v30  ;;  %v844_v1 = vpop.permute.xlu1 %843  ;;  %3613 = vmatprep.subr.bf16.mxu0 %v3911_v2 }
 0x237   :  { %v1964_v25 = vsub.s32 0, %v5469_v53  ;;  %v2249_v18 = vsel %vm2241_vm12, %v2232_v26, %v2248_v59  ;;  %3961 = vcosq.f32 %v5423_v20  ;;  %v5492_v40 = vsel %vm1900_vm1, %v1984_v54, %v1960_v47  ;;  %v3912_v59 = vld [vmem:[#allocation12 + $0x28] sm:$0xff]  }
 0x238   :  { %v5484_v57 = vsel %vm2003_vm5, %v6479_v17, %v5360_v30  ;;  %6481 = vst [vmem:[#allocation63_spill] sm:$0xff] %v5492_v40  ;;  %v2250_v32 = vsel %vm2240_vm7, %v2247_v6, %v2249_v18  ;;  %v2253_v30 = vsel %vm2241_vm12, %v2235_v23, %v2252_v28  ;;  %v2246_v26 = vsel %vm2240_vm7, %v2243_v36, %v2245_v24  ;;  %v3990_v18 = vld [vmem:[#allocation6] ss:$0 sm:$0xff] }
 0x239   :  { %6480 = vst [vmem:[#allocation62_spill] sm:$0xff] %v5484_v57  ;;  %v3550_v11 = vmin.u32 %v1964_v25, %v5469_v53  ;;  %v2254_v35 = vsel %vm2240_vm7, %v2251_v14, %v2253_v30  ;;  %v6482_v31 = vand.u32 2139095040, %v5409_v33  ;;  %v2089_v54 = vsel %vm5443_vm6, %v5096_v10, %v2086_v9  ;;  %v3913_v9 = vld [vmem:[#allocation12 + $0x70] sm:$0xff]   ;;  %3614 = vmatpush3.bf16.msra.mxu0 %v3912_v59 }
 0x23a   :  { %v5509_v0 = vmul.u32.u64.low %v5425_v42, %v2254_v35  ;;  %v5510_v23 = vmul.u32.u64.high %v5425_v42, %v2254_v35, %v5509_v0  ;;  %v2112_v49 = vor.u32 8388608, %v5456_v45  ;;  %3963 = vsinq.f32 %v5423_v20  ;;  %v836_v20 = vpop.permute.xlu0 %835  ;;  %3615 = vmatprep.subr.bf16.mxu0 %v3913_v9 }
 0x23b   :  { %v2108_v47 = vshrl.u32 %v6482_v31, 23  ;;  %v1966_v6 = vclz %v3550_v11  ;;  %v5514_v36 = vmul.u32.u64.low %v5425_v42, %v2250_v32  ;;  %v5515_v24 = vmul.u32.u64.high %v5425_v42, %v2250_v32, %v5514_v36  ;;  %v318_v32 = vld [vmem:[#allocation11] sm:$0x3]  ;;  %v3914_v11 = vld [vmem:[#allocation12 + $0x30] sm:$0xff]  }
 0x23c   :  { %v1954_v28 = vadd.s32 %v5398_v46, %v5415_v55  ;;  %3965 = vcosq.f32 %v2089_v54  ;;  %v5527_v38 = vmul.f32 %v3990_v18, %v844_v1  ;;  %v2262_v30 = vmul.u32 %v5425_v42, %v2246_v26  ;;  %v3915_v42 = vld [vmem:[#allocation12 + $0x78] sm:$0xff]  }
 0x23d   :  { %v3557_v41 = vadd.s32 4294967169, %v2108_v47  ;;  %v3551_v17 = vadd.s32 4294967294, %v1966_v6  ;;  %3967 = vsinq.f32 %v2089_v54  ;;  %vm2264_vm0 = vc.u32 %v5510_v23, %v5514_v36  ;;  %3616 = vmatpush3.bf16.msra.mxu0 %v3914_v11 }
 0x23e   :  { %v5532_v46 = vshll.u32 %v2112_v49, 8  ;;  %v2265_v55 = vadd.s32 1, %v5515_v24  ;;  %v6376_v2 = vand.u32 2147483647, %v5527_v38  ;;  %v5536_v47 = vmul.f32 %v3990_v18, %v836_v20  ;;  %v3916_v20 = vld [vmem:[#allocation12 + $0x38] sm:$0xff]   ;;  %3617 = vmatprep.subr.bf16.mxu0 %v3915_v42 }
 0x23f   :  { %v2114_v25 = vadd.s32 1, %v3557_v41  ;;  %vm3552_vm5 = vcmp.lt.s32.totalorder %v3551_v17, 0  ;;  %v5539_v54 = vrot.slane %v318_v32, %v4459_v7  ;;  %v2416_v9 = vand.u32 2139095040, %v5527_v38 }
 0x240   :  { %v1969_v35 = vsel %vm3552_vm5, 0, %v3551_v17  ;;  %v2266_v1 = vsel %vm2264_vm0, %v2265_v55, %v5515_v24  ;;  %v5549_v17 = vrot.slane %v318_v32, %v4463_v13  ;;  %v5562_v13 = vld [vmem:[%s6313_s8] sm:$0xff]   ;;  %vm6490_vm6 = vcmp.lt.s32.totalorder %v5332_v4, 0 }
 0x241   :  { %vm2115_vm9 = vcmp.gt.s32.totalorder %v2114_v25, 0  ;;  %v1970_v26 = vsub.s32 32, %v1969_v35  ;;  %v1971_v0 = vshll.u32 %v5469_v53, %v1969_v35  ;;  %v1974_v49 = vsub.s32 4294967266, %v1969_v35  ;;  %v5546_v6 = vpop.eup %3961  ;;  %3618 = vmatpush3.bf16.msra.mxu0 %v3916_v20 }
 0x242   :  { %v2116_v31 = vsel %vm2115_vm9, %v2114_v25, 0  ;;  %6483 = vst [vmem:[#allocation64_spill] sm:$0xff] %v5546_v6  ;;  %v2267_v41 = vadd.s32 %v2266_v1, %v2262_v30  ;;  %v5554_v53 = vand.u32 8388607, %v6376_v2  ;;  %v2417_v40 = vshrl.u32 %v2416_v9, 23  ;;  %3661 = vmatprep.subr.bf16.mxu0 %v5562_v13 }
 0x243   :  { %v2118_v59 = vand.u32 31, %v2116_v31  ;;  %v1972_v25 = vshrl.u32 %v1954_v28, %v1970_v26  ;;  %v1975_v18 = vadd.s32 127, %v1974_v49  ;;  %v5556_v14 = vshrl.u32 %v2116_v31, 5 }
 0x244   :  { %v2268_v35 = vadd.s32 536870912, %v2267_v41  ;;  %v5566_v11 = vpop.eup %3963 }
 0x245   :  { %v2119_v24 = vsub.s32 32, %v2118_v59  ;;  %v2121_v30 = vshll.u32 %v6441_v19, %v2118_v59  ;;  %v1973_v28 = vor.u32 %v1972_v25, %v1971_v0  ;;  %v1976_v32 = vshll.u32 %v1975_v18, 23  ;;  %6484 = vst [vmem:[#allocation65_spill] sm:$0xff] %v5566_v11 }
 0x246   :  { %v2124_v55 = vshll.u32 %v6435_v39, %v2118_v59  ;;  %v2130_v26 = vshll.u32 %v6437_v29, %v2118_v59  ;;  %v2269_v49 = vshrl.u32 %v2268_v35, 30  ;;  %v2127_v42 = vshll.u32 %v6436_v21, %v2118_v59  ;;  %v5571_v45 = vpop.eup %3965 }
 0x247   :  { %v2122_v31 = vshrl.u32 %v6435_v39, %v2119_v24  ;;  %v2125_v1 = vshrl.u32 %v6436_v21, %v2119_v24  ;;  %6485 = vst [vmem:[#allocation66_spill] sm:$0xff] %v5571_v45  ;;  %v1977_v2 = vor.u32 4788187, %v1976_v32  ;;  %v1980_v57 = vcvt.s32.f32 %v1973_v28  ;;  %v5576_v18 = vpop.eup %3967 }
 0x248   :  { %v2128_v0 = vshrl.u32 %v6437_v29, %v2119_v24  ;;  %v2131_v25 = vshrl.u32 %v6439_v61, %v2119_v24  ;;  %6486 = vst [vmem:[#allocation67_spill] sm:$0xff] %v5576_v18  ;;  %v2270_v35 = vshll.u32 %v2269_v49, 30  ;;  %v2120_v5 = vshrl.u32 %v6441_v19, %v2119_v24 }
 0x249   :  { %v2123_v10 = vor.u32 %v2122_v31, %v2121_v30  ;;  %v1978_v6 = vand.u32 2147483647, %v1977_v2  ;;  %v2126_v45 = vor.u32 %v2125_v1, %v2124_v55  ;;  %v2133_v28 = vshll.u32 %v6439_v61, %v2118_v59 }
 0x24a   :  { %v2132_v32 = vor.u32 %v2131_v25, %v2130_v26  ;;  %v6487_v11 = vand.u32 2147483647, %v5332_v4  ;;  %v5587_v20 = vsub.s32 %v2267_v41, %v2270_v35  ;;  %v2129_v18 = vor.u32 %v2128_v0, %v2127_v42 }
 0x24b   :  { %v2134_v44 = vshrl.u32 %v6422_v51, %v2119_v24  ;;  %vm2136_vm0 = vcmp.lt.s32.totalorder %v5556_v14, 1  ;;  %v1981_v9 = vmul.f32 %v1980_v57, %v1978_v6  ;;  %v2293_v30 = vsub.s32 4, %v2269_v49 }
 0x24c   :  { %vm5583_vm12 = vcmp.le.f32.partialorder %v6487_v11, 0.7853982  ;;  %vm2137_vm5 = vcmp.lt.s32.totalorder %v5556_v14, 2  ;;  %vm2138_vm9 = vcmp.lt.s32.totalorder %v5556_v14, 3  ;;  %v2273_v2 = vsub.s32 0, %v5587_v20 }
 0x24d   :  { %v2135_v59 = vor.u32 %v2134_v44, %v2133_v28  ;;  %vm2139_vm7 = vcmp.lt.s32.totalorder %v5556_v14, 4  ;;  %v2140_v41 = vsel %vm2136_vm0, %v2120_v5, %v2123_v10  ;;  %v1982_v55 = vxor.u32 2147483648, %v1981_v9 }
 0x24e   :  { %v2141_v26 = vsel %vm2139_vm7, %v2129_v18, 2102212464  ;;  %v2144_v24 = vsel %vm2136_vm0, %v2123_v10, %v2126_v45  ;;  %v2145_v11 = vsel %vm2139_vm7, %v2132_v32, 920167782  ;;  %v3562_v57 = vmin.u32 %v2273_v2, %v5587_v20 }
 0x24f   :  { %v2142_v6 = vsel %vm2138_vm9, %v2126_v45, %v2141_v26  ;;  %v2146_v31 = vsel %vm2138_vm9, %v2129_v18, %v2145_v11  ;;  %v2148_v44 = vsel %vm2136_vm0, %v2126_v45, %v2129_v18  ;;  %v1983_v5 = vsel %vm1900_vm1, %v1982_v55, %v1981_v9 }
 0x250   :  { %v2147_v1 = vsel %vm2137_vm5, %v2144_v24, %v2146_v31  ;;  %v2149_v42 = vsel %vm2139_vm7, %v2135_v59, 1326507024  ;;  %v6389_v10 = vand.u32 2147483647, %v5536_v47  ;;  %v1986_v0 = vsel %vm5460_vm14, %v5099_v43, %v1983_v5 }
 0x251   :  { %v2275_v25 = vclz %v3562_v57  ;;  %v5616_v35 = vsel %vm6490_vm6, %v2293_v30, %v2269_v49  ;;  %v2150_v45 = vsel %vm2138_vm9, %v2132_v32, %v2149_v42  ;;  %v2143_v18 = vsel %vm2137_vm5, %v2140_v41, %v2142_v6 }
 0x252   :  { %6491 = vst [vmem:[#allocation68_spill] sm:$0xff] %v5616_v35  ;;  %v2151_v28 = vsel %vm2137_vm5, %v2148_v44, %v2150_v45  ;;  %v5625_v9 = vmul.u32.u64.low %v5532_v46, %v2147_v1  ;;  %v5626_v2 = vmul.u32.u64.high %v5532_v46, %v2147_v1, %v5625_v9  ;;  %v2421_v49 = vor.u32 8388608, %v5554_v53 }
 0x253   :  { %v3563_v59 = vadd.s32 4294967294, %v2275_v25  ;;  %v5629_v55 = vmul.u32.u64.low %v5532_v46, %v2151_v28  ;;  %v5630_v26 = vmul.u32.u64.high %v5532_v46, %v2151_v28, %v5629_v55  ;;  %3969 = vcosq.f32 %v1986_v0 }
 0x254   :  { %v2263_v32 = vadd.s32 %v5514_v36, %v5510_v23  ;;  %v3569_v30 = vadd.s32 4294967169, %v2417_v40  ;;  %3971 = vsinq.f32 %v1986_v0  ;;  %v2159_v41 = vmul.u32 %v5532_v46, %v2143_v18 }
 0x255   :  { %vm3564_vm6 = vcmp.lt.s32.totalorder %v3563_v59, 0  ;;  %v2313_v24 = vand.u32 2139095040, %v5536_v47  ;;  %v2162_v57 = vadd.s32 1, %v5626_v2  ;;  %v2317_v53 = vand.u32 8388607, %v6389_v10 }
 0x256   :  { %v2278_v11 = vsel %vm3564_vm6, 0, %v3563_v59  ;;  %v2423_v6 = vadd.s32 1, %v3569_v30  ;;  %v5644_v44 = vshll.u32 %v2421_v49, 8  ;;  %vm2161_vm1 = vc.u32 %v5630_v26, %v5625_v9 }
 0x257   :  { %v2279_v31 = vsub.s32 32, %v2278_v11  ;;  %v2280_v23 = vshll.u32 %v5587_v20, %v2278_v11  ;;  %v2283_v36 = vsub.s32 4294967266, %v2278_v11  ;;  %v2314_v40 = vshrl.u32 %v2313_v24, 23 }
 0x258   :  { %vm2424_vm7 = vcmp.gt.s32.totalorder %v2423_v6, 0  ;;  %v4245_v46 = vmov 1966171168   ;;  %vm2106_vm0 = vcmp.lt.s32.totalorder %v5409_v33, 0  ;;  %v2163_v0 = vsel %vm2161_vm1, %v2162_v57, %v5626_v2 }
 0x259   :  { %v5647_v5 = vunpack.c.l.s4 %v4245_v46  ;;  %v2281_v1 = vshrl.u32 %v2263_v32, %v2279_v31  ;;  %v2284_v42 = vadd.s32 127, %v2283_v36  ;;  %v2425_v25 = vsel %vm2424_vm7, %v2423_v6, 0 }
 0x25a   :  { %v5652_v45 = vadd.s32 %v5625_v9, %v5630_v26  ;;  %v2164_v20 = vadd.s32 %v2163_v0, %v2159_v41  ;;  %v2427_v18 = vand.u32 31, %v2425_v25  ;;  %v2318_v28 = vor.u32 8388608, %v2317_v53 }
 0x25b   :  { %v2282_v59 = vor.u32 %v2281_v1, %v2280_v23  ;;  %v2285_v55 = vshll.u32 %v2284_v42, 23  ;;  %v2426_v49 = vshrl.u32 %v2425_v25, 5  ;;  %v3565_v30 = vadd.s32 4294967169, %v2314_v40 }
 0x25c   :  { %v2165_v24 = vadd.s32 536870912, %v2164_v20  ;;  %v2428_v11 = vsub.s32 32, %v2427_v18  ;;  %v2430_v32 = vshll.u32 %v6441_v19, %v2427_v18  ;;  %v2433_v31 = vshll.u32 %v6435_v39, %v2427_v18 }
 0x25d   :  { %v2286_v36 = vor.u32 4788187, %v2285_v55  ;;  %v2289_v46 = vcvt.s32.f32 %v2282_v59  ;;  %v2436_v2 = vshll.u32 %v6436_v21, %v2427_v18  ;;  %v2439_v9 = vshll.u32 %v6437_v29, %v2427_v18  ;;  %v5658_v26 = vpop.eup %3969 }
 0x25e   :  { %6492 = vst [vmem:[#allocation69_spill] sm:$0xff] %v5658_v26  ;;  %v6493_v41 = vand.u32 2147483647, %v5409_v33  ;;  %v2166_v6 = vshrl.u32 %v2165_v24, 30  ;;  %v2429_v53 = vshrl.u32 %v6441_v19, %v2428_v11  ;;  %v2431_v23 = vshrl.u32 %v6435_v39, %v2428_v11  ;;  %v5669_v1 = vpop.eup %3971 }
 0x25f   :  { %v2434_v40 = vshrl.u32 %v6436_v21, %v2428_v11  ;;  %6496 = vst [vmem:[#allocation70_spill] sm:$0xff] %v5669_v1  ;;  %v2287_v42 = vand.u32 2147483647, %v2286_v36  ;;  %v2437_v0 = vshrl.u32 %v6437_v29, %v2428_v11  ;;  %v2440_v25 = vshrl.u32 %v6439_v61, %v2428_v11 }
 0x260   :  { %vm5662_vm5 = vcmp.le.f32.partialorder %v6493_v41, 0.7853982  ;;  %v2442_v59 = vshll.u32 %v6439_v61, %v2427_v18  ;;  %v2167_v55 = vshll.u32 %v2166_v6, 30  ;;  %v2190_v41 = vsub.s32 4, %v2166_v6 }
 0x261   :  { %v2432_v14 = vor.u32 %v2431_v23, %v2430_v32  ;;  %v2435_v10 = vor.u32 %v2434_v40, %v2433_v31  ;;  %v2290_v24 = vmul.f32 %v2289_v46, %v2287_v42  ;;  %v2438_v35 = vor.u32 %v2437_v0, %v2436_v2 }
 0x262   :  { %v2441_v43 = vor.u32 %v2440_v25, %v2439_v9  ;;  %v2443_v26 = vshrl.u32 %v6422_v51, %v2428_v11  ;;  %v5675_v16 = vsub.s32 %v2164_v20, %v2167_v55  ;;  %v5679_v36 = vsel %vm2106_vm0, %v2190_v41, %v2166_v6 }
 0x263   :  { %vm2445_vm9 = vcmp.lt.s32.totalorder %v2426_v49, 1  ;;  %v5681_v1 = vshll.u32 %v2318_v28, 8  ;;  %v2291_v37 = vxor.u32 2147483648, %v2290_v24  ;;  %vm2446_vm6 = vcmp.lt.s32.totalorder %v2426_v49, 2 }
 0x264   :  { %v2444_v18 = vor.u32 %v2443_v26, %v2442_v59  ;;  %vm2447_vm1 = vcmp.lt.s32.totalorder %v2426_v49, 3  ;;  %v2170_v32 = vsub.s32 0, %v5675_v16  ;;  %vm2448_vm7 = vcmp.lt.s32.totalorder %v2426_v49, 4 }
 0x265   :  { %v2449_v31 = vsel %vm2445_vm9, %v2429_v53, %v2432_v14  ;;  %v2453_v46 = vsel %vm2445_vm9, %v2432_v14, %v2435_v10  ;;  %vm6497_vm14 = vcmp.lt.s32.totalorder %v5332_v4, 0  ;;  %v2450_v11 = vsel %vm2448_vm7, %v2438_v35, 2102212464 }
 0x266   :  { %v2292_v20 = vsel %vm6497_vm14, %v2291_v37, %v2290_v24  ;;  %v2454_v2 = vsel %vm2448_vm7, %v2441_v43, 920167782  ;;  %v2457_v9 = vsel %vm2445_vm9, %v2435_v10, %v2438_v35  ;;  %v3558_v6 = vmin.u32 %v2170_v32, %v5675_v16 }
 0x267   :  { %v2295_v28 = vsel %vm5583_vm12, %v5332_v4, %v2292_v20  ;;  %v2451_v26 = vsel %vm2447_vm1, %v2435_v10, %v2450_v11  ;;  %v2455_v23 = vsel %vm2447_vm1, %v2438_v35, %v2454_v2  ;;  %v2458_v37 = vsel %vm2448_vm7, %v2444_v18, 1326507024 }
 0x268   :  { %v2456_v53 = vsel %vm2446_vm6, %v2453_v46, %v2455_v23  ;;  %v2705_v40 = vunpack.c.0.s8 %v5647_v5  ;;  %3973 = vcosq.f32 %v2295_v28  ;;  %v2172_v42 = vclz %v3558_v6 }
 0x269   :  { %v2452_v0 = vsel %vm2446_vm6, %v2449_v31, %v2451_v26  ;;  %v2459_v25 = vsel %vm2447_vm1, %v2441_v43, %v2458_v37  ;;  %v5701_v10 = vmul.u32.u64.low %v5644_v44, %v2456_v53  ;;  %v5702_v35 = vmul.u32.u64.high %v5644_v44, %v2456_v53, %v5701_v10  ;;  %v5735_v37 = vpop.f32.mrb[0].mxu1 }
 0x26a   :  { %v2460_v59 = vsel %vm2446_vm6, %v2457_v9, %v2459_v25  ;;  %v2320_v55 = vadd.s32 1, %v3565_v30  ;;  %3975 = vsinq.f32 %v2295_v28  ;;  %v3559_v41 = vadd.s32 4294967294, %v2172_v42  ;;  %v526_v42 = vpop.f32.mrb[1].mxu1 }
 0x26b   :  { %v5706_v24 = vmul.u32.u64.low %v5644_v44, %v2460_v59  ;;  %v5707_v18 = vmul.u32.u64.high %v5644_v44, %v2460_v59, %v5706_v24  ;;  %v2468_v5 = vmul.u32 %v5644_v44, %v2452_v0  ;;  %v5711_v32 = vsub.s32 %v2705_v40, %v4456_v3 }
 0x26c   :  { %vm2321_vm14 = vcmp.gt.s32.totalorder %v2320_v55, 0  ;;  %v6498_v43 = vsel %vm4696_vm13, 0, %v4720_v63  ;;  %vm3560_vm9 = vcmp.lt.s32.totalorder %v3559_v41, 0  ;;  %v964_v31 = vxor.u32 2147483648, %v4791_v60  ;;  %v528_v24 = vpop.f32.mrb[2].mxu1 }
 0x26d   :  { %v5717_v49 = vand.u32 3, %v6498_v43  ;;  %v2322_v30 = vsel %vm2321_vm14, %v2320_v55, 0  ;;  %v2175_v20 = vsel %vm3560_vm9, 0, %v3559_v41  ;;  %v2471_v11 = vadd.s32 1, %v5702_v35 }
 0x26e   :  { %v2324_v44 = vand.u32 31, %v2322_v30  ;;  %v6499_v2 = vsel %vm4778_vm4, 0, %v4748_v34  ;;  %v2176_v8 = vsub.s32 32, %v2175_v20  ;;  %v2177_v63 = vshll.u32 %v5675_v16, %v2175_v20 }
 0x26f   :  { %v5726_v9 = vand.u32 3, %v6499_v2  ;;  %v2180_v28 = vsub.s32 4294967266, %v2175_v20  ;;  %v5729_v6 = vshrl.u32 %v2322_v30, 5  ;;  %vm2470_vm13 = vc.u32 %v5707_v18, %v5701_v10  ;;  %v530_v2 = vpop.f32.mrb[3].mxu1 }
 0x270   :  { %v2325_v26 = vsub.s32 32, %v2324_v44  ;;  %v2327_v23 = vshll.u32 %v6441_v19, %v2324_v44  ;;  %v2330_v53 = vshll.u32 %v6435_v39, %v2324_v44  ;;  %v2178_v34 = vshrl.u32 %v5652_v45, %v2176_v8 }
 0x271   :  { %v2181_v27 = vadd.s32 127, %v2180_v28  ;;  %vm6397_vm4 = vcmp.lt.s32.totalorder %v5527_v38, 0  ;;  %v2472_v16 = vsel %vm2470_vm13, %v2471_v11, %v5702_v35  ;;  %v2333_v40 = vshll.u32 %v6436_v21, %v2324_v44 }
 0x272   :  { %v6500_v0 = vand.u32 2147483647, %v5527_v38  ;;  %v2473_v59 = vadd.s32 %v2472_v16, %v2468_v5  ;;  %v2326_v55 = vshrl.u32 %v6441_v19, %v2325_v26  ;;  %v2328_v41 = vshrl.u32 %v6435_v39, %v2325_v26  ;;  %v5750_v43 = vpop.eup %3973 }
 0x273   :  { %v2331_v45 = vshrl.u32 %v6436_v21, %v2325_v26  ;;  %v2179_v35 = vor.u32 %v2178_v34, %v2177_v63  ;;  %v2182_v30 = vshll.u32 %v2181_v27, 23  ;;  %v2334_v20 = vshrl.u32 %v6437_v29, %v2325_v26 }
 0x274   :  { %vm5743_vm6 = vcmp.le.f32.partialorder %v6500_v0, 0.7853982  ;;  %v2336_v11 = vshll.u32 %v6437_v29, %v2324_v44  ;;  %v2474_v8 = vadd.s32 536870912, %v2473_v59  ;;  %v2329_v28 = vor.u32 %v2328_v41, %v2327_v23  ;;  %v5755_v19 = vpop.eup %3975 }
 0x275   :  { %v2332_v0 = vor.u32 %v2331_v45, %v2330_v53  ;;  %v2337_v5 = vshrl.u32 %v6439_v61, %v2325_v26  ;;  %v2183_v39 = vor.u32 4788187, %v2182_v30  ;;  %v2186_v16 = vcvt.s32.f32 %v2179_v35 }
 0x276   :  { %v2335_v21 = vor.u32 %v2334_v20, %v2333_v40  ;;  %v2339_v14 = vshll.u32 %v6439_v61, %v2324_v44  ;;  %v2475_v46 = vshrl.u32 %v2474_v8, 30  ;;  %v2340_v34 = vshrl.u32 %v6422_v51, %v2325_v26 }
 0x277   :  { %v2338_v63 = vor.u32 %v2337_v5, %v2336_v11  ;;  %vm2342_vm1 = vcmp.lt.s32.totalorder %v5729_v6, 1  ;;  %v2184_v29 = vand.u32 2147483647, %v2183_v39  ;;  %vm2343_vm7 = vcmp.lt.s32.totalorder %v5729_v6, 2 }
 0x278   :  { %vm2344_vm14 = vcmp.lt.s32.totalorder %v5729_v6, 3  ;;  %vm2345_vm9 = vcmp.lt.s32.totalorder %v5729_v6, 4  ;;  %v2476_v23 = vshll.u32 %v2475_v46, 30  ;;  %v2499_v53 = vsub.s32 4, %v2475_v46 }
 0x279   :  { %v2341_v27 = vor.u32 %v2340_v34, %v2339_v14  ;;  %v2346_v40 = vsel %vm2342_vm1, %v2326_v55, %v2329_v28  ;;  %v2187_v61 = vmul.f32 %v2186_v16, %v2184_v29  ;;  %v2347_v44 = vsel %vm2345_vm9, %v2335_v21, 2102212464 }
 0x27a   :  { %v2350_v51 = vsel %vm2342_vm1, %v2329_v28, %v2332_v0  ;;  %v2351_v26 = vsel %vm2345_vm9, %v2338_v63, 920167782  ;;  %v5771_v41 = vsub.s32 %v2473_v59, %v2476_v23  ;;  %v5775_v45 = vsel %vm6397_vm4, %v2499_v53, %v2475_v46 }
 0x27b   :  { %v2348_v14 = vsel %vm2344_vm14, %v2332_v0, %v2347_v44  ;;  %v2352_v55 = vsel %vm2344_vm14, %v2335_v21, %v2351_v26  ;;  %v2188_v35 = vxor.u32 2147483648, %v2187_v61  ;;  %v2469_v30 = vadd.s32 %v5701_v10, %v5707_v18 }
 0x27c   :  { %v2502_v20 = vsel %vm5743_vm6, 0, %v5775_v45  ;;  %v2353_v59 = vsel %vm2343_vm7, %v2350_v51, %v2352_v55  ;;  %v2479_v46 = vsub.s32 0, %v5771_v41  ;;  %v2349_v11 = vsel %vm2343_vm7, %v2346_v40, %v2348_v14 }
 0x27d   :  { %v2354_v8 = vsel %vm2342_vm1, %v2332_v0, %v2335_v21  ;;  %v2355_v28 = vsel %vm2345_vm9, %v2341_v27, 1326507024  ;;  %v2189_v10 = vsel %vm2106_vm0, %v2188_v35, %v2187_v61  ;;  %v525_v21 = vadd.f32 %v5735_v37, %v5539_v54 }
 0x27e   :  { %v2356_v18 = vsel %vm2344_vm14, %v2338_v63, %v2355_v28  ;;  %v5800_v5 = vmul.u32.u64.low %v5681_v1, %v2353_v59  ;;  %v5801_v39 = vmul.u32.u64.high %v5681_v1, %v2353_v59, %v5800_v5  ;;  %v2192_v16 = vsel %vm5662_vm5, %v5409_v33, %v2189_v10  ;;  %v3918_v28 = vld [vmem:[%s6313_s8 + $0x8] sm:$0xff]  }
 0x27f   :  { %v3570_v34 = vmin.u32 %v2479_v46, %v5771_v41  ;;  %v2357_v0 = vsel %vm2343_vm7, %v2354_v8, %v2356_v18  ;;  %3977 = vcosq.f32 %v2192_v16  ;;  %v527_v23 = vadd.f32 %v526_v42, %v5549_v17 }
 0x280   :  { %v5813_v63 = vmul.u32.u64.low %v5681_v1, %v2357_v0  ;;  %v5814_v29 = vmul.u32.u64.high %v5681_v1, %v2357_v0, %v5813_v63  ;;  %3979 = vsinq.f32 %v2192_v16  ;;  %v2365_v27 = vmul.u32 %v5681_v1, %v2349_v11 }
 0x281   :  { %v2481_v53 = vclz %v3570_v34  ;;  %v529_v40 = vadd.f32 %v528_v24, %v5539_v54  ;;  %v2368_v6 = vadd.s32 1, %v5801_v39  ;;  %v533_v61 = vmax.f32 %v525_v21, 0.0 }
 0x282   :  { %v5820_v44 = vmax.f32 %v527_v23, 0.0  ;;  %v531_v37 = vadd.f32 %v530_v2, %v5549_v17  ;;  %vm962_vm13 = vcmp.lt.s32.totalorder %v5717_v49, 2  ;;  %vm963_vm1 = vcmp.eq.s32.totalorder %v5717_v49, 0 }
 0x283   :  { %v3571_v51 = vadd.s32 4294967294, %v2481_v53  ;;  %v535_v26 = vmax.f32 %v529_v40, 0.0  ;;  %v5826_v42 = vadd.s32 %v5800_v5, %v5814_v29  ;;  %vm2367_vm7 = vc.u32 %v5814_v29, %v5800_v5 }
 0x284   :  { %v5829_v1 = vmax.f32 %v531_v37, 0.0  ;;  %vm966_vm14 = vcmp.eq.s32.totalorder %v5717_v49, 2  ;;  %vm1063_vm9 = vweird.f32 %v4492_v22  ;;  %vm6398_vm0 = vcmp.lt.s32.totalorder %v5536_v47, 0 }
 0x285   :  { %vm3572_vm4 = vcmp.lt.s32.totalorder %v3571_v51, 0  ;;  %v2369_v54 = vsel %vm2367_vm7, %v2368_v6, %v5801_v39  ;;  %v537_v17 = vpack.c.bf16 %v535_v26, %v533_v61  ;;  %v2709_v24 = vrot.slane %v5820_v44, %v5711_v32 }
 0x286   :  { %v2484_v2 = vsel %vm3572_vm4, 0, %v3571_v51  ;;  %v2370_v14 = vadd.s32 %v2369_v54, %v2365_v27  ;;  %v2702_v55 = vcombine.high %v5820_v44, %v5820_v44  ;;  %v538_v35 = vpack.c.bf16 %v5829_v1, %v5820_v44 }
 0x287   :  { %v2485_v59 = vsub.s32 32, %v2484_v2  ;;  %v2486_v46 = vshll.u32 %v5771_v41, %v2484_v2  ;;  %v2489_v11 = vsub.s32 4294967266, %v2484_v2  ;;  %v2725_v8 = vrot.slane %v2709_v24, %v5711_v32 }
 0x288   :  { %v6503_v10 = vand.u32 2147483647, %v5536_v47  ;;  %v2371_v5 = vadd.s32 536870912, %v2370_v14  ;;  %706 = vmatprep.mubr.bf16.mxu0 %v538_v35  ;;  %v965_v41 = vsel %vm963_vm1, %v4785_v50, %v964_v31  ;;  %v6506_v39 = vxor.u32 2147483648, %v4785_v50 }
 0x289   :  { %vm1065_vm7 = vcmp.lt.s32.totalorder %v5726_v9, 2  ;;  %v2487_v34 = vshrl.u32 %v2469_v30, %v2485_v59  ;;  %v2490_v0 = vadd.s32 127, %v2489_v11  ;;  %707 = vmatmul.mubr.bf16.vlgmr.msra.gmra.mrb[4].mxu0 %v537_v17  ;;  %v2803_v21 = vrot.slane %v2725_v8, %v4459_v7  ;;  %v5866_v29 = vpop.eup %3977  ;;  %v3920_v11 = vld [vmem:[%s6313_s8 + $0x18] sm:$0xff]  }
 0x28a   :  { %vm5848_vm4 = vcmp.le.f32.partialorder %v6503_v10, 0.7853982  ;;  %v968_v16 = vsel %vm966_vm14, %v6506_v39, %v4791_v60  ;;  %v2372_v23 = vshrl.u32 %v2371_v5, 30  ;;  %3662 = vmatpush3.bf16.msra.mxu0 %v5562_v13  ;;  %vm6507_vm1 = vweird.f32 %v4482_v12  ;;  %v5873_v31 = vpop.eup %3979  ;;  %v3919_v12 = vld [vmem:[%s6313_s8 + $0x10] sm:$0xff]   ;;  %v6509_v5 = vld [vmem:[#allocation30_spill] sm:$0xff] }
 0x28b   :  { %v969_v63 = vsel %vm962_vm13, %v965_v41, %v968_v16  ;;  %vm1066_vm14 = vcmp.eq.s32.totalorder %v5726_v9, 0  ;;  %v1067_v60 = vxor.u32 2147483648, %v5026_v48  ;;  %v2488_v30 = vor.u32 %v2487_v34, %v2486_v46  ;;  %2864 = vrot.lane.b32.xlu0 %v2803_v21, %s4230_s4  ;;  %3663 = vmatprep.subr.bf16.mxu0 %v3918_v28  ;;  %v6510_v39 = vld [vmem:[#allocation25_spill] sm:$0xff] }
 0x28c   :  { %v970_v50 = vsel %vm6507_vm1, nan, %v969_v63  ;;  %v2491_v53 = vshll.u32 %v2490_v0, 23  ;;  %vm1069_vm13 = vcmp.eq.s32.totalorder %v5726_v9, 2  ;;  %v1070_v49 = vxor.u32 2147483648, %v5021_v58  ;;  %v6511_v0 = vld [vmem:[#allocation29_spill] sm:$0xff] }
 0x28d   :  { %v2373_v13 = vshll.u32 %v2372_v23, 30  ;;  %v2396_v27 = vsub.s32 4, %v2372_v23  ;;  %v1068_v40 = vsel %vm1066_vm14, %v5021_v58, %v1067_v60  ;;  %v2717_v6 = vcombine.high %v2709_v24, %v2709_v24  ;;  %v6512_v60 = vld [vmem:[#allocation32_spill] sm:$0xff] }
 0x28e   :  { %v2492_v61 = vor.u32 4788187, %v2491_v53  ;;  %v2495_v44 = vcvt.s32.f32 %v2488_v30  ;;  %v1071_v37 = vsel %vm1069_vm13, %v1070_v49, %v5026_v48  ;;  %v2747_v51 = vcombine.high %v2725_v8, %v2725_v8  ;;  %3664 = vmatpush3.bf16.msra.mxu0 %v3918_v28 }
 0x28f   :  { %v5884_v26 = vsub.s32 %v2370_v14, %v2373_v13  ;;  %v5888_v54 = vsel %vm6398_vm0, %v2396_v27, %v2372_v23  ;;  %v1072_v17 = vsel %vm1065_vm7, %v1068_v40, %v1071_v37  ;;  %v2739_v2 = vrot.slane %v2717_v6, %v5711_v32  ;;  %3665 = vmatprep.subr.bf16.mxu0 %v3919_v12  ;;  %v6514_v6 = vld [vmem:[#allocation38_spill] sm:$0xff] }
 0x290   :  { %v2493_v58 = vand.u32 2147483647, %v2492_v61  ;;  %v2751_v24 = vcombine.high %v5829_v1, %v5829_v1  ;;  %v1073_v48 = vsel %vm1063_vm9, nan, %v1072_v17  ;;  %v2811_v14 = vrot.slane %v2747_v51, %v4459_v7 }
 0x291   :  { %v2376_v35 = vsub.s32 0, %v5884_v26  ;;  %v2516_v59 = vpack.c.bf16 %v1073_v48, %v970_v50  ;;  %v2807_v46 = vrot.slane %v2739_v2, %v4459_v7  ;;  %v2749_v9 = vcombine.high %v2739_v2, %v2739_v2  ;;  %v6515_v2 = vld [vmem:[#allocation37_spill] sm:$0xff] }
 0x292   :  { %v2496_v8 = vmul.f32 %v2495_v44, %v2493_v58  ;;  %v2399_v28 = vsel %vm5848_vm4, 0, %v5888_v54  ;;  %2868 = vrot.lane.b32.xlu0 %v2811_v14, %s4230_s4  ;;  %v2716_v22 = vrot.slane %v2702_v55, %v5711_v32  ;;  %vm1169_vm9 = vcmp.eq.s32.totalorder %v4743_v52, 0  ;;  %3666 = vmatpush3.bf16.msra.mxu0 %v3919_v12 }
 0x293   :  { %v3566_v10 = vmin.u32 %v2376_v35, %v5884_v26  ;;  %vm6508_vm7 = vcmask 523264   ;;  %2866 = vrot.lane.b32.xlu1 %v2807_v46, %s4230_s4  ;;  %vm1168_vm14 = vcmp.lt.s32.totalorder %v4743_v52, 2  ;;  %v1170_v41 = vxor.u32 2147483648, %v6509_v5  ;;  %3667 = vmatprep.subr.bf16.mxu0 %v3920_v11 }
 0x294   :  { %3669 = vmatprep.mubr.msk.bf16.mxu0 %vm6508_vm7, %v2516_v59  ;;  %vm1172_vm13 = vcmp.eq.s32.totalorder %v4743_v52, 2  ;;  %v2497_v16 = vxor.u32 2147483648, %v2496_v8  ;;  %v2732_v55 = vrot.slane %v2716_v22, %v5711_v32  ;;  %v2718_v34 = vcombine.high %v2716_v22, %v2716_v22 }
 0x295   :  { %v1173_v21 = vxor.u32 2147483648, %v6511_v0  ;;  %v2378_v63 = vclz %v3566_v10  ;;  %v2815_v23 = vrot.slane %v2749_v9, %v4459_v7  ;;  %v1171_v50 = vsel %vm1169_vm9, %v6511_v0, %v1170_v41  ;;  %v6520_v10 = vld [vmem:[#allocation49_spill] sm:$0xff]  ;;  %v6521_v41 = vld [vmem:[#allocation46_spill] sm:$0xff] }
 0x296   :  { %vm1272_vm7 = vcmp.eq.s32.totalorder %v6512_v60, 0  ;;  %vm6513_vm1 = vcmp.lt.s32.totalorder %v5527_v38, 0  ;;  %v2819_v53 = vrot.slane %v2732_v55, %v4459_v7  ;;  %v2746_v49 = vrot.slane %v2718_v34, %v5711_v32  ;;  %3668 = vmatpush3.bf16.msra.mxu0 %v3920_v11  ;;  %v6522_v0 = vld [vmem:[#allocation26_spill] sm:$0xff] }
 0x297   :  { %v2498_v30 = vsel %vm6513_vm1, %v2497_v16, %v2496_v8  ;;  %v2748_v12 = vcombine.high %v2732_v55, %v2732_v55  ;;  %v3567_v27 = vadd.s32 4294967294, %v2378_v63  ;;  %2870 = vrot.lane.b32.xlu1 %v2815_v23, %s4230_s4  ;;  %v1174_v40 = vsel %vm1172_vm13, %v1173_v21, %v6509_v5  ;;  %v6518_v8 = vld [vmem:[#allocation35_spill] sm:$0xff] }
 0x298   :  { %v2501_v13 = vsel %vm5743_vm6, %v5527_v38, %v2498_v30  ;;  %v1273_v61 = vxor.u32 2147483648, %v6514_v6  ;;  %2872 = vrot.lane.b32.xlu0 %v2819_v53, %s4230_s4  ;;  %v2823_v44 = vrot.slane %v2746_v49, %v4459_v7  ;;  %v2750_v37 = vcombine.high %v2746_v49, %v2746_v49 }
 0x299   :  { %3981 = vcosq.f32 %v2501_v13  ;;  %vm1271_vm1 = vcmp.lt.s32.totalorder %v6512_v60, 2  ;;  %vm3568_vm9 = vcmp.lt.s32.totalorder %v3567_v27, 0  ;;  %v2827_v51 = vrot.slane %v2748_v12, %v4459_v7  ;;  %v6525_v12 = vld [vmem:[#allocation33_spill] sm:$0xff] }
 0x29a   :  { %v1175_v17 = vsel %vm1168_vm14, %v1171_v50, %v1174_v40  ;;  %v1274_v58 = vsel %vm1272_vm7, %v6515_v2, %v1273_v61  ;;  %v2381_v48 = vsel %vm3568_vm9, 0, %v3567_v27  ;;  %v2831_v14 = vrot.slane %v2750_v37, %v4459_v7  ;;  %v6527_v40 = vld [vmem:[#allocation45_spill] sm:$0xff] }
 0x29b   :  { %vm6516_vm13 = vweird.f32 %v4485_v15  ;;  %vm1275_vm0 = vcmp.eq.s32.totalorder %v6512_v60, 2  ;;  %v2382_v59 = vsub.s32 32, %v2381_v48  ;;  %v2383_v46 = vshll.u32 %v5884_v26, %v2381_v48  ;;  %2874 = vrot.lane.b32.xlu1 %v2823_v44, %s4230_s4 }
 0x29c   :  { %v1176_v35 = vsel %vm6516_vm13, nan, %v1175_v17  ;;  %v2386_v9 = vsub.s32 4294967266, %v2381_v48  ;;  %v1276_v52 = vxor.u32 2147483648, %v6515_v2  ;;  %2876 = vrot.lane.b32.xlu0 %v2827_v51, %s4230_s4  ;;  %v6519_v22 = vsel %vm5047_vm10, 0, %v6518_v8  ;;  %v6528_v51 = vld [vmem:[#allocation44_spill] sm:$0xff] }
 0x29d   :  { %v1373_v15 = vand.u32 3, %v6519_v22  ;;  %v1376_v5 = vxor.u32 2147483648, %v6520_v10  ;;  %v1379_v16 = vxor.u32 2147483648, %v6521_v41  ;;  %v2384_v26 = vshrl.u32 %v5826_v42, %v2382_v59 }
 0x29e   :  { %v2387_v55 = vadd.s32 127, %v2386_v9  ;;  %v1277_v34 = vsel %vm1275_vm0, %v1276_v52, %v6514_v6  ;;  %vm1475_vm7 = vweird.f32 %v6522_v0  ;;  %vm6523_vm10 = vweird.f32 %v6510_v39  ;;  %v6532_v9 = vld [vmem:[#allocation48_spill] sm:$0xff] }
 0x29f   :  { %v1278_v21 = vsel %vm1271_vm1, %v1274_v58, %v1277_v34  ;;  %vm1374_vm9 = vcmp.lt.s32.totalorder %v1373_v15, 2  ;;  %vm1375_vm13 = vcmp.eq.s32.totalorder %v1373_v15, 0  ;;  %vm1378_vm14 = vcmp.eq.s32.totalorder %v1373_v15, 2  ;;  %2878 = vrot.lane.b32.xlu1 %v2831_v14, %s4230_s4 }
 0x2a0   :  { %v2385_v63 = vor.u32 %v2384_v26, %v2383_v46  ;;  %v2388_v23 = vshll.u32 %v2387_v55, 23  ;;  %v1279_v50 = vsel %vm6523_vm10, nan, %v1278_v21  ;;  %v1377_v42 = vsel %vm1375_vm13, %v6521_v41, %v1376_v5  ;;  %v6537_v21 = vld [vmem:[#allocation56_spill] sm:$0xff] }
 0x2a1   :  { %v2517_v30 = vpack.c.bf16 %v1279_v50, %v1176_v35  ;;  %v1380_v53 = vsel %vm1378_vm14, %v1379_v16, %v6520_v10  ;;  %v6526_v60 = vsel %vm4936_vm15, 0, %v6525_v12  ;;  %v1479_v6 = vxor.u32 2147483648, %v6527_v40  ;;  %v6535_v16 = vld [vmem:[#allocation28_spill] sm:$0xff]  ;;  %v6539_v50 = vld [vmem:[#allocation41_spill] sm:$0xff] }
 0x2a2   :  { %v1476_v27 = vand.u32 3, %v6526_v60  ;;  %v2389_v61 = vor.u32 4788187, %v2388_v23  ;;  %v2392_v44 = vcvt.s32.f32 %v2385_v63  ;;  %v1381_v37 = vsel %vm1374_vm9, %v1377_v42, %v1380_v53  ;;  %v6542_v60 = vld [vmem:[#allocation27_spill] sm:$0xff] }
 0x2a3   :  { %v1482_v17 = vxor.u32 2147483648, %v6528_v51  ;;  %v5975_v2 = vpop.eup %3981  ;;  %vm6529_vm0 = vcmask 523264   ;;  %vm6530_vm1 = vweird.f32 %v4725_v62  ;;  %v2758_v35 = vrot.slane %v5829_v1, %v5711_v32  ;;  %v6534_v62 = vld [vmem:[#allocation57_spill] sm:$0xff]  ;;  %v6555_v23 = vld [vmem:[#allocation59_spill] sm:$0xff] }
 0x2a4   :  { %3670 = vmatmul.mubr.msk.bf16.vlgmr.msra.gmra.mrb[8].mxu0 %vm6529_vm0, %v2517_v30  ;;  %v1382_v39 = vsel %vm6530_vm1, nan, %v1381_v37  ;;  %vm1477_vm14 = vcmp.lt.s32.totalorder %v1476_v27, 2  ;;  %vm1478_vm13 = vcmp.eq.s32.totalorder %v1476_v27, 0  ;;  %vm1481_vm10 = vcmp.eq.s32.totalorder %v1476_v27, 2 }
 0x2a5   :  { %v2390_v58 = vand.u32 2147483647, %v2389_v61  ;;  %v1480_v48 = vsel %vm1478_vm13, %v6528_v51, %v1479_v6  ;;  %v1483_v14 = vsel %vm1481_vm10, %v1482_v17, %v6527_v40  ;;  %3983 = vsinq.f32 %v2501_v13  ;;  %v6544_v17 = vld [vmem:[#allocation50_spill] sm:$0xff] }
 0x2a6   :  { %v1484_v59 = vsel %vm1477_vm14, %v1480_v48, %v1483_v14  ;;  %v6533_v52 = vsel %vm5189_vm3, 0, %v6532_v9  ;;  %v1582_v8 = vxor.u32 2147483648, %v6534_v62  ;;  %v2774_v10 = vrot.slane %v2758_v35, %v5711_v32  ;;  %v6548_v9 = vld [vmem:[#allocation65_spill] sm:$0xff] }
 0x2a7   :  { %v1579_v11 = vand.u32 3, %v6533_v52  ;;  %v2393_v22 = vmul.f32 %v2392_v44, %v2390_v58  ;;  %v1485_v15 = vsel %vm1475_vm7, nan, %v1484_v59  ;;  %v2766_v5 = vcombine.high %v2758_v35, %v2758_v35  ;;  %v6543_v44 = vld [vmem:[#allocation55_spill] sm:$0xff]  ;;  %v6546_v35 = vld [vmem:[#allocation54_spill] sm:$0xff] }
 0x2a8   :  { %v2518_v41 = vpack.c.bf16 %v1485_v15, %v1382_v39  ;;  %vm1578_vm15 = vweird.f32 %v6535_v16  ;;  %v2835_v26 = vrot.slane %v2774_v10, %v4459_v7  ;;  %v2796_v34 = vcombine.high %v2774_v10, %v2774_v10 }
 0x2a9   :  { %vm1581_vm9 = vcmp.eq.s32.totalorder %v1579_v11, 0  ;;  %vm1584_vm0 = vcmp.eq.s32.totalorder %v1579_v11, 2  ;;  %v2394_v13 = vxor.u32 2147483648, %v2393_v22  ;;  %v2788_v55 = vrot.slane %v2766_v5, %v5711_v32  ;;  %v6552_v5 = vld [vmem:[#allocation53_spill] sm:$0xff] }
 0x2aa   :  { %vm6536_vm3 = vcmask 523264   ;;  %vm1580_vm1 = vcmp.lt.s32.totalorder %v1579_v11, 2  ;;  %v1583_v0 = vsel %vm1581_vm9, %v6537_v21, %v1582_v8  ;;  %v1585_v63 = vxor.u32 2147483648, %v6537_v21  ;;  %2880 = vrot.lane.b32.xlu0 %v2835_v26, %s4230_s4  ;;  %v6549_v8 = vld [vmem:[#allocation36_spill] sm:$0xff]  ;;  %v6554_v21 = vld [vmem:[#allocation34_spill] sm:$0xff] }
 0x2ab   :  { %3673 = vmatprep.mubr.msk.bf16.mxu0 %vm6536_vm3, %v2518_v41  ;;  %v6540_v42 = vsel %vm5057_vm11, 0, %v6539_v50  ;;  %vm6541_vm7 = vcmp.lt.s32.totalorder %v5536_v47, 0  ;;  %v2839_v49 = vrot.slane %v2788_v55, %v4459_v7  ;;  %v2798_v12 = vcombine.high %v2788_v55, %v2788_v55 }
 0x2ac   :  { %v1682_v30 = vand.u32 3, %v6540_v42  ;;  %v2395_v53 = vsel %vm6541_vm7, %v2394_v13, %v2393_v22  ;;  %vm1681_vm14 = vweird.f32 %v6542_v60  ;;  %v2843_v40 = vrot.slane %v2796_v34, %v4459_v7  ;;  %v6550_v22 = vld [vmem:[#allocation64_spill] sm:$0xff]  ;;  %v6556_v42 = vld [vmem:[#allocation58_spill] sm:$0xff]  ;;  %v6558_v60 = vld [vmem:[#allocation61_spill] sm:$0xff] }
 0x2ad   :  { %v2398_v27 = vsel %vm5848_vm4, %v5536_v47, %v2395_v53  ;;  %v1586_v6 = vsel %vm1584_vm0, %v1585_v63, %v6534_v62  ;;  %2882 = vrot.lane.b32.xlu1 %v2839_v49, %s4230_s4  ;;  %v1685_v37 = vxor.u32 2147483648, %v6543_v44  ;;  %v2847_v51 = vrot.slane %v2798_v12, %v4459_v7 }
 0x2ae   :  { %vm1684_vm11 = vcmp.eq.s32.totalorder %v1682_v30, 0  ;;  %3985 = vcosq.f32 %v2398_v27  ;;  %v1587_v61 = vsel %vm1580_vm1, %v1583_v0, %v1586_v6  ;;  %vm1683_vm13 = vcmp.lt.s32.totalorder %v1682_v30, 2  ;;  %2884 = vrot.lane.b32.xlu0 %v2843_v40, %s4230_s4 }
 0x2af   :  { %3987 = vsinq.f32 %v2398_v27  ;;  %vm1687_vm10 = vcmp.eq.s32.totalorder %v1682_v30, 2  ;;  %v1688_v39 = vxor.u32 2147483648, %v6544_v17  ;;  %v1588_v58 = vsel %vm1578_vm15, nan, %v1587_v61  ;;  %v6026_v11 = vpop.eup %3983  ;;  %v6560_v27 = vld [vmem:[#allocation63_spill] sm:$0xff]  ;;  %v6562_v61 = vld [vmem:[#allocation70_spill] sm:$0xff] }
 0x2b0   :  { %v1686_v48 = vsel %vm1684_vm11, %v6544_v17, %v1685_v37  ;;  %v6547_v59 = vsel %vm5300_vm8, 0, %v6546_v35  ;;  %v1788_v52 = vxor.u32 2147483648, %v6548_v9  ;;  %vm1784_vm9 = vweird.f32 %v6549_v8 }
 0x2b1   :  { %v1785_v46 = vand.u32 3, %v6547_v59  ;;  %v1689_v62 = vsel %vm1687_vm10, %v1688_v39, %v6543_v44  ;;  %v1791_v15 = vxor.u32 2147483648, %v6550_v22  ;;  %v6553_v41 = vsel %vm5281_vm2, 0, %v6552_v5  ;;  %2886 = vrot.lane.b32.xlu1 %v2847_v51, %s4230_s4  ;;  %v6565_v5 = vld [vmem:[#allocation42_spill] sm:$0xff] }
 0x2b2   :  { %v1888_v16 = vand.u32 3, %v6553_v41  ;;  %v1690_v13 = vsel %vm1683_vm13, %v1686_v48, %v1689_v62  ;;  %vm1887_vm3 = vweird.f32 %v6554_v21  ;;  %v1891_v50 = vxor.u32 2147483648, %v6555_v23  ;;  %v6567_v41 = vld [vmem:[#allocation60_spill] sm:$0xff]  ;;  %v6572_v21 = vld [vmem:[#allocation66_spill] sm:$0xff] }
 0x2b3   :  { %vm1786_vm8 = vcmp.lt.s32.totalorder %v1785_v46, 2  ;;  %vm1787_vm15 = vcmp.eq.s32.totalorder %v1785_v46, 0  ;;  %vm1790_vm0 = vcmp.eq.s32.totalorder %v1785_v46, 2  ;;  %v1691_v26 = vsel %vm1681_vm14, nan, %v1690_v13 }
 0x2b4   :  { %v1789_v55 = vsel %vm1787_vm15, %v6550_v22, %v1788_v52  ;;  %v1792_v34 = vsel %vm1790_vm0, %v1791_v15, %v6548_v9  ;;  %v2519_v0 = vpack.c.bf16 %v1691_v26, %v1588_v58  ;;  %vm1890_vm2 = vcmp.eq.s32.totalorder %v1888_v16, 0  ;;  %v6564_v52 = vld [vmem:[#allocation43_spill] sm:$0xff] }
 0x2b5   :  { %v1793_v63 = vsel %vm1786_vm8, %v1789_v55, %v1792_v34  ;;  %vm1889_vm1 = vcmp.lt.s32.totalorder %v1888_v16, 2  ;;  %vm1893_vm7 = vcmp.eq.s32.totalorder %v1888_v16, 2  ;;  %v1894_v30 = vxor.u32 2147483648, %v6556_v42  ;;  %v6569_v16 = vld [vmem:[#allocation62_spill] sm:$0xff]  ;;  %v6571_v55 = vld [vmem:[#allocation67_spill] sm:$0xff] }
 0x2b6   :  { %v2765_v53 = vrot.slane %v2751_v24, %v5711_v32  ;;  %vm6557_vm14 = vcmask 523264   ;;  %v1794_v49 = vsel %vm1784_vm9, nan, %v1793_v63  ;;  %v1892_v12 = vsel %vm1890_vm2, %v6556_v42, %v1891_v50  ;;  %v6563_v24 = vld [vmem:[#allocation69_spill] sm:$0xff] }
 0x2b7   :  { %3674 = vmatmul.mubr.msk.bf16.gmra.mrb[12].mxu0 %vm6557_vm14, %v2519_v0  ;;  %vm6559_vm11 = vnez %v6558_v60  ;;  %v1994_v44 = vxor.u32 2147483648, %v6562_v61  ;;  %v1895_v37 = vsel %vm1893_vm7, %v1894_v30, %v6555_v23  ;;  %v1997_v17 = vxor.u32 2147483648, %v6563_v24  ;;  %vm6566_vm0 = vmmov %vm6557_vm14 }
 0x2b8   :  { %v6561_v40 = vsel %vm6559_vm11, 0, %v6560_v27  ;;  %v2781_v51 = vrot.slane %v2765_v53, %v5711_v32  ;;  %v2767_v1 = vcombine.high %v2765_v53, %v2765_v53  ;;  %v6060_v39 = vpop.eup %3985  ;;  %v1896_v58 = vsel %vm1889_vm1, %v1892_v12, %v1895_v37  ;;  %v6574_v27 = vld [vmem:[#allocation68_spill] sm:$0xff] }
 0x2b9   :  { %v1991_v6 = vand.u32 3, %v6561_v40  ;;  %v6062_v48 = vpop.eup %3987  ;;  %v1897_v14 = vsel %vm1887_vm3, nan, %v1896_v58  ;;  %vm1990_vm8 = vweird.f32 %v6564_v52  ;;  %vm2093_vm15 = vweird.f32 %v6565_v5 }
 0x2ba   :  { %v2851_v35 = vrot.slane %v2781_v51, %v4459_v7  ;;  %v2795_v59 = vrot.slane %v2767_v1, %v5711_v32  ;;  %v2797_v46 = vcombine.high %v2781_v51, %v2781_v51  ;;  %v2520_v9 = vpack.c.bf16 %v1897_v14, %v1794_v49 }
 0x2bb   :  { %vm1992_vm13 = vcmp.lt.s32.totalorder %v1991_v6, 2  ;;  %vm1993_vm10 = vcmp.eq.s32.totalorder %v1991_v6, 0  ;;  %vm1996_vm9 = vcmp.eq.s32.totalorder %v1991_v6, 2  ;;  %vm6568_vm3 = vnez %v6567_v41 }
 0x2bc   :  { %v1995_v62 = vsel %vm1993_vm10, %v6563_v24, %v1994_v44  ;;  %v1998_v8 = vsel %vm1996_vm9, %v1997_v17, %v6562_v61  ;;  %2888 = vrot.lane.b32.xlu0 %v2851_v35, %s4230_s4  ;;  %v2855_v22 = vrot.slane %v2795_v59, %v4459_v7  ;;  %v2799_v15 = vcombine.high %v2795_v59, %v2795_v59  ;;  %v3921_v35 = vld [vmem:[#allocation15] sm:$0xff]   ;;  %v3922_v59 = vld [vmem:[#allocation15 + $0x8] sm:$0xff]  }
 0x2bd   :  { %v1999_v10 = vsel %vm1992_vm13, %v1995_v62, %v1998_v8  ;;  %3677 = vmatprep.mubr.msk.bf16.mxu0 %vm6566_vm0, %v2520_v9  ;;  %v2859_v32 = vrot.slane %v2797_v46, %v4459_v7  ;;  %v6570_v13 = vsel %vm6568_vm3, 0, %v6569_v16  ;;  %v2097_v34 = vxor.u32 2147483648, %v6571_v55  ;;  %3685 = vmatprep.subr.bf16.mxu1 %v3921_v35  ;;  %v3923_v46 = vld [vmem:[#allocation15 + $0x10] sm:$0xff]  }
 0x2be   :  { %v2094_v26 = vand.u32 3, %v6570_v13  ;;  %v2100_v0 = vxor.u32 2147483648, %v6572_v21  ;;  %2890 = vrot.lane.b32.xlu1 %v2855_v22, %s4230_s4  ;;  %v2863_v63 = vrot.slane %v2799_v15, %v4459_v7  ;;  %v2000_v23 = vsel %vm1990_vm8, nan, %v1999_v10  ;;  %3686 = vmatpush3.bf16.msra.mxu1 %v3921_v35  ;;  %v6136_v15 = vld [vmem:[%s6314_s9] ss:$0 sm:$0xff] }
 0x2bf   :  { %v6573_v50 = vsel %vm5662_vm5, 0, %v5679_v36  ;;  %v2200_v30 = vxor.u32 2147483648, %v5873_v31  ;;  %v2203_v53 = vxor.u32 2147483648, %v5866_v29  ;;  %vm2196_vm13 = vweird.f32 %v5409_v33  ;;  %3687 = vmatprep.subr.bf16.mxu1 %v3922_v59 }
 0x2c0   :  { %v2197_v42 = vand.u32 3, %v6573_v50  ;;  %vm2095_vm2 = vcmp.lt.s32.totalorder %v2094_v26, 2  ;;  %vm2096_vm1 = vcmp.eq.s32.totalorder %v2094_v26, 0  ;;  %vm2099_vm7 = vcmp.eq.s32.totalorder %v2094_v26, 2  ;;  %2892 = vrot.lane.b32.xlu0 %v2859_v32, %s4230_s4 }
 0x2c1   :  { %v2098_v49 = vsel %vm2096_vm1, %v6572_v21, %v2097_v34  ;;  %v2101_v12 = vsel %vm2099_vm7, %v2100_v0, %v6571_v55  ;;  %v6575_v40 = vsel %vm5583_vm12, 0, %v6574_v27  ;;  %v2303_v61 = vxor.u32 2147483648, %v5755_v19 }
 0x2c2   :  { %vm2198_vm14 = vcmp.lt.s32.totalorder %v2197_v42, 2  ;;  %vm2199_vm11 = vcmp.eq.s32.totalorder %v2197_v42, 0  ;;  %v2102_v7 = vsel %vm2095_vm2, %v2098_v49, %v2101_v12  ;;  %vm2202_vm5 = vcmp.eq.s32.totalorder %v2197_v42, 2  ;;  %2894 = vrot.lane.b32.xlu1 %v2863_v63, %s4230_s4  ;;  %3688 = vmatpush3.bf16.msra.mxu1 %v3922_v59 }
 0x2c3   :  { %v2201_v57 = vsel %vm2199_vm11, %v5866_v29, %v2200_v30  ;;  %v2103_v36 = vsel %vm2093_vm15, nan, %v2102_v7  ;;  %v2204_v60 = vsel %vm2202_vm5, %v2203_v53, %v5873_v31  ;;  %v2300_v6 = vand.u32 3, %v6575_v40  ;;  %3689 = vmatprep.subr.bf16.mxu1 %v3923_v46 }
 0x2c4   :  { %v2521_v44 = vpack.c.bf16 %v2103_v36, %v2000_v23  ;;  %v2205_v37 = vsel %vm2198_vm14, %v2201_v57, %v2204_v60  ;;  %vm2299_vm10 = vweird.f32 %v5332_v4  ;;  %v2306_v33 = vxor.u32 2147483648, %v5750_v43 }
 0x2c5   :  { %v2206_v29 = vsel %vm2196_vm13, nan, %v2205_v37  ;;  %vm2301_vm9 = vcmp.lt.s32.totalorder %v2300_v6, 2  ;;  %vm2302_vm8 = vcmp.eq.s32.totalorder %v2300_v6, 0  ;;  %vm2305_vm0 = vcmp.eq.s32.totalorder %v2300_v6, 2 }
 0x2c6   :  { %vm6576_vm15 = vcmask 523264   ;;  %v2304_v31 = vsel %vm2302_vm8, %v5750_v43, %v2303_v61  ;;  %v2307_v56 = vsel %vm2305_vm0, %v2306_v33, %v5755_v19  ;;  %v2403_v51 = vand.u32 3, %v2399_v28  ;;  %3690 = vmatpush3.bf16.msra.mxu1 %v3923_v46 }
 0x2c7   :  { %3678 = vmatmul.mubr.msk.bf16.gmra.mrb[16].mxu0 %vm6576_vm15, %v2521_v44  ;;  %v2406_v1 = vxor.u32 2147483648, %v6062_v48  ;;  %v2308_v4 = vsel %vm2301_vm9, %v2304_v31, %v2307_v56  ;;  %v2409_v24 = vxor.u32 2147483648, %v6060_v39  ;;  %v2506_v17 = vand.u32 3, %v2502_v20  ;;  %vm6577_vm14 = vmmov %vm6576_vm15 }
 0x2c8   :  { %v2309_v58 = vsel %vm2299_vm10, nan, %v2308_v4  ;;  %vm2404_vm12 = vcmp.lt.s32.totalorder %v2403_v51, 2  ;;  %vm2405_vm3 = vcmp.eq.s32.totalorder %v2403_v51, 0  ;;  %vm2408_vm2 = vcmp.eq.s32.totalorder %v2403_v51, 2  ;;  %vm6578_vm13 = vmmov %vm6577_vm14 }
 0x2c9   :  { %v2522_v43 = vpack.c.bf16 %v2309_v58, %v2206_v29  ;;  %vm2402_vm1 = vweird.f32 %v5536_v47  ;;  %v2407_v19 = vsel %vm2405_vm3, %v6060_v39, %v2406_v1  ;;  %v2410_v18 = vsel %vm2408_vm2, %v2409_v24, %v6062_v48  ;;  %vm6579_vm5 = vmmov %vm6578_vm13 }
 0x2ca   :  { %v2411_v54 = vsel %vm2404_vm12, %v2407_v19, %v2410_v18  ;;  %vm2508_vm4 = vcmp.eq.s32.totalorder %v2506_v17, 0  ;;  %v2509_v28 = vxor.u32 2147483648, %v6026_v11  ;;  %vm2511_vm7 = vcmp.eq.s32.totalorder %v2506_v17, 2  ;;  %vm6580_vm10 = vmmov %vm6579_vm5 }
 0x2cb   :  { %3681 = vmatprep.mubr.msk.bf16.mxu0 %vm6577_vm14, %v2522_v43  ;;  %vm2507_vm6 = vcmp.lt.s32.totalorder %v2506_v17, 2  ;;  %v2512_v25 = vxor.u32 2147483648, %v5975_v2  ;;  %vm2505_vm11 = vweird.f32 %v5527_v38  ;;  %v2412_v20 = vsel %vm2402_vm1, nan, %v2411_v54  ;;  %v3924_v38 = vld [vmem:[#allocation15 + $0x18] sm:$0xff]   ;;  %vm6581_vm9 = vmmov %vm6579_vm5 }
 0x2cc   :  { %v2510_v45 = vsel %vm2508_vm4, %v5975_v2, %v2509_v28  ;;  %3691 = vmatprep.subr.bf16.mxu1 %v3924_v38  ;;  %v3600_v2 = vld [vmem:[#allocation2] ss:$0 sm:$0xff]  ;;  %vm6582_vm8 = vmmov %vm6579_vm5 }
 0x2cd   :  { %v2513_v47 = vsel %vm2511_vm7, %v2512_v25, %v6026_v11  ;;  %3692 = vmatpush3.bf16.msra.mxu1 %v3924_v38  ;;  %3190 = vperm.xlu1 %3839, %v3600_v2   ;;  %vm6583_vm0 = vmmov %vm6579_vm5 }
 0x2ce   :  { %v2514_v39 = vsel %vm2507_vm6, %v2510_v45, %v2513_v47  ;;  %vm6584_vm15 = vmmov %vm6583_vm0 }
 0x2cf   :  { %v2515_v14 = vsel %vm2505_vm11, nan, %v2514_v39  ;;  %vm6585_vm12 = vmmov %vm6583_vm0 }
 0x2d0   :  { %v2523_v48 = vpack.c.bf16 %v2515_v14, %v2412_v20  ;;  %vm6586_vm3 = vmmov %vm6583_vm0 }
 0x2d1   :  { %vm6587_vm2 = vmmov %vm6583_vm0 }
 0x2d2   :  { %3682 = vmatmul.mubr.msk.bf16.gmra.mrb[20].mxu0 %vm6578_vm13, %v2523_v48  ;;  %vm6588_vm1 = vmmov %vm6583_vm0 }
 0x2d3   :  { %vm6589_vm4 = vmmov %vm6583_vm0 }
 0x2d4   :  { %vm6590_vm7 = vmmov %vm6583_vm0 }
 0x2d5   :  { %vm6591_vm14 = vmmov %vm6583_vm0 }
 0x2d6   :  { %vm6592_vm6 = vmmov %vm6583_vm0 }
 0x2d7   :  { %vm6593_vm11 = vmmov %vm6583_vm0 }
 0x2d8   :  { %vm6594_vm13 = vmmov %vm6583_vm0 }
 0x2fd   :  { %v2865_v10 = vpop.permute.xlu0 %2864 }
 0x304   :  { %v2869_v50 = vpop.permute.xlu0 %2868 }
 0x305   :  { %v2867_v5 = vpop.permute.xlu1 %2866 }
 0x309   :  { %v2871_v42 = vpop.permute.xlu1 %2870 }
 0x30a   :  { %v2873_v60 = vpop.permute.xlu0 %2872 }
 0x30d   :  { %v2875_v27 = vpop.permute.xlu1 %2874 }
 0x30e   :  { %v2877_v4 = vpop.permute.xlu0 %2876 }
 0x311   :  { %v2879_v24 = vpop.permute.xlu1 %2878 }
 0x31c   :  { %v2881_v25 = vpop.permute.xlu0 %2880 }
 0x31f   :  { %v2883_v45 = vpop.permute.xlu1 %2882 }
 0x35c   :  { %v3619_v11 = vpop.f32.mrb[4].mxu0 }
 0x35d   :  { %v3620_v9 = vpop.f32.mrb[5].mxu0 }
 0x35e   :  { %v6129_v52 = vadd.f32 %v3620_v9, %v3619_v11  ;;  %v3622_v62 = vpop.f32.mrb[6].mxu0  ;;  %v2885_v11 = vpop.permute.xlu0 %2884 }
 0x35f   :  { %v3623_v8 = vpop.f32.mrb[7].mxu0 }
 0x360   :  { %v6131_v22 = vadd.f32 %v3623_v8, %v3622_v62  ;;  %v2887_v62 = vpop.permute.xlu1 %2886 }
 0x377   :  { %v3671_v32 = vpop.f32.mrb[8].mxu0 }
 0x378   :  { %v2630_v41 = vadd.f32 %v3671_v32, %v6136_v15  ;;  %v2621_v16 = vpop.f32.mrb[9].mxu0 }
 0x379   :  { %v2622_v13 = vadd.f32 %v6136_v15, %v2621_v16  ;;  %v3672_v26 = vpop.f32.mrb[10].mxu0 }
 0x37a   :  { %v2686_v55 = vmax.f32 %v2630_v41, 0.0  ;;  %v2633_v34 = vadd.f32 %v3672_v26, %v6136_v15  ;;  %v2624_v21 = vpop.f32.mrb[11].mxu0  ;;  %v2889_v26 = vpop.permute.xlu0 %2888 }
 0x37b   :  { %v2684_v0 = vmax.f32 %v2622_v13, 0.0  ;;  %v2625_v63 = vadd.f32 %v6136_v15, %v2624_v21 }
 0x37c   :  { %v2687_v23 = vmax.f32 %v2633_v34, 0.0  ;;  %v2914_v53 = vmul.f32 %v2869_v50, %v2686_v55  ;;  %v2891_v55 = vpop.permute.xlu1 %2890 }
 0x37d   :  { %v2685_v30 = vmax.f32 %v2625_v63, 0.0  ;;  %v2912_v12 = vmul.f32 %v2865_v10, %v2684_v0 }
 0x37e   :  { %v2915_v49 = vmul.f32 %v2871_v42, %v2687_v23 }
 0x37f   :  { %v2913_v7 = vmul.f32 %v2867_v5, %v2685_v30 }
 0x380   :  { %v2929_v57 = vpack.c.bf16 %v2915_v49, %v2914_v53 }
 0x381   :  { %v2928_v36 = vpack.c.bf16 %v2913_v7, %v2912_v12  ;;  %v2893_v7 = vpop.permute.xlu0 %2892 }
 0x383   :  { %3693 = vmatprep.mubr.msk.bf16.mxu1 %vm6579_vm5, %v2928_v36  ;;  %vm6595_vm5 = vmmov %vm6583_vm0 }
 0x384   :  { %3694 = vmatmul.mubr.msk.bf16.vlgmr.msra.gmra.mrb[4].mxu1 %vm6580_vm10, %v2929_v57  ;;  %v2895_v57 = vpop.permute.xlu1 %2894  ;;  %vm6596_vm10 = vmmov %vm6583_vm0 }
 0x38a   :  { %v3675_v40 = vpop.f32.mrb[12].mxu0 }
 0x38b   :  { %v2646_v6 = vadd.f32 %v3675_v40, %v6136_v15  ;;  %v2637_v61 = vpop.f32.mrb[13].mxu0 }
 0x38c   :  { %v2638_v44 = vadd.f32 %v6136_v15, %v2637_v61  ;;  %v3676_v37 = vpop.f32.mrb[14].mxu0 }
 0x38d   :  { %v2690_v33 = vmax.f32 %v2646_v6, 0.0  ;;  %v2649_v29 = vadd.f32 %v3676_v37, %v6136_v15  ;;  %v2640_v31 = vpop.f32.mrb[15].mxu0  ;;  %v6165_v37 = vld [vmem:[%s6316_s11] ss:$0 sm:$0xff]  ;;  %s4246_s11 = smov 32  }
 0x38e   :  { %v2688_v56 = vmax.f32 %v2638_v44, 0.0  ;;  %v2641_v51 = vadd.f32 %v6136_v15, %v2640_v31 }
 0x38f   :  { %v2691_v1 = vmax.f32 %v2649_v29, 0.0  ;;  %v2918_v58 = vmul.f32 %v2877_v4, %v2690_v33 }
 0x390   :  { %v2689_v17 = vmax.f32 %v2641_v51, 0.0  ;;  %v2916_v19 = vmul.f32 %v2873_v60, %v2688_v56  ;;  %v6172_v51 = vld [vmem:[%s6317_s12] ss:$0 sm:$0xff]  ;;  %s4247_s12 = smov [#allocation18]  }
 0x391   :  { %v2919_v43 = vmul.f32 %v2879_v24, %v2691_v1  ;;  %s3434_s26 = sshll.u32 %s4247_s12, 4  ;;  %s3435_s26 = int_to_ptr.vmem [resolvable:$true] %s3434_s26 }
 0x392   :  { %v2917_v18 = vmul.f32 %v2875_v27, %v2689_v17  ;;  %s4191_s20 = scalar_lea.vmem %s3435_s26, 256  ;;  %p4196_p3 = scmp.lt.s32.totalorder %s3435_s26, %s3435_s26 }
 0x393   :  { %v2931_v54 = vpack.c.bf16 %v2919_v43, %v2918_v58  ;;  %p4192_p2 = scmp.ne.s32.totalorder %s3435_s26, %s4191_s20  ;;  %p4197_p4 = scmp.lt.s32.totalorder %s4191_s20, %s4191_s20 }
 0x394   :  { %v2930_v28 = vpack.c.bf16 %v2917_v18, %v2916_v19 }
 0x395   :  { %p4198_p5 = por %p4197_p4, %p4196_p3 }
 0x396   :  { %3697 = vmatprep.mubr.msk.bf16.mxu1 %vm6581_vm9, %v2930_v28  ;;  %vm6597_vm9 = vmmov %vm6583_vm0 }
 0x397   :  { %3698 = vmatmul.mubr.msk.bf16.gmra.mrb[8].mxu1 %vm6582_vm8, %v2931_v54  ;;  %vm6598_vm8 = vmmov %vm6583_vm0  ;;  %p4199_p6 = pnand %p4198_p5, %p4192_p2 }
 0x39a   :  { %v3679_v20 = vpop.f32.mrb[16].mxu0 }
 0x39b   :  { %v2662_v47 = vadd.f32 %v3679_v20, %v6136_v15  ;;  %v2653_v39 = vpop.f32.mrb[17].mxu0 }
 0x39c   :  { %v2654_v14 = vadd.f32 %v6136_v15, %v2653_v39  ;;  %v3680_v48 = vpop.f32.mrb[18].mxu0 }
 0x39d   :  { %v2694_v35 = vmax.f32 %v2662_v47, 0.0  ;;  %v2665_v59 = vadd.f32 %v3680_v48, %v6136_v15  ;;  %v2656_v46 = vpop.f32.mrb[19].mxu0 }
 0x39e   :  { %v2692_v38 = vmax.f32 %v2654_v14, 0.0  ;;  %v2657_v2 = vadd.f32 %v6136_v15, %v2656_v46 }
 0x39f   :  { %v2695_v9 = vmax.f32 %v2665_v59, 0.0  ;;  %v2922_v10 = vmul.f32 %v2885_v11, %v2694_v35 }
 0x3a0   :  { %v2693_v8 = vmax.f32 %v2657_v2, 0.0  ;;  %v2920_v32 = vmul.f32 %v2881_v25, %v2692_v38 }
 0x3a1   :  { %v2923_v5 = vmul.f32 %v2887_v62, %v2695_v9 }
 0x3a2   :  { %v2921_v41 = vmul.f32 %v2883_v45, %v2693_v8 }
 0x3a3   :  { %v2933_v16 = vpack.c.bf16 %v2923_v5, %v2922_v10 }
 0x3a4   :  { %v2932_v13 = vpack.c.bf16 %v2921_v41, %v2920_v32 }
 0x3a5   :  { %v3683_v34 = vpop.f32.mrb[20].mxu0 }
 0x3a6   :  { %3701 = vmatprep.mubr.msk.bf16.mxu1 %vm6583_vm0, %v2932_v13  ;;  %v2678_v21 = vadd.f32 %v3683_v34, %v6136_v15  ;;  %v2669_v0 = vpop.f32.mrb[21].mxu0 }
 0x3a7   :  { %3702 = vmatmul.mubr.msk.bf16.gmra.mrb[12].mxu1 %vm6584_vm15, %v2933_v16  ;;  %v2670_v63 = vadd.f32 %v6136_v15, %v2669_v0  ;;  %v3684_v23 = vpop.f32.mrb[22].mxu0  ;;  %vm6599_vm15 = vmmov %vm6583_vm0 }
 0x3a8   :  { %v2698_v50 = vmax.f32 %v2678_v21, 0.0  ;;  %v2681_v42 = vadd.f32 %v3684_v23, %v6136_v15  ;;  %v2672_v30 = vpop.f32.mrb[23].mxu0 }
 0x3a9   :  { %v2696_v53 = vmax.f32 %v2670_v63, 0.0  ;;  %v2673_v49 = vadd.f32 %v6136_v15, %v2672_v30 }
 0x3aa   :  { %v2699_v12 = vmax.f32 %v2681_v42, 0.0  ;;  %v2926_v60 = vmul.f32 %v2893_v7, %v2698_v50 }
 0x3ab   :  { %v2697_v36 = vmax.f32 %v2673_v49, 0.0  ;;  %v2924_v40 = vmul.f32 %v2889_v26, %v2696_v53 }
 0x3ac   :  { %v2927_v27 = vmul.f32 %v2895_v57, %v2699_v12 }
 0x3ad   :  { %v2925_v6 = vmul.f32 %v2891_v55, %v2697_v36 }
 0x3ae   :  { %v2935_v61 = vpack.c.bf16 %v2927_v27, %v2926_v60 }
 0x3af   :  { %v2934_v44 = vpack.c.bf16 %v2925_v6, %v2924_v40 }
 0x3b1   :  { %3705 = vmatprep.mubr.msk.bf16.mxu1 %vm6585_vm12, %v2934_v44  ;;  %v3336_v44 = vld [vmem:[#allocation17 + $0x8] sm:$0xff]  ;;  %vm6600_vm12 = vmmov %vm6583_vm0 }
 0x3b2   :  { %3706 = vmatmul.mubr.msk.bf16.gmra.mrb[16].mxu1 %vm6586_vm3, %v2935_v61  ;;  %v3335_v61 = vld [vmem:[#allocation17] sm:$0xff]  ;;  %vm6601_vm3 = vmmov %vm6583_vm0 }
 0x457   :  { %v3695_v15 = vpop.f32.mrb[4].mxu1 }
 0x458   :  { %v3042_v33 = vadd.f32 %v3695_v15, %v6165_v37  ;;  %v3033_v29 = vpop.f32.mrb[5].mxu1 }
 0x459   :  { %v3034_v31 = vadd.f32 %v6165_v37, %v3033_v29  ;;  %v3696_v56 = vpop.f32.mrb[6].mxu1  ;;  %v3732_v29 = vpack.c.bf16 %v3336_v44, %v3335_v61 }
 0x45a   :  { %v3098_v1 = vmax.f32 %v3042_v33, 0.0  ;;  %v3045_v4 = vadd.f32 %v3696_v56, %v6165_v37  ;;  %v3036_v24 = vpop.f32.mrb[7].mxu1 }
 0x45b   :  { %v3096_v17 = vmax.f32 %v3034_v31, 0.0  ;;  %v3037_v58 = vadd.f32 %v6165_v37, %v3036_v24  ;;  %3733 = vmatprep.subr.bf16.mxu0 %v3732_v29 }
 0x45c   :  { %v3121_v43 = vmul.f32 %v6172_v51, %v3098_v1  ;;  %v3099_v18 = vmax.f32 %v3045_v4, 0.0  ;;  %3735 = vmatpush3.bf16.msra.mxu0 %v3732_v29 }
 0x45d   :  { %v3097_v19 = vmax.f32 %v3037_v58, 0.0  ;;  %v3119_v28 = vmul.f32 %v6172_v51, %v3096_v17 }
 0x45e   :  { %v3141_v54 = vsel %vm6587_vm2, %v3121_v43, 0.0  ;;  %v3122_v47 = vmul.f32 %v6172_v51, %v3099_v18  ;;  %vm3304_vm2 = vcmask 1041409  }
 0x45f   :  { %3142 = vadd.xlane.f32.xlu0 %v3141_v54  ;;  %v3120_v25 = vmul.f32 %v6172_v51, %v3097_v19  ;;  %v3135_v20 = vsel %vm6589_vm4, %v3119_v28, 0.0  ;;  %vm3308_vm4 = vcmask 1043459  }
 0x460   :  { %v3144_v39 = vsel %vm6590_vm7, %v3122_v47, 0.0  ;;  %vm3310_vm7 = vcmask 1044484  }
 0x461   :  { %v3138_v45 = vsel %vm6588_vm1, %v3120_v25, 0.0  ;;  %vm3306_vm1 = vcmask 1042434  }
 0x462   :  { %3139 = vadd.xlane.f32.xlu1 %v3138_v45 }
 0x463   :  { %3136 = vadd.xlane.f32.xlu0 %v3135_v20 }
 0x467   :  { %3145 = vadd.xlane.f32.xlu0 %v3144_v39 }
 0x46a   :  { %v3699_v14 = vpop.f32.mrb[8].mxu1 }
 0x46b   :  { %v3058_v48 = vadd.f32 %v3699_v14, %v6165_v37  ;;  %v3049_v35 = vpop.f32.mrb[9].mxu1 }
 0x46c   :  { %v3050_v59 = vadd.f32 %v6165_v37, %v3049_v35  ;;  %v3700_v46 = vpop.f32.mrb[10].mxu1 }
 0x46d   :  { %v3102_v38 = vmax.f32 %v3058_v48, 0.0  ;;  %v3061_v2 = vadd.f32 %v3700_v46, %v6165_v37  ;;  %v3052_v11 = vpop.f32.mrb[11].mxu1 }
 0x46e   :  { %v3100_v9 = vmax.f32 %v3050_v59, 0.0  ;;  %v3053_v10 = vadd.f32 %v6165_v37, %v3052_v11  ;;  %v3338_v59 = vld [vmem:[#allocation17 + $0x18] sm:$0xff]  ;;  %v3340_v11 = vld [vmem:[#allocation17 + $0x28] sm:$0xff] }
 0x46f   :  { %v3125_v62 = vmul.f32 %v6172_v51, %v3102_v38  ;;  %v3103_v8 = vmax.f32 %v3061_v2, 0.0  ;;  %v3339_v2 = vld [vmem:[#allocation17 + $0x20] sm:$0xff] }
 0x470   :  { %v3123_v32 = vmul.f32 %v6172_v51, %v3100_v9  ;;  %v3101_v41 = vmax.f32 %v3053_v10, 0.0  ;;  %v3740_v9 = vpack.c.bf16 %v3340_v11, %v3339_v2 }
 0x471   :  { %v3153_v5 = vsel %vm6591_vm14, %v3125_v62, 0.0  ;;  %v3126_v13 = vmul.f32 %v6172_v51, %v3103_v8  ;;  %v3341_v62 = vld [vmem:[#allocation17 + $0x30] sm:$0xff]  ;;  %v3342_v8 = vld [vmem:[#allocation17 + $0x38] sm:$0xff]  ;;  %vm3312_vm14 = vcmask 1045509  }
 0x472   :  { %3154 = vadd.xlane.f32.xlu0 %v3153_v5  ;;  %v3147_v16 = vsel %vm6592_vm6, %v3123_v32, 0.0  ;;  %v3124_v0 = vmul.f32 %v6172_v51, %v3101_v41  ;;  %v3744_v10 = vpack.c.bf16 %v3342_v8, %v3341_v62  ;;  %v6220_v5 = vld [vmem:[#allocation3] sm:$0xff]  ;;  %v3343_v32 = vld [vmem:[#allocation17 + $0x40] sm:$0xff]  ;;  %vm3314_vm6 = vcmask 1046534  }
 0x473   :  { %v3156_v21 = vsel %vm6593_vm11, %v3126_v13, 0.0  ;;  %v3344_v41 = vld [vmem:[#allocation17 + $0x48] sm:$0xff]  ;;  %vm3327_vm11 = vcmask 261120  }
 0x474   :  { %v3150_v57 = vsel %vm6594_vm13, %v3124_v0, 0.0  ;;  %v6226_v0 = vpop.permute.xlu1 %3190  ;;  %vm3316_vm13 = vcmask 1047559  }
 0x476   :  { %3148 = vadd.xlane.f32.xlu0 %v3147_v16  ;;  %v3748_v16 = vpack.c.bf16 %v3344_v41, %v3343_v32 }
 0x47a   :  { %v3703_v26 = vpop.f32.mrb[12].mxu1  ;;  %3157 = vadd.xlane.f32.xlu0 %v3156_v21 }
 0x47b   :  { %v3074_v55 = vadd.f32 %v3703_v26, %v6165_v37  ;;  %v3065_v34 = vpop.f32.mrb[13].mxu1 }
 0x47c   :  { %v3066_v63 = vadd.f32 %v6165_v37, %v3065_v34  ;;  %v3704_v23 = vpop.f32.mrb[14].mxu1 }
 0x47d   :  { %v3106_v50 = vmax.f32 %v3074_v55, 0.0  ;;  %v3077_v42 = vadd.f32 %v3704_v23, %v6165_v37  ;;  %v3068_v30 = vpop.f32.mrb[15].mxu1  ;;  %v6602_v23 = vlaneseq }
 0x47e   :  { %v3104_v53 = vmax.f32 %v3066_v63, 0.0  ;;  %v3069_v49 = vadd.f32 %v6165_v37, %v3068_v30  ;;  %3151 = vadd.xlane.f32.xlu0 %v3150_v57 }
 0x47f   :  { %v3107_v12 = vmax.f32 %v3077_v42, 0.0  ;;  %v3129_v7 = vmul.f32 %v6172_v51, %v3106_v50  ;;  %v3238_v50 = vand.u32 127, %v6602_v23 }
 0x480   :  { %v3127_v36 = vmul.f32 %v6172_v51, %v3104_v53  ;;  %v3105_v60 = vmax.f32 %v3069_v49, 0.0 }
 0x481   :  { %v3165_v27 = vsel %vm6595_vm5, %v3129_v7, 0.0  ;;  %v3130_v40 = vmul.f32 %v6172_v51, %v3107_v12  ;;  %v3239_v53 = vadd.s32 4294967224, %v3238_v50  ;;  %vm3332_vm5 = vcmask 588800  }
 0x482   :  { %3166 = vadd.xlane.f32.xlu1 %v3165_v27  ;;  %v3159_v6 = vsel %vm6596_vm10, %v3127_v36, 0.0  ;;  %v3128_v33 = vmul.f32 %v6172_v51, %v3105_v60  ;;  %v3491_v27 = vld [vmem:[#allocation14] ss:$0 sm:$0xff]  ;;  %vm3345_vm10 = vcmask 654336  }
 0x483   :  { %3160 = vadd.xlane.f32.xlu0 %v3159_v6  ;;  %v3168_v15 = vsel %vm6597_vm9, %v3130_v40, 0.0  ;;  %v6232_v57 = vsub.s32 %v3239_v53, %v4456_v3  ;;  %v709_v29 = vadd.f32 %v6129_v52, %v3491_v27  ;;  %vm6603_vm9 = vmmov %vm6583_vm0 }
 0x484   :  { %v3162_v19 = vsel %vm6598_vm8, %v3128_v33, 0.0  ;;  %vm6604_vm8 = vmmov %vm6583_vm0 }
 0x485   :  { %v3707_v31 = vpop.f32.mrb[16].mxu1 }
 0x486   :  { %3169 = vadd.xlane.f32.xlu1 %v3168_v15  ;;  %v3090_v56 = vadd.f32 %v3707_v31, %v6165_v37  ;;  %v3081_v1 = vpop.f32.mrb[17].mxu1 }
 0x487   :  { %v3082_v4 = vadd.f32 %v6165_v37, %v3081_v1  ;;  %v3708_v24 = vpop.f32.mrb[18].mxu1 }
 0x488   :  { %v3110_v17 = vmax.f32 %v3090_v56, 0.0  ;;  %v3093_v58 = vadd.f32 %v3708_v24, %v6165_v37  ;;  %v3084_v43 = vpop.f32.mrb[19].mxu1 }
 0x489   :  { %v3108_v18 = vmax.f32 %v3082_v4, 0.0  ;;  %v3085_v54 = vadd.f32 %v6165_v37, %v3084_v43  ;;  %v3337_v37 = vld [vmem:[#allocation17 + $0x10] sm:$0xff] }
 0x48a   :  { %3163 = vadd.xlane.f32.xlu1 %v3162_v19  ;;  %v3111_v28 = vmax.f32 %v3093_v58, 0.0  ;;  %v3133_v25 = vmul.f32 %v6172_v51, %v3110_v17  ;;  %v3736_v46 = vpack.c.bf16 %v3338_v59, %v3337_v37 }
 0x48b   :  { %v3109_v45 = vmax.f32 %v3085_v54, 0.0  ;;  %v3131_v47 = vmul.f32 %v6172_v51, %v3108_v18  ;;  %v715_v18 = vand.u32 2147483647, %v709_v29 }
 0x48c   :  { %v3177_v20 = vsel %vm6583_vm0, %v3133_v25, 0.0  ;;  %v3134_v39 = vmul.f32 %v6172_v51, %v3111_v28  ;;  %3737 = vmatprep.subr.bf16.mxu0 %v3736_v46 }
 0x48d   :  { %v3171_v48 = vsel %vm6600_vm12, %v3131_v47, 0.0  ;;  %v3132_v35 = vmul.f32 %v6172_v51, %v3109_v45  ;;  %3739 = vmatpush3.bf16.msra.mxu0 %v3736_v46  ;;  %v6223_v51 = vld [vmem:[#allocation3 + $0x8] sm:$0xff]  ;;  %v712_v45 = vadd.f32 %v6131_v22, %v3491_v27  ;;  %v3209_v2 = vmul.f32 %v6220_v5, %v715_v18 }
 0x48e   :  { %3178 = vadd.xlane.f32.xlu1 %v3177_v20  ;;  %v3180_v14 = vsel %vm6599_vm15, %v3134_v39, 0.0  ;;  %3741 = vmatprep.subr.bf16.mxu0 %v3740_v9 }
 0x48f   :  { %3181 = vadd.xlane.f32.xlu0 %v3180_v14  ;;  %v3174_v38 = vsel %vm6601_vm3, %v3132_v35, 0.0  ;;  %v716_v62 = vand.u32 2147483647, %v712_v45 }
 0x491   :  { %3743 = vmatpush3.bf16.msra.mxu0 %v3740_v9 }
 0x492   :  { %3172 = vadd.xlane.f32.xlu1 %v3171_v48  ;;  %3745 = vmatprep.subr.bf16.mxu0 %v3744_v10 }
 0x495   :  { %3747 = vmatpush3.bf16.msra.mxu0 %v3744_v10 }
 0x496   :  { %3175 = vadd.xlane.f32.xlu1 %v3174_v38  ;;  %3749 = vmatprep.subr.bf16.mxu0 %v3748_v16 }
 0x499   :  { %3751 = vmatpush3.bf16.msra.mxu0 %v3748_v16 }
 0x4a5   :  { %3213 = vrot.lane.b32.xlu0 %v6220_v5, %s4246_s11 }
 0x4a7   :  { %3215 = vrot.lane.b32.xlu1 %v6223_v51, %s4246_s11 }
 0x4ec   :  { %v3143_v13 = vpop.xlane.xlu0 %3142 }
 0x4ed   :  { %v3195_v44 = vadd.f32 %v6226_v0, %v3143_v13 }
 0x4ef   :  { %v3140_v42 = vpop.xlane.xlu1 %3139  ;;  %v3251_v24 = vrot.slane %v3195_v44, %v6232_v57 }
 0x4f0   :  { %v3137_v26 = vpop.xlane.xlu0 %3136  ;;  %v3194_v12 = vadd.f32 %v6226_v0, %v3140_v42 }
 0x4f1   :  { %v3193_v7 = vadd.f32 %v6226_v0, %v3137_v26 }
 0x4f2   :  { %v3247_v40 = vrot.slane %v3194_v12, %v6232_v57 }
 0x4f3   :  { %v3243_v6 = vrot.slane %v3193_v7, %v6232_v57  ;;  %v3210_v7 = vmul.f32 %v6223_v51, %v716_v62 }
 0x4f4   :  { %v3146_v55 = vpop.xlane.xlu0 %3145 }
 0x4f5   :  { %v3196_v61 = vadd.f32 %v6226_v0, %v3146_v55  ;;  %v3305_v1 = vsel %vm3304_vm2, %v3247_v40, %v3243_v6 }
 0x4f6   :  { %v3307_v54 = vsel %vm3306_vm1, %v3251_v24, %v3305_v1 }
 0x4f7   :  { %v3255_v4 = vrot.slane %v3196_v61, %v6232_v57 }
 0x4f9   :  { %v3309_v20 = vsel %vm3308_vm4, %v3255_v4, %v3307_v54 }
 0x4ff   :  { %v3155_v34 = vpop.xlane.xlu0 %3154 }
 0x500   :  { %v3199_v28 = vadd.f32 %v6226_v0, %v3155_v34 }
 0x502   :  { %v3267_v38 = vrot.slane %v3199_v28, %v6232_v57 }
 0x503   :  { %v3149_v21 = vpop.xlane.xlu0 %3148 }
 0x504   :  { %v3197_v15 = vadd.f32 %v6226_v0, %v3149_v21 }
 0x506   :  { %v3259_v17 = vrot.slane %v3197_v15, %v6232_v57 }
 0x507   :  { %v3158_v63 = vpop.xlane.xlu0 %3157 }
 0x508   :  { %v3311_v39 = vsel %vm3310_vm7, %v3259_v17, %v3309_v20  ;;  %v3200_v37 = vadd.f32 %v6226_v0, %v3158_v63 }
 0x50a   :  { %v3271_v41 = vrot.slane %v3200_v37, %v6232_v57 }
 0x50b   :  { %v3152_v30 = vpop.xlane.xlu0 %3151 }
 0x50c   :  { %v3198_v31 = vadd.f32 %v6226_v0, %v3152_v30 }
 0x50e   :  { %v3263_v52 = vrot.slane %v3198_v31, %v6232_v57 }
 0x50f   :  { %v3167_v49 = vpop.xlane.xlu1 %3166 }
 0x510   :  { %v3161_v60 = vpop.xlane.xlu0 %3160  ;;  %v3203_v43 = vadd.f32 %v6226_v0, %v3167_v49  ;;  %v3313_v59 = vsel %vm3312_vm14, %v3263_v52, %v3311_v39 }
 0x511   :  { %v3201_v33 = vadd.f32 %v6226_v0, %v3161_v60  ;;  %v3315_v32 = vsel %vm3314_vm6, %v3267_v38, %v3313_v59 }
 0x512   :  { %v3283_v35 = vrot.slane %v3203_v43, %v6232_v57  ;;  %v3317_v63 = vsel %vm3316_vm13, %v3271_v41, %v3315_v32 }
 0x513   :  { %v3170_v36 = vpop.xlane.xlu1 %3169  ;;  %v3275_v58 = vrot.slane %v3201_v33, %v6232_v57 }
 0x514   :  { %v3204_v14 = vadd.f32 %v6226_v0, %v3170_v36 }
 0x516   :  { %v3287_v8 = vrot.slane %v3204_v14, %v6232_v57 }
 0x517   :  { %v3164_v3 = vpop.xlane.xlu1 %3163 }
 0x518   :  { %v3202_v56 = vadd.f32 %v6226_v0, %v3164_v3 }
 0x51a   :  { %v3279_v25 = vrot.slane %v3202_v56, %v6232_v57 }
 0x51b   :  { %v3179_v19 = vpop.xlane.xlu1 %3178 }
 0x51c   :  { %v3182_v47 = vpop.xlane.xlu0 %3181  ;;  %v3318_v48 = vsel %vm3304_vm2, %v3279_v25, %v3275_v58  ;;  %v3207_v16 = vadd.f32 %v6226_v0, %v3179_v19 }
 0x51d   :  { %v3319_v11 = vsel %vm3306_vm1, %v3283_v35, %v3318_v48  ;;  %v3208_v55 = vadd.f32 %v6226_v0, %v3182_v47 }
 0x51e   :  { %v3320_v5 = vsel %vm3308_vm4, %v3287_v8, %v3319_v11  ;;  %v3299_v30 = vrot.slane %v3207_v16, %v6232_v57 }
 0x51f   :  { %v3173_v46 = vpop.xlane.xlu1 %3172  ;;  %v3303_v12 = vrot.slane %v3208_v55, %v6232_v57 }
 0x520   :  { %v3205_v22 = vadd.f32 %v6226_v0, %v3173_v46  ;;  %v3214_v9 = vpop.permute.xlu0 %3213 }
 0x521   :  { %v3219_v10 = vmul.f32 %v3214_v9, %v715_v18 }
 0x522   :  { %v3291_v13 = vrot.slane %v3205_v22, %v6232_v57 }
 0x523   :  { %v3176_v26 = vpop.xlane.xlu1 %3175  ;;  %v3328_v21 = vsel %vm3327_vm11, %v3209_v2, %v3219_v10 }
 0x524   :  { %v3206_v34 = vadd.f32 %v6226_v0, %v3176_v26  ;;  %v3330_v23 = vsel %vm6603_vm9, %v3328_v21, %v709_v29  ;;  %v3321_v53 = vsel %vm3310_vm7, %v3291_v13, %v3320_v5 }
 0x525   :  { %v3333_v42 = vsel %vm3332_vm5, %v3330_v23, %v3317_v63 }
 0x526   :  { %v3295_v50 = vrot.slane %v3206_v34, %v6232_v57  ;;  %3729 = vmatprep.mubr.msk.f32.mxu0 %vm3345_vm10, %v3333_v42 }
 0x527   :  { %v3216_v49 = vpop.permute.xlu1 %3215 }
 0x528   :  { %v3322_v0 = vsel %vm3312_vm14, %v3295_v50, %v3321_v53  ;;  %v3220_v36 = vmul.f32 %v3216_v49, %v716_v62 }
 0x529   :  { %v3323_v60 = vsel %vm3314_vm6, %v3299_v30, %v3322_v0 }
 0x52a   :  { %v3329_v27 = vsel %vm3327_vm11, %v3210_v7, %v3220_v36  ;;  %v3324_v40 = vsel %vm3316_vm13, %v3303_v12, %v3323_v60 }
 0x52b   :  { %v3331_v6 = vsel %vm6604_vm8, %v3329_v27, %v712_v45 }
 0x52c   :  { %v3334_v61 = vsel %vm3332_vm5, %v3331_v6, %v3324_v40 }
 0x52d   :  { %3730 = vmatmul.mubr.msk.f32.vlgmr.msra.gmra.mrb[24].mxu0 %vm3345_vm10, %v3334_v61 }
 0x600   :  { %v3731_v57 = vpop.f32.mrb[24].mxu0 }
 0x601   :  { %3428 = vst [vmem:[#allocation18 + $0x8] sm:$0xff] %v3731_v57  ;;  %v3418_v44 = vpop.f32.mrb[25].mxu0 }
 0x602   :  { %3427 = vst [vmem:[#allocation18] sm:$0xff] %v3418_v44 }
 0x603   :  { %4202 = shalt.err (!%p4199_p6)
}
 0x604   :  { %s4203_s25 = scalar_lea.hbm %s6320_s15, 256 }
 0x605   :  { %p4204_p7 = scmp.ne.s32.totalorder %s6320_s15, %s4203_s25  ;;  %p4207_p8 = scmp.lt.u32.totalorder %s4203_s25, %s6320_s15 }
 0x607   :  { %p4209_p9 = pnand %p4207_p8, %p4204_p7 }
 0x609   :  { %4212 = shalt.err (!%p4209_p9)
}
 0x60a   :  { %3440 = dma.vmem_to_hbm [thread:$0]  %s3435_s26, 256, %s6320_s15, [#allocation5], %s4228_s21, %s4228_s21, %s4229_s28  }
 0x60b   :  { %4223 = dma.done.wait [#allocation5], 256  }
 0x60c   :  { %4224 = vsyncadd [#allocation5], 4294967040 }
 0x60d   :  { %3444 = vsyncpa [#allocation4], 1 }
 0x60e   :  { %3445 = vsyncpa [#allocation7], 1 }
 0x60f   :  { %3446 = vsyncpa [#allocation10], 1 }
 0x610   :  { %3447 = vsyncpa [#allocation13], 1 }
 0x611   :  { %3448 = vsyncpa [#allocation16], 1 }
 0x612   :  { %3449 = vsyncpa [#allocation5], 1 }

</bundles_post_ra>
